<compile_context>
chip_gen: v7x
topology: tpu7x:2x2x1
jax: 0.10.0
libtpu: 0.0.40
codegen_flags: <defaults>
</compile_context>

<pallas_src>
import jax
import jax.numpy as jnp
from jax import lax
from jax.experimental import pallas as pl
from jax.experimental.pallas import tpu as pltpu

K = 7           # depthwise kernel size (and the only PyTorch-valid spatial size)
BN_EPS = 1e-5


# --------------------------------------------------------------------------- #
# Fused kernel.
#   Phase 0 (grid step 0 only):
#     y[n, c]   = sum_{u,v} x[n, u, v, c] * w[u, v, c] + b[c]        (depthwise)
#     scale/shift = folded training-mode BatchNorm (biased batch stats over N)
#   Every grid step (batch tile of size block_n):
#     h   = y * scale + shift
#     h   = relu(h @ w1 + b1) @ w1 + b1          (bf16 MXU operands, f32 accum)
#     out = x + h  (broadcast over the 7x7 spatial extent)
# --------------------------------------------------------------------------- #
def conv_ffn_kernel(x_ref, dw_w_ref, dw_b_ref, gamma_ref, beta_ref,
                    w1_ref, b1_ref, out_ref, y_sc, scale_sc, shift_sc):
    N = x_ref.shape[0]
    C = x_ref.shape[3]
    block_n = out_ref.shape[0]
    n = pl.program_id(0)

    # ---- Phase 0: depthwise 7x7 over the full batch + folded BN ------------ #
    @pl.when(n == 0)
    def _():
        # Running accumulation over the 7 kernel rows: live set ~ one (N,7,C)
        # row slab + the (N,C) accumulator, instead of the full 49-tap product.
        acc = jnp.zeros((N, C), jnp.float32)
        for u in range(K):                                   # static 7-iter loop
            xu = x_ref[:, u, :, :].astype(jnp.float32)       # (N, K, C)
            wu = dw_w_ref[u, :, :].astype(jnp.float32)       # (K, C), loaded once
            acc = acc + jnp.sum(xu * wu[None, :, :], axis=1) # sublane reduce (XLU)
        y = acc + dw_b_ref[...].astype(jnp.float32)          # (N, C) + (1, C)
        y_sc[...] = y

        # Training-mode BatchNorm: biased batch stats (spatial extent is 1x1),
        # folded into one per-channel FMA.
        mean = jnp.mean(y, axis=0, keepdims=True)                      # (1, C)
        var = jnp.mean(jnp.square(y - mean), axis=0, keepdims=True)    # biased
        scale = gamma_ref[...].astype(jnp.float32) * lax.rsqrt(var + BN_EPS)
        scale_sc[...] = scale
        shift_sc[...] = beta_ref[...].astype(jnp.float32) - mean * scale

    # ---- Per-step FFN on a (block_n, C) slice + residual -------------------- #
    start = pl.multiple_of(n * block_n, block_n)
    h = y_sc[pl.ds(start, block_n), :] * scale_sc[...] + shift_sc[...]  # f32

    w1 = w1_ref[...]                                 # already bf16 (pre-cast)
    b1 = b1_ref[...].astype(jnp.float32)
    h = jnp.dot(h.astype(jnp.bfloat16), w1, preferred_element_type=jnp.float32) + b1
    h = jnp.maximum(h, 0.0)
    h = jnp.dot(h.astype(jnp.bfloat16), w1, preferred_element_type=jnp.float32) + b1

    # Residual: (block_n,1,1,C) broadcasts over (block_n,7,7,C), matching the
    # PyTorch (N,C,1,1) + (N,C,H,W) broadcast.  x is re-read from the resident
    # VMEM copy only here.
    x_tile = x_ref[pl.ds(start, block_n), :, :, :].astype(jnp.float32)
    out_ref[...] = (x_tile + h[:, None, None, :]).astype(out_ref.dtype)


# --------------------------------------------------------------------------- #
# Wrapper (NHWC).  dw_w: (K, K, C); dw_b/gamma/beta/b1: (1, C) or (C,);
# w1: (C_in, C_out) with C_in == C_out == C.
# --------------------------------------------------------------------------- #
def conv_ffn(x, dw_w, dw_b, gamma, beta, w1, b1, *, block_n=None):
    N, H, W, C = x.shape
    assert H == K and W == K, "residual only valid when 7x7 output is spatially 1x1"
    assert w1.shape == (C, C), "in_channels must equal out_channels"

    if block_n is None:
        block_n = N if N <= 128 else 128
    block_n = min(block_n, N)
    assert N % block_n == 0
    if block_n < N:
        assert block_n % 8 == 0, "multi-step batch tiles must be sublane aligned"
    n_blocks = N // block_n

    itemsize = x.dtype.itemsize
    x_bytes = N * K * K * C * itemsize
    # The fused design keeps the full input resident in VMEM (BN stats couple the
    # whole batch); guard against shapes where that no longer fits comfortably.
    assert x_bytes <= 24 * 1024 * 1024, \
        "input too large for the fused single-kernel ConvFFN; tile the batch"

    # Pre-cast w1 to bf16 once in HBM (halves its DMA/VMEM cost, removes the
    # per-step in-kernel cast).  Small per-channel vectors normalized to (1, C).
    w1_bf16 = w1.astype(jnp.bfloat16)
    dw_b2 = dw_b.reshape(1, C).astype(jnp.float32)
    gamma2 = gamma.reshape(1, C).astype(jnp.float32)
    beta2 = beta.reshape(1, C).astype(jnp.float32)
    b12 = b1.reshape(1, C).astype(jnp.float32)

    # Rough VMEM working set (x + double-buffered out tiles + w1 + scratch);
    # stays within the default scoped limit at these sizes, clamp for v7x (64 MiB).
    working_set = (2 * x_bytes
                   + 2 * block_n * K * K * C * itemsize
                   + 2 * C * C * 2
                   + N * C * 4 + 8 * C * 4)
    vmem_limit = int(min(64 * 1024 * 1024, max(32 * 1024 * 1024, 2 * working_set)))

    out = pl.pallas_call(
        conv_ffn_kernel,
        out_shape=jax.ShapeDtypeStruct((N, K, K, C), x.dtype),
        grid=(n_blocks,),
        in_specs=[
            pl.BlockSpec((N, K, K, C), lambda n: (0, 0, 0, 0)),   # x (resident)
            pl.BlockSpec((K, K, C), lambda n: (0, 0, 0)),          # depthwise w
            pl.BlockSpec((1, C), lambda n: (0, 0)),                # depthwise b
            pl.BlockSpec((1, C), lambda n: (0, 0)),                # BN gamma
            pl.BlockSpec((1, C), lambda n: (0, 0)),                # BN beta
            pl.BlockSpec((C, C), lambda n: (0, 0)),                # w1 (bf16)
            pl.BlockSpec((1, C), lambda n: (0, 0)),                # b1
        ],
        out_specs=pl.BlockSpec((block_n, K, K, C), lambda n: (n, 0, 0, 0)),
        scratch_shapes=[
            pltpu.VMEM((N, C), jnp.float32),    # depthwise output y
            pltpu.VMEM((1, C), jnp.float32),    # folded BN scale
            pltpu.VMEM((1, C), jnp.float32),    # folded BN shift
        ],
        compiler_params=pltpu.CompilerParams(
            dimension_semantics=("arbitrary",),   # scratch carries phase-0 results
            vmem_limit_bytes=vmem_limit),
    )(x, dw_w, dw_b2, gamma2, beta2, w1_bf16, b12)
    return out


# --------------------------------------------------------------------------- #
# Pure-JAX reference (NHWC).  matmul_dtype lets us check both against the exact
# bf16-operand math the kernel uses (tight tolerance) and full-f32 math (loose).
# --------------------------------------------------------------------------- #
def conv_ffn_reference(x, dw_w, dw_b, gamma, beta, w1, b1,
                       matmul_dtype=jnp.float32):
    N, H, W, C = x.shape
    xf = x.astype(jnp.float32)
    y = jnp.einsum("nuvc,uvc->nc", xf, dw_w.astype(jnp.float32)) + dw_b.reshape(C)
    mean = y.mean(axis=0)
    var = ((y - mean) ** 2).mean(axis=0)
    h = (y - mean) * jax.lax.rsqrt(var + BN_EPS) * gamma.reshape(C) + beta.reshape(C)
    w1c = w1.astype(matmul_dtype)
    h = jnp.dot(h.astype(matmul_dtype), w1c,
                preferred_element_type=jnp.float32) + b1.reshape(C)
    h = jnp.maximum(h, 0.0)
    h = jnp.dot(h.astype(matmul_dtype), w1c,
                preferred_element_type=jnp.float32) + b1.reshape(C)
    return (xf + h[:, None, None, :]).astype(x.dtype)


if __name__ == "__main__":
    # Small but lane-dense shapes: the forward pass only type-checks for
    # H == W == 7 and in_channels == out_channels; C is a multiple of 128 so
    # channels fill the 128-lane axis and stores are unmasked.
    N, C = 16, 256
    H = W = K

    key = jax.random.PRNGKey(0)
    k1, k2, k3, k4, k5, k6, kx = jax.random.split(key, 7)

    dw_w = 0.05 * jax.random.normal(k1, (K, K, C), jnp.float32)      # depthwise weight
    dw_b = 0.05 * jax.random.normal(k2, (1, C), jnp.float32)         # depthwise bias
    gamma = 1.0 + 0.1 * jax.random.normal(k3, (1, C), jnp.float32)   # BN weight
    beta = 0.1 * jax.random.normal(k4, (1, C), jnp.float32)          # BN bias
    w1 = jax.random.normal(k5, (C, C), jnp.float32) / jnp.sqrt(C)    # conv_1x1 (C_in, C_out)
    b1 = 0.05 * jax.random.normal(k6, (1, C), jnp.float32)           # conv_1x1 bias

    x = jax.random.normal(kx, (N, H, W, C), jnp.float32)             # NHWC input

    out = conv_ffn(x, dw_w, dw_b, gamma, beta, w1, b1)
    out = jax.block_until_ready(out)
    assert out.shape == (N, H, W, C)

    # Tight check against a reference using the same bf16-operand matmul math.
    ref_bf16 = conv_ffn_reference(x, dw_w, dw_b, gamma, beta, w1, b1,
                                  matmul_dtype=jnp.bfloat16)
    assert jnp.allclose(out, ref_bf16, atol=5e-3, rtol=5e-3), \
        "mismatch vs bf16-matched reference"

    # Loose check against the full-f32 reference (bf16 MXU operands -> looser tol).
    ref_f32 = conv_ffn_reference(x, dw_w, dw_b, gamma, beta, w1, b1,
                                 matmul_dtype=jnp.float32)
    assert jnp.allclose(out, ref_f32, atol=5e-2, rtol=5e-2), \
        "mismatch vs f32 reference"

    print("KERNEL_OK")
</pallas_src>

<mosaic_0001>
module attributes {stable_mosaic.version = 11 : i64} {
  func.func @conv_ffn_kernel(%arg0: i32, %arg1: memref<16x7x7x256xf32, #tpu.memory_space<vmem>>, %arg2: memref<7x7x256xf32, #tpu.memory_space<vmem>>, %arg3: memref<1x256xf32, #tpu.memory_space<vmem>>, %arg4: memref<1x256xf32, #tpu.memory_space<vmem>>, %arg5: memref<1x256xf32, #tpu.memory_space<vmem>>, %arg6: memref<256x256xbf16, #tpu.memory_space<vmem>>, %arg7: memref<1x256xf32, #tpu.memory_space<vmem>>, %arg8: memref<16x7x7x256xf32, #tpu.memory_space<vmem>>, %arg9: memref<16x256xf32, #tpu.memory_space<vmem>>, %arg10: memref<1x256xf32, #tpu.memory_space<vmem>>, %arg11: memref<1x256xf32, #tpu.memory_space<vmem>>) attributes {dimension_semantics = [#tpu.dimension_semantics<arbitrary>], iteration_bounds = array<i64: 1>, scalar_prefetch = 0 : i64, scratch_operands = 3 : i64, tpu.core_type = #tpu.core_type<tc>, window_params = [{pipeline_mode = #tpu.pipeline_mode<synchronous>, transform_indices = @transform_0, window_bounds = array<i64: 16, 7, 7, 256>}, {pipeline_mode = #tpu.pipeline_mode<synchronous>, transform_indices = @transform_1, window_bounds = array<i64: 7, 7, 256>}, {pipeline_mode = #tpu.pipeline_mode<synchronous>, transform_indices = @transform_2, window_bounds = array<i64: 1, 256>}, {pipeline_mode = #tpu.pipeline_mode<synchronous>, transform_indices = @transform_3, window_bounds = array<i64: 1, 256>}, {pipeline_mode = #tpu.pipeline_mode<synchronous>, transform_indices = @transform_4, window_bounds = array<i64: 1, 256>}, {pipeline_mode = #tpu.pipeline_mode<synchronous>, transform_indices = @transform_5, window_bounds = array<i64: 256, 256>}, {pipeline_mode = #tpu.pipeline_mode<synchronous>, transform_indices = @transform_6, window_bounds = array<i64: 1, 256>}, {transform_indices = @transform_7, window_bounds = array<i64: 16, 7, 7, 256>}]} {
    %c0_i32 = arith.constant 0 : i32
    %0 = arith.cmpi eq, %arg0, %c0_i32 : i32
    %1 = arith.extui %0 : i1 to i32
    %c0_i32_0 = arith.constant 0 : i32
    %2 = arith.cmpi ne, %1, %c0_i32_0 : i32
    scf.if %2 {
      %cst_18 = arith.constant 0.000000e+00 : f32
      %31 = vector.broadcast %cst_18 : f32 to vector<16x256xf32>
      %c0_19 = arith.constant 0 : index
      %c0_20 = arith.constant 0 : index
      %c0_21 = arith.constant 0 : index
      %c0_22 = arith.constant 0 : index
      %32 = vector.load %arg1[%c0_19, %c0_20, %c0_21, %c0_22] : memref<16x7x7x256xf32, #tpu.memory_space<vmem>>, vector<16x1x7x256xf32>
      %33 = vector.shape_cast %32 : vector<16x1x7x256xf32> to vector<16x7x256xf32>
      %c0_23 = arith.constant 0 : index
      %c0_24 = arith.constant 0 : index
      %c0_25 = arith.constant 0 : index
      %34 = vector.load %arg2[%c0_23, %c0_24, %c0_25] : memref<7x7x256xf32, #tpu.memory_space<vmem>>, vector<1x7x256xf32>
      %35 = vector.shape_cast %34 : vector<1x7x256xf32> to vector<7x256xf32>
      %36 = vector.shape_cast %35 : vector<7x256xf32> to vector<1x7x256xf32>
      %37 = vector.broadcast %36 : vector<1x7x256xf32> to vector<16x7x256xf32>
      %38 = arith.mulf %33, %37 : vector<16x7x256xf32>
      %cst_26 = arith.constant dense<0.000000e+00> : vector<16x256xf32>
      %39 = vector.multi_reduction <add>, %38, %cst_26 [1] : vector<16x7x256xf32> to vector<16x256xf32>
      %40 = arith.addf %31, %39 : vector<16x256xf32>
      %c0_27 = arith.constant 0 : index
      %c1 = arith.constant 1 : index
      %c0_28 = arith.constant 0 : index
      %c0_29 = arith.constant 0 : index
      %41 = vector.load %arg1[%c0_27, %c1, %c0_28, %c0_29] : memref<16x7x7x256xf32, #tpu.memory_space<vmem>>, vector<16x1x7x256xf32>
      %42 = vector.shape_cast %41 : vector<16x1x7x256xf32> to vector<16x7x256xf32>
      %c1_30 = arith.constant 1 : index
      %c0_31 = arith.constant 0 : index
      %c0_32 = arith.constant 0 : index
      %43 = vector.load %arg2[%c1_30, %c0_31, %c0_32] : memref<7x7x256xf32, #tpu.memory_space<vmem>>, vector<1x7x256xf32>
      %44 = vector.shape_cast %43 : vector<1x7x256xf32> to vector<7x256xf32>
      %45 = vector.shape_cast %44 : vector<7x256xf32> to vector<1x7x256xf32>
      %46 = vector.broadcast %45 : vector<1x7x256xf32> to vector<16x7x256xf32>
      %47 = arith.mulf %42, %46 : vector<16x7x256xf32>
      %cst_33 = arith.constant dense<0.000000e+00> : vector<16x256xf32>
      %48 = vector.multi_reduction <add>, %47, %cst_33 [1] : vector<16x7x256xf32> to vector<16x256xf32>
      %49 = arith.addf %40, %48 : vector<16x256xf32>
      %c0_34 = arith.constant 0 : index
      %c2 = arith.constant 2 : index
      %c0_35 = arith.constant 0 : index
      %c0_36 = arith.constant 0 : index
      %50 = vector.load %arg1[%c0_34, %c2, %c0_35, %c0_36] : memref<16x7x7x256xf32, #tpu.memory_space<vmem>>, vector<16x1x7x256xf32>
      %51 = vector.shape_cast %50 : vector<16x1x7x256xf32> to vector<16x7x256xf32>
      %c2_37 = arith.constant 2 : index
      %c0_38 = arith.constant 0 : index
      %c0_39 = arith.constant 0 : index
      %52 = vector.load %arg2[%c2_37, %c0_38, %c0_39] : memref<7x7x256xf32, #tpu.memory_space<vmem>>, vector<1x7x256xf32>
      %53 = vector.shape_cast %52 : vector<1x7x256xf32> to vector<7x256xf32>
      %54 = vector.shape_cast %53 : vector<7x256xf32> to vector<1x7x256xf32>
      %55 = vector.broadcast %54 : vector<1x7x256xf32> to vector<16x7x256xf32>
      %56 = arith.mulf %51, %55 : vector<16x7x256xf32>
      %cst_40 = arith.constant dense<0.000000e+00> : vector<16x256xf32>
      %57 = vector.multi_reduction <add>, %56, %cst_40 [1] : vector<16x7x256xf32> to vector<16x256xf32>
      %58 = arith.addf %49, %57 : vector<16x256xf32>
      %c0_41 = arith.constant 0 : index
      %c3 = arith.constant 3 : index
      %c0_42 = arith.constant 0 : index
      %c0_43 = arith.constant 0 : index
      %59 = vector.load %arg1[%c0_41, %c3, %c0_42, %c0_43] : memref<16x7x7x256xf32, #tpu.memory_space<vmem>>, vector<16x1x7x256xf32>
      %60 = vector.shape_cast %59 : vector<16x1x7x256xf32> to vector<16x7x256xf32>
      %c3_44 = arith.constant 3 : index
      %c0_45 = arith.constant 0 : index
      %c0_46 = arith.constant 0 : index
      %61 = vector.load %arg2[%c3_44, %c0_45, %c0_46] : memref<7x7x256xf32, #tpu.memory_space<vmem>>, vector<1x7x256xf32>
      %62 = vector.shape_cast %61 : vector<1x7x256xf32> to vector<7x256xf32>
      %63 = vector.shape_cast %62 : vector<7x256xf32> to vector<1x7x256xf32>
      %64 = vector.broadcast %63 : vector<1x7x256xf32> to vector<16x7x256xf32>
      %65 = arith.mulf %60, %64 : vector<16x7x256xf32>
      %cst_47 = arith.constant dense<0.000000e+00> : vector<16x256xf32>
      %66 = vector.multi_reduction <add>, %65, %cst_47 [1] : vector<16x7x256xf32> to vector<16x256xf32>
      %67 = arith.addf %58, %66 : vector<16x256xf32>
      %c0_48 = arith.constant 0 : index
      %c4 = arith.constant 4 : index
      %c0_49 = arith.constant 0 : index
      %c0_50 = arith.constant 0 : index
      %68 = vector.load %arg1[%c0_48, %c4, %c0_49, %c0_50] : memref<16x7x7x256xf32, #tpu.memory_space<vmem>>, vector<16x1x7x256xf32>
      %69 = vector.shape_cast %68 : vector<16x1x7x256xf32> to vector<16x7x256xf32>
      %c4_51 = arith.constant 4 : index
      %c0_52 = arith.constant 0 : index
      %c0_53 = arith.constant 0 : index
      %70 = vector.load %arg2[%c4_51, %c0_52, %c0_53] : memref<7x7x256xf32, #tpu.memory_space<vmem>>, vector<1x7x256xf32>
      %71 = vector.shape_cast %70 : vector<1x7x256xf32> to vector<7x256xf32>
      %72 = vector.shape_cast %71 : vector<7x256xf32> to vector<1x7x256xf32>
      %73 = vector.broadcast %72 : vector<1x7x256xf32> to vector<16x7x256xf32>
      %74 = arith.mulf %69, %73 : vector<16x7x256xf32>
      %cst_54 = arith.constant dense<0.000000e+00> : vector<16x256xf32>
      %75 = vector.multi_reduction <add>, %74, %cst_54 [1] : vector<16x7x256xf32> to vector<16x256xf32>
      %76 = arith.addf %67, %75 : vector<16x256xf32>
      %c0_55 = arith.constant 0 : index
      %c5 = arith.constant 5 : index
      %c0_56 = arith.constant 0 : index
      %c0_57 = arith.constant 0 : index
      %77 = vector.load %arg1[%c0_55, %c5, %c0_56, %c0_57] : memref<16x7x7x256xf32, #tpu.memory_space<vmem>>, vector<16x1x7x256xf32>
      %78 = vector.shape_cast %77 : vector<16x1x7x256xf32> to vector<16x7x256xf32>
      %c5_58 = arith.constant 5 : index
      %c0_59 = arith.constant 0 : index
      %c0_60 = arith.constant 0 : index
      %79 = vector.load %arg2[%c5_58, %c0_59, %c0_60] : memref<7x7x256xf32, #tpu.memory_space<vmem>>, vector<1x7x256xf32>
      %80 = vector.shape_cast %79 : vector<1x7x256xf32> to vector<7x256xf32>
      %81 = vector.shape_cast %80 : vector<7x256xf32> to vector<1x7x256xf32>
      %82 = vector.broadcast %81 : vector<1x7x256xf32> to vector<16x7x256xf32>
      %83 = arith.mulf %78, %82 : vector<16x7x256xf32>
      %cst_61 = arith.constant dense<0.000000e+00> : vector<16x256xf32>
      %84 = vector.multi_reduction <add>, %83, %cst_61 [1] : vector<16x7x256xf32> to vector<16x256xf32>
      %85 = arith.addf %76, %84 : vector<16x256xf32>
      %c0_62 = arith.constant 0 : index
      %c6 = arith.constant 6 : index
      %c0_63 = arith.constant 0 : index
      %c0_64 = arith.constant 0 : index
      %86 = vector.load %arg1[%c0_62, %c6, %c0_63, %c0_64] : memref<16x7x7x256xf32, #tpu.memory_space<vmem>>, vector<16x1x7x256xf32>
      %87 = vector.shape_cast %86 : vector<16x1x7x256xf32> to vector<16x7x256xf32>
      %c6_65 = arith.constant 6 : index
      %c0_66 = arith.constant 0 : index
      %c0_67 = arith.constant 0 : index
      %88 = vector.load %arg2[%c6_65, %c0_66, %c0_67] : memref<7x7x256xf32, #tpu.memory_space<vmem>>, vector<1x7x256xf32>
      %89 = vector.shape_cast %88 : vector<1x7x256xf32> to vector<7x256xf32>
      %90 = vector.shape_cast %89 : vector<7x256xf32> to vector<1x7x256xf32>
      %91 = vector.broadcast %90 : vector<1x7x256xf32> to vector<16x7x256xf32>
      %92 = arith.mulf %87, %91 : vector<16x7x256xf32>
      %cst_68 = arith.constant dense<0.000000e+00> : vector<16x256xf32>
      %93 = vector.multi_reduction <add>, %92, %cst_68 [1] : vector<16x7x256xf32> to vector<16x256xf32>
      %94 = arith.addf %85, %93 : vector<16x256xf32>
      %c0_69 = arith.constant 0 : index
      %c0_70 = arith.constant 0 : index
      %95 = vector.load %arg3[%c0_69, %c0_70] : memref<1x256xf32, #tpu.memory_space<vmem>>, vector<1x256xf32>
      %96 = vector.broadcast %95 : vector<1x256xf32> to vector<16x256xf32>
      %97 = arith.addf %94, %96 : vector<16x256xf32>
      %c0_71 = arith.constant 0 : index
      %c0_72 = arith.constant 0 : index
      %98 = vector.load %arg9[%c0_71, %c0_72] : memref<16x256xf32, #tpu.memory_space<vmem>>, vector<16x256xf32>
      tpu.vector_store %arg9[%c0_71, %c0_72], %97 {strides = array<i32>} : memref<16x256xf32, #tpu.memory_space<vmem>>, vector<16x256xf32>,
      %cst_73 = arith.constant dense<0.000000e+00> : vector<256xf32>
      %99 = vector.multi_reduction <add>, %97, %cst_73 [0] : vector<16x256xf32> to vector<256xf32>
      %100 = vector.shape_cast %99 : vector<256xf32> to vector<1x256xf32>
      %cst_74 = arith.constant 1.600000e+01 : f32
      %101 = vector.broadcast %cst_74 : f32 to vector<1x256xf32>
      %102 = arith.divf %100, %101 : vector<1x256xf32>
      %103 = vector.broadcast %102 : vector<1x256xf32> to vector<16x256xf32>
      %104 = arith.subf %97, %103 : vector<16x256xf32>
      %105 = arith.mulf %104, %104 : vector<16x256xf32>
      %cst_75 = arith.constant dense<0.000000e+00> : vector<256xf32>
      %106 = vector.multi_reduction <add>, %105, %cst_75 [0] : vector<16x256xf32> to vector<256xf32>
      %107 = vector.shape_cast %106 : vector<256xf32> to vector<1x256xf32>
      %cst_76 = arith.constant 1.600000e+01 : f32
      %108 = vector.broadcast %cst_76 : f32 to vector<1x256xf32>
      %109 = arith.divf %107, %108 : vector<1x256xf32>
      %c0_77 = arith.constant 0 : index
      %c0_78 = arith.constant 0 : index
      %110 = vector.load %arg4[%c0_77, %c0_78] : memref<1x256xf32, #tpu.memory_space<vmem>>, vector<1x256xf32>
      %cst_79 = arith.constant 9.99999974E-6 : f32
      %111 = vector.broadcast %cst_79 : f32 to vector<1x256xf32>
      %112 = arith.addf %109, %111 : vector<1x256xf32>
      %113 = math.rsqrt %112 : vector<1x256xf32>
      %114 = arith.mulf %110, %113 : vector<1x256xf32>
      %c0_80 = arith.constant 0 : index
      %c0_81 = arith.constant 0 : index
      %115 = vector.load %arg10[%c0_80, %c0_81] : memref<1x256xf32, #tpu.memory_space<vmem>>, vector<1x256xf32>
      tpu.vector_store %arg10[%c0_80, %c0_81], %114 {strides = array<i32>} : memref<1x256xf32, #tpu.memory_space<vmem>>, vector<1x256xf32>,
      %c0_82 = arith.constant 0 : index
      %c0_83 = arith.constant 0 : index
      %116 = vector.load %arg5[%c0_82, %c0_83] : memref<1x256xf32, #tpu.memory_space<vmem>>, vector<1x256xf32>
      %117 = arith.mulf %102, %114 : vector<1x256xf32>
      %118 = arith.subf %116, %117 : vector<1x256xf32>
      %c0_84 = arith.constant 0 : index
      %c0_85 = arith.constant 0 : index
      %119 = vector.load %arg11[%c0_84, %c0_85] : memref<1x256xf32, #tpu.memory_space<vmem>>, vector<1x256xf32>
      tpu.vector_store %arg11[%c0_84, %c0_85], %118 {strides = array<i32>} : memref<1x256xf32, #tpu.memory_space<vmem>>, vector<1x256xf32>,
    } else {
    }
    %c16_i32 = arith.constant 16 : i32
    %3 = arith.muli %arg0, %c16_i32 : i32
    %4 = tpu.assume_multiple %3, 16 : i32
    %5 = arith.index_cast %4 : i32 to index
    %c0 = arith.constant 0 : index
    %6 = vector.load %arg9[%5, %c0] : memref<16x256xf32, #tpu.memory_space<vmem>>, vector<16x256xf32>
    %c0_1 = arith.constant 0 : index
    %c0_2 = arith.constant 0 : index
    %7 = vector.load %arg10[%c0_1, %c0_2] : memref<1x256xf32, #tpu.memory_space<vmem>>, vector<1x256xf32>
    %8 = vector.broadcast %7 : vector<1x256xf32> to vector<16x256xf32>
    %9 = arith.mulf %6, %8 : vector<16x256xf32>
    %c0_3 = arith.constant 0 : index
    %c0_4 = arith.constant 0 : index
    %10 = vector.load %arg11[%c0_3, %c0_4] : memref<1x256xf32, #tpu.memory_space<vmem>>, vector<1x256xf32>
    %11 = vector.broadcast %10 : vector<1x256xf32> to vector<16x256xf32>
    %12 = arith.addf %9, %11 : vector<16x256xf32>
    %c0_5 = arith.constant 0 : index
    %c0_6 = arith.constant 0 : index
    %13 = vector.load %arg6[%c0_5, %c0_6] : memref<256x256xbf16, #tpu.memory_space<vmem>>, vector<256x256xbf16>
    %c0_7 = arith.constant 0 : index
    %c0_8 = arith.constant 0 : index
    %14 = vector.load %arg7[%c0_7, %c0_8] : memref<1x256xf32, #tpu.memory_space<vmem>>, vector<1x256xf32>
    %15 = arith.truncf %12 : vector<16x256xf32> to vector<16x256xbf16>
    %cst = arith.constant dense<0.000000e+00> : vector<16x256xf32>
    %16 = tpu.matmul %15, %13, %cst {dimension_numbers = #tpu.dot_dimension_numbers<[1], [0], [0], [1], [0, 0, 1, 1], [], []>} : vector<16x256xbf16>, vector<256x256xbf16>, vector<16x256xf32> -> vector<16x256xf32>
    %17 = vector.broadcast %14 : vector<1x256xf32> to vector<16x256xf32>
    %18 = arith.addf %16, %17 : vector<16x256xf32>
    %cst_9 = arith.constant 0.000000e+00 : f32
    %19 = vector.broadcast %cst_9 : f32 to vector<16x256xf32>
    %20 = arith.maximumf %18, %19 : vector<16x256xf32>
    %21 = arith.truncf %20 : vector<16x256xf32> to vector<16x256xbf16>
    %cst_10 = arith.constant dense<0.000000e+00> : vector<16x256xf32>
    %22 = tpu.matmul %21, %13, %cst_10 {dimension_numbers = #tpu.dot_dimension_numbers<[1], [0], [0], [1], [0, 0, 1, 1], [], []>} : vector<16x256xbf16>, vector<256x256xbf16>, vector<16x256xf32> -> vector<16x256xf32>
    %23 = vector.broadcast %14 : vector<1x256xf32> to vector<16x256xf32>
    %24 = arith.addf %22, %23 : vector<16x256xf32>
    %25 = arith.index_cast %4 : i32 to index
    %c0_11 = arith.constant 0 : index
    %c0_12 = arith.constant 0 : index
    %c0_13 = arith.constant 0 : index
    %26 = vector.load %arg1[%25, %c0_11, %c0_12, %c0_13] : memref<16x7x7x256xf32, #tpu.memory_space<vmem>>, vector<16x7x7x256xf32>
    %27 = vector.shape_cast %24 : vector<16x256xf32> to vector<16x1x1x256xf32>
    %28 = vector.broadcast %27 : vector<16x1x1x256xf32> to vector<16x7x7x256xf32>
    %29 = arith.addf %26, %28 : vector<16x7x7x256xf32>
    %c0_14 = arith.constant 0 : index
    %c0_15 = arith.constant 0 : index
    %c0_16 = arith.constant 0 : index
    %c0_17 = arith.constant 0 : index
    %30 = vector.load %arg8[%c0_14, %c0_15, %c0_16, %c0_17] : memref<16x7x7x256xf32, #tpu.memory_space<vmem>>, vector<16x7x7x256xf32>
    tpu.vector_store %arg8[%c0_14, %c0_15, %c0_16, %c0_17], %29 {strides = array<i32>} : memref<16x7x7x256xf32, #tpu.memory_space<vmem>>, vector<16x7x7x256xf32>,
    return
  }
  func.func @transform_0(%arg0: i32) -> (i32, i32, i32, i32) {
    %c0_i32 = arith.constant 0 : i32
    %c0_i32_0 = arith.constant 0 : i32
    %c0_i32_1 = arith.constant 0 : i32
    %c0_i32_2 = arith.constant 0 : i32
    %c0_i32_3 = arith.constant 0 : i32
    return %c0_i32, %c0_i32_0, %c0_i32_1, %c0_i32_2 : i32, i32, i32, i32
  }
  func.func @transform_1(%arg0: i32) -> (i32, i32, i32) {
    %c0_i32 = arith.constant 0 : i32
    %c0_i32_0 = arith.constant 0 : i32
    %c0_i32_1 = arith.constant 0 : i32
    %c0_i32_2 = arith.constant 0 : i32
    return %c0_i32, %c0_i32_0, %c0_i32_1 : i32, i32, i32
  }
  func.func @transform_2(%arg0: i32) -> (i32, i32) {
    %c0_i32 = arith.constant 0 : i32
    %c0_i32_0 = arith.constant 0 : i32
    %c0_i32_1 = arith.constant 0 : i32
    return %c0_i32, %c0_i32_0 : i32, i32
  }
  func.func @transform_3(%arg0: i32) -> (i32, i32) {
    %c0_i32 = arith.constant 0 : i32
    %c0_i32_0 = arith.constant 0 : i32
    %c0_i32_1 = arith.constant 0 : i32
    return %c0_i32, %c0_i32_0 : i32, i32
  }
  func.func @transform_4(%arg0: i32) -> (i32, i32) {
    %c0_i32 = arith.constant 0 : i32
    %c0_i32_0 = arith.constant 0 : i32
    %c0_i32_1 = arith.constant 0 : i32
    return %c0_i32, %c0_i32_0 : i32, i32
  }
  func.func @transform_5(%arg0: i32) -> (i32, i32) {
    %c0_i32 = arith.constant 0 : i32
    %c0_i32_0 = arith.constant 0 : i32
    %c0_i32_1 = arith.constant 0 : i32
    return %c0_i32, %c0_i32_0 : i32, i32
  }
  func.func @transform_6(%arg0: i32) -> (i32, i32) {
    %c0_i32 = arith.constant 0 : i32
    %c0_i32_0 = arith.constant 0 : i32
    %c0_i32_1 = arith.constant 0 : i32
    return %c0_i32, %c0_i32_0 : i32, i32
  }
  func.func @transform_7(%arg0: i32) -> (i32, i32, i32, i32) {
    %c0_i32 = arith.constant 0 : i32
    %c0_i32_0 = arith.constant 0 : i32
    %c0_i32_1 = arith.constant 0 : i32
    %c0_i32_2 = arith.constant 0 : i32
    return %arg0, %c0_i32, %c0_i32_0, %c0_i32_1 : i32, i32, i32, i32
  }
}

</mosaic_0001>

<bundles_post_ra>
// kernel: tpu_custom_call.1
= control target key start
LH: loop header
LB: loop body
LE: loop exit
PB: predicated region body
PF: predicated region fallthrough
CT: control target
= control target key end

     0   :  { %vm96_vm0 = vcmask 1046528   ;;  %vm2374_vm1 = vcmask 1041409   ;;  %vm2377_vm2 = vcmask 1042434   ;;  %vm2380_vm3 = vcmask 1043459   ;;  %s9065_s5 = inlined_call_operand.vmem [shape: bf16[256,256], index: 5, kind: input, shape index: {}]   ;;  %s9066_s0 = inlined_call_operand.vmem [shape: f32[16,7,7,256], index: 0, kind: input, shape index: {}]   ;;  %s9067_s1 = inlined_call_operand.vmem [shape: f32[7,7,256], index: 1, kind: input, shape index: {}]   ;;  %s9068_s2 = inlined_call_operand.vmem [shape: f32[1,256], index: 2, kind: input, shape index: {}]   ;;  %s9069_s3 = inlined_call_operand.vmem [shape: f32[1,256], index: 3, kind: input, shape index: {}]   ;;  %s9070_s4 = inlined_call_operand.vmem [shape: f32[1,256], index: 4, kind: input, shape index: {}]   ;;  %s9071_s6 = inlined_call_operand.vmem [shape: f32[1,256], index: 6, kind: input, shape index: {}]   ;;  %s9072_s7 = inlined_call_operand.vmem [shape: f32[16,7,7,256], index: 7, kind: output, shape index: {}]  }
   0x1   :  { %v4226_v0 = vld [vmem:[%s9065_s5 + $0x4] ss:$8 sps:$4 sm:$0xff]   ;;  %v4228_v1 = vld [vmem:[%s9065_s5] ss:$8 sps:$4 sm:$0xff]   ;;  %v4229_v2 = vld [vmem:[%s9065_s5 + $0x14] ss:$8 sps:$4 sm:$0xff]  }
   0x2   :  { %2952 = vmatprep.subr.bf16.mxu0 %v4226_v0  ;;  %3001 = vmatprep.subr.bf16.mxu1 %v4226_v0  ;;  %v4231_v3 = vld [vmem:[%s9065_s5 + $0x10] ss:$8 sps:$4 sm:$0xff]   ;;  %v4232_v4 = vld [vmem:[%s9065_s5 + $0x24] ss:$8 sps:$4 sm:$0xff]   ;;  %v4234_v5 = vld [vmem:[%s9065_s5 + $0x20] ss:$8 sps:$4 sm:$0xff]  }
   0x3   :  { %2953 = vmatpush1.bf16.msra.mxu0 %v4228_v1  ;;  %3002 = vmatpush1.bf16.msra.mxu1 %v4228_v1  ;;  %v4235_v6 = vld [vmem:[%s9065_s5 + $0x34] ss:$8 sps:$4 sm:$0xff]   ;;  %v4237_v7 = vld [vmem:[%s9065_s5 + $0x30] ss:$8 sps:$4 sm:$0xff]   ;;  %v4238_v8 = vld [vmem:[%s9065_s5 + $0x44] ss:$8 sps:$4 sm:$0xff]  }
   0x4   :  { %2954 = vmatprep.subr.bf16.mxu0 %v4229_v2  ;;  %3003 = vmatprep.subr.bf16.mxu1 %v4229_v2  ;;  %v4240_v9 = vld [vmem:[%s9065_s5 + $0x40] ss:$8 sps:$4 sm:$0xff]   ;;  %v4241_v10 = vld [vmem:[%s9065_s5 + $0x54] ss:$8 sps:$4 sm:$0xff]   ;;  %v4243_v11 = vld [vmem:[%s9065_s5 + $0x50] ss:$8 sps:$4 sm:$0xff]  }
   0x5   :  { %v4244_v12 = vld [vmem:[%s9065_s5 + $0x64] ss:$8 sps:$4 sm:$0xff]   ;;  %v4246_v13 = vld [vmem:[%s9065_s5 + $0x60] ss:$8 sps:$4 sm:$0xff]   ;;  %v4247_v14 = vld [vmem:[%s9065_s5 + $0x74] ss:$8 sps:$4 sm:$0xff]  }
   0x6   :  { %v4249_v15 = vld [vmem:[%s9065_s5 + $0x70] ss:$8 sps:$4 sm:$0xff]   ;;  %v4250_v16 = vld [vmem:[%s9065_s5 + $0x84] ss:$8 sps:$4 sm:$0xff]   ;;  %v4252_v17 = vld [vmem:[%s9065_s5 + $0x80] ss:$8 sps:$4 sm:$0xff]  }
   0x7   :  { %2955 = vmatpush1.bf16.msra.mxu0 %v4231_v3  ;;  %3004 = vmatpush1.bf16.msra.mxu1 %v4231_v3  ;;  %v4253_v18 = vld [vmem:[%s9065_s5 + $0x94] ss:$8 sps:$4 sm:$0xff]   ;;  %v4255_v19 = vld [vmem:[%s9065_s5 + $0x90] ss:$8 sps:$4 sm:$0xff]   ;;  %v30_v20 = vld [vmem:[%s9066_s0] sm:$0x7f] }
   0x8   :  { %2956 = vmatprep.subr.bf16.mxu0 %v4232_v4  ;;  %3005 = vmatprep.subr.bf16.mxu1 %v4232_v4  ;;  %v31_v21 = vld [vmem:[%s9066_s0 + $0x8] sm:$0x7f]  ;;  %v32_v22 = vld [vmem:[%s9066_s0 + $0x70] sm:$0x7f]  ;;  %v33_v23 = vld [vmem:[%s9066_s0 + $0x78] sm:$0x7f] }
   0x9   :  { %v4394_v24 = vld [vmem:[%s9067_s1] sm:$0x7f]  ;;  %v4399_v25 = vld [vmem:[%s9067_s1 + $0x8] sm:$0x7f]  ;;  %v36_v30 = vld [vmem:[%s9066_s0 + $0x150] sm:$0x7f] }
   0xa   :  { %v4256_v26 = vld [vmem:[%s9065_s5 + $0xa4] ss:$8 sps:$4 sm:$0xff]   ;;  %v4258_v27 = vld [vmem:[%s9065_s5 + $0xa0] ss:$8 sps:$4 sm:$0xff]   ;;  %v37_v31 = vld [vmem:[%s9066_s0 + $0x158] sm:$0x7f]  ;;  %v64_v33 = vmul.f32 %v4394_v24, %v30_v20  ;;  %v65_v34 = vmul.f32 %v4399_v25, %v31_v21  ;;  %v66_v35 = vmul.f32 %v4394_v24, %v32_v22  ;;  %v67_v36 = vmul.f32 %v4399_v25, %v33_v23 }
   0xb   :  { %2957 = vmatpush1.bf16.msra.mxu0 %v4234_v5  ;;  %3006 = vmatpush1.bf16.msra.mxu1 %v4234_v5  ;;  %v34_v28 = vld [vmem:[%s9066_s0 + $0xe0] sm:$0x7f]  ;;  %v35_v29 = vld [vmem:[%s9066_s0 + $0xe8] sm:$0x7f]  ;;  %v4259_v37 = vld [vmem:[%s9065_s5 + $0xb4] ss:$8 sps:$4 sm:$0xff]   ;;  %v70_v49 = vmul.f32 %v4394_v24, %v36_v30  ;;  %v71_v50 = vmul.f32 %v4399_v25, %v37_v31 }
   0xc   :  { %2958 = vmatprep.subr.bf16.mxu0 %v4235_v6  ;;  %3007 = vmatprep.subr.bf16.mxu1 %v4235_v6  ;;  %v38_v32 = vld [vmem:[%s9066_s0 + $0x1c0] sm:$0x7f]  ;;  %v39_v38 = vld [vmem:[%s9066_s0 + $0x1c8] sm:$0x7f]  ;;  %v40_v39 = vld [vmem:[%s9066_s0 + $0x230] sm:$0x7f]  ;;  %v68_v43 = vmul.f32 %v4394_v24, %v34_v28  ;;  %v69_v48 = vmul.f32 %v4399_v25, %v35_v29 }
   0xd   :  { %v41_v40 = vld [vmem:[%s9066_s0 + $0x238] sm:$0x7f]  ;;  %v42_v41 = vld [vmem:[%s9066_s0 + $0x2a0] sm:$0x7f]  ;;  %v43_v42 = vld [vmem:[%s9066_s0 + $0x2a8] sm:$0x7f]  ;;  %v4463_v51 = vmul.f32 %v4394_v24, %v38_v32  ;;  %v4485_v61 = vmul.f32 %v4399_v25, %v39_v38  ;;  %v4488_v62 = vmul.f32 %v4394_v24, %v40_v39 }
   0xe   :  { %v4448_v44 = vld [vmem:[%s9065_s5 + $0xb0] ss:$8 sps:$4 sm:$0xff]   ;;  %v46_v47 = vld [vmem:[%s9066_s0 + $0x380] sm:$0x7f]  ;;  %v47_v53 = vld [vmem:[%s9066_s0 + $0x388] sm:$0x7f]  ;;  %v4491_v63 = vmul.f32 %v4399_v25, %v41_v40  ;;  %v4494_v0 = vmul.f32 %v4394_v24, %v42_v41  ;;  %v4503_v3 = vmul.f32 %v4399_v25, %v43_v42 }
   0xf   :  { %2959 = vmatpush1.bf16.msra.mxu0 %v4237_v7  ;;  %3008 = vmatpush1.bf16.msra.mxu1 %v4237_v7  ;;  %v44_v45 = vld [vmem:[%s9066_s0 + $0x310] sm:$0x7f]  ;;  %v45_v46 = vld [vmem:[%s9066_s0 + $0x318] sm:$0x7f]  ;;  %v4262_v52 = vld [vmem:[%s9065_s5 + $0xc4] ss:$8 sps:$4 sm:$0xff]  }
  0x10   :  { %2960 = vmatprep.subr.bf16.mxu0 %v4238_v8  ;;  %3009 = vmatprep.subr.bf16.mxu1 %v4238_v8  ;;  %v97_v54 = vsel %vm96_vm0, %v64_v33, 0.0  ;;  %v104_v55 = vsel %vm96_vm0, %v65_v34, 0.0  ;;  %v111_v56 = vsel %vm96_vm0, %v66_v35, 0.0  ;;  %v118_v57 = vsel %vm96_vm0, %v67_v36, 0.0  ;;  %v48_v58 = vld [vmem:[%s9066_s0 + $0x3f0] sm:$0x7f] }
  0x11   :  { %v49_v59 = vld [vmem:[%s9066_s0 + $0x3f8] sm:$0x7f]  ;;  %v50_v60 = vld [vmem:[%s9066_s0 + $0x460] sm:$0x7f]  ;;  %v51_v1 = vld [vmem:[%s9066_s0 + $0x468] sm:$0x7f]  ;;  %v4506_v4 = vmul.f32 %v4394_v24, %v44_v45  ;;  %v4509_v5 = vmul.f32 %v4399_v25, %v45_v46 }
  0x12   :  { %v52_v2 = vld [vmem:[%s9066_s0 + $0x4d0] sm:$0x7f]  ;;  %v125_v6 = vsel %vm96_vm0, %v68_v43, 0.0  ;;  %v4264_v7 = vld [vmem:[%s9065_s5 + $0xc0] ss:$8 sps:$4 sm:$0xff]   ;;  %v4547_v22 = vmul.f32 %v4394_v24, %v50_v60  ;;  %v4550_v23 = vmul.f32 %v4399_v25, %v51_v1  ;;  %v132_v30 = vsel %vm96_vm0, %v69_v48, 0.0 }
  0x13   :  { %2961 = vmatpush1.bf16.msra.mxu0 %v4240_v9  ;;  %3010 = vmatpush1.bf16.msra.mxu1 %v4240_v9  ;;  %v53_v8 = vld [vmem:[%s9066_s0 + $0x4d8] sm:$0x7f]  ;;  %v98_v9 = vrot.slane %v97_v54, 4  ;;  %v56_v20 = vld [vmem:[%s9066_s0 + $0x5b0] sm:$0x7f]  ;;  %v139_v31 = vsel %vm96_vm0, %v70_v49, 0.0 }
  0x14   :  { %2962 = vmatprep.subr.bf16.mxu0 %v4241_v10  ;;  %3011 = vmatprep.subr.bf16.mxu1 %v4241_v10  ;;  %v105_v10 = vrot.slane %v104_v55, 4  ;;  %v57_v21 = vld [vmem:[%s9066_s0 + $0x5b8] sm:$0x7f]  ;;  %v58_v28 = vld [vmem:[%s9066_s0 + $0x620] sm:$0x7f]  ;;  %v4559_v29 = vmul.f32 %v4399_v25, %v53_v8  ;;  %v146_v32 = vsel %vm96_vm0, %v71_v50, 0.0  ;;  %v4581_v42 = vmul.f32 %v4394_v24, %v56_v20 }
  0x15   :  { %v59_v33 = vld [vmem:[%s9066_s0 + $0x628] sm:$0x7f]  ;;  %v60_v34 = vld [vmem:[%s9066_s0 + $0x690] sm:$0x7f]  ;;  %v61_v35 = vld [vmem:[%s9066_s0 + $0x698] sm:$0x7f]  ;;  %v99_v36 = vadd.f32 %v98_v9, %v97_v54  ;;  %v4584_v43 = vmul.f32 %v4399_v25, %v57_v21  ;;  %v4593_v50 = vmul.f32 %v4394_v24, %v58_v28 }
  0x16   :  { %v4267_v45 = vld [vmem:[%s9065_s5 + $0xd0] ss:$8 sps:$4 sm:$0xff]   ;;  %v147_v48 = vrot.slane %v146_v32, 4  ;;  %v4268_v49 = vld [vmem:[%s9065_s5 + $0xe4] ss:$8 sps:$4 sm:$0xff]   ;;  %v4602_v54 = vmul.f32 %v4399_v25, %v61_v35  ;;  %v160_v60 = vsel %vm96_vm0, %v4485_v61, 0.0 }
  0x17   :  { %2963 = vmatpush1.bf16.msra.mxu0 %v4243_v11  ;;  %3012 = vmatpush1.bf16.msra.mxu1 %v4243_v11  ;;  %v112_v11 = vrot.slane %v111_v56, 4  ;;  %v167_v1 = vsel %vm96_vm0, %v4488_v62, 0.0  ;;  %v161_v62 = vrot.slane %v160_v60, 4  ;;  %vm2383_vm4 = vcmask 1044484  }
  0x18   :  { %2964 = vmatprep.subr.bf16.mxu0 %v4244_v12  ;;  %3013 = vmatprep.subr.bf16.mxu1 %v4244_v12  ;;  %v119_v12 = vrot.slane %v118_v57, 4  ;;  %v148_v8 = vadd.f32 %v147_v48, %v146_v32  ;;  %v168_v9 = vrot.slane %v167_v1, 4  ;;  %vm2386_vm5 = vcmask 1045509  }
  0x19   :  { %v113_v38 = vadd.f32 %v112_v11, %v111_v56  ;;  %v188_v11 = vsel %vm96_vm0, %v4503_v3, 0.0  ;;  %vm2389_vm6 = vcmask 1046534   ;;  %vm2392_vm7 = vcmask 1047559  }
  0x1a   :  { %v120_v39 = vadd.f32 %v119_v12, %v118_v57  ;;  %v195_v12 = vsel %vm96_vm0, %v4506_v4, 0.0  ;;  %v189_v3 = vrot.slane %v188_v11, 4  ;;  %v149_v32 = vrot.slane %v148_v8, 2 }
  0x1b   :  { %2965 = vmatpush1.bf16.msra.mxu0 %v4246_v13  ;;  %3014 = vmatpush1.bf16.msra.mxu1 %v4246_v13  ;;  %v4265_v13 = vld [vmem:[%s9065_s5 + $0xd4] ss:$8 sps:$4 sm:$0xff]   ;;  %v114_v57 = vrot.slane %v113_v38, 2  ;;  %v169_v35 = vadd.f32 %v168_v9, %v167_v1 }
  0x1c   :  { %2966 = vmatprep.subr.bf16.mxu0 %v4247_v14  ;;  %3015 = vmatprep.subr.bf16.mxu1 %v4247_v14  ;;  %v54_v14 = vld [vmem:[%s9066_s0 + $0x540] sm:$0x7f]  ;;  %v190_v48 = vadd.f32 %v189_v3, %v188_v11 }
  0x1d   :  { %v4575_v40 = vmul.f32 %v4394_v24, %v54_v14  ;;  %v115_v20 = vadd.f32 %v114_v57, %v113_v38 }
  0x1f   :  { %2967 = vmatpush1.bf16.msra.mxu0 %v4249_v15  ;;  %3016 = vmatpush1.bf16.msra.mxu1 %v4249_v15  ;;  %v55_v15 = vld [vmem:[%s9066_s0 + $0x548] sm:$0x7f] }
  0x20   :  { %2968 = vmatprep.subr.bf16.mxu0 %v4250_v16  ;;  %3017 = vmatprep.subr.bf16.mxu1 %v4250_v16  ;;  %v4528_v16 = vmul.f32 %v4394_v24, %v46_v47  ;;  %v4578_v41 = vmul.f32 %v4399_v25, %v55_v15  ;;  %v140_v47 = vrot.slane %v139_v31, 4 }
  0x23   :  { %2969 = vmatpush1.bf16.msra.mxu0 %v4252_v17  ;;  %3018 = vmatpush1.bf16.msra.mxu1 %v4252_v17  ;;  %v4531_v17 = vmul.f32 %v4399_v25, %v47_v53  ;;  %v4596_v53 = vmul.f32 %v4399_v25, %v59_v33 }
  0x24   :  { %2970 = vmatprep.subr.bf16.mxu0 %v4253_v18  ;;  %3019 = vmatprep.subr.bf16.mxu1 %v4253_v18  ;;  %v4534_v18 = vmul.f32 %v4394_v24, %v48_v58  ;;  %v121_v58 = vrot.slane %v120_v39, 2 }
  0x26   :  { %v122_v21 = vadd.f32 %v121_v58, %v120_v39  ;;  %v116_v39 = vrot.slane %v115_v20, 1 }
  0x27   :  { %2971 = vmatpush1.bf16.msra.mxu0 %v4255_v19  ;;  %3020 = vmatpush1.bf16.msra.mxu1 %v4255_v19  ;;  %v4537_v19 = vmul.f32 %v4399_v25, %v49_v59  ;;  %v153_v59 = vsel %vm96_vm0, %v4463_v51, 0.0  ;;  %v4270_v25 = vld [vmem:[%s9065_s5 + $0xe0] ss:$8 sps:$4 sm:$0xff]   ;;  %v4271_v51 = vld [vmem:[%s9065_s5 + $0xf4] ss:$8 sps:$4 sm:$0xff]  }
  0x28   :  { %2972 = vmatprep.subr.bf16.mxu0 %v4256_v26  ;;  %3021 = vmatprep.subr.bf16.mxu1 %v4256_v26  ;;  %v4553_v26 = vmul.f32 %v4394_v24, %v52_v2  ;;  %v154_v61 = vrot.slane %v153_v59, 4 }
  0x2a   :  { %v155_v33 = vadd.f32 %v154_v61, %v153_v59 }
  0x2b   :  { %2973 = vmatpush1.bf16.msra.mxu0 %v4258_v27  ;;  %3022 = vmatpush1.bf16.msra.mxu1 %v4258_v27  ;;  %v126_v27 = vrot.slane %v125_v6, 4 }
  0x2c   :  { %2974 = vmatprep.subr.bf16.mxu0 %v4259_v37  ;;  %3023 = vmatprep.subr.bf16.mxu1 %v4259_v37  ;;  %v106_v37 = vadd.f32 %v105_v10, %v104_v55  ;;  %v100_v55 = vrot.slane %v99_v36, 2  ;;  %v156_v58 = vrot.slane %v155_v33, 2 }
  0x2d   :  { %v127_v46 = vadd.f32 %v126_v27, %v125_v6 }
  0x2e   :  { %v107_v56 = vrot.slane %v106_v37, 2  ;;  %v101_v14 = vadd.f32 %v100_v55, %v99_v36  ;;  %v157_v11 = vadd.f32 %v156_v58, %v155_v33 }
  0x2f   :  { %2975 = vmatpush1.bf16.msra.mxu0 %v4448_v44  ;;  %3024 = vmatpush1.bf16.msra.mxu1 %v4448_v44  ;;  %v133_v44 = vrot.slane %v132_v30, 4  ;;  %v128_v2 = vrot.slane %v127_v46, 2 }
  0x30   :  { %2976 = vmatprep.subr.bf16.mxu0 %v4262_v52  ;;  %3025 = vmatprep.subr.bf16.mxu1 %v4262_v52  ;;  %v4599_v52 = vmul.f32 %v4394_v24, %v60_v34  ;;  %v174_v24 = vsel %vm96_vm0, %v4491_v63, 0.0  ;;  %v181_v63 = vsel %vm96_vm0, %v4494_v0, 0.0  ;;  %v108_v15 = vadd.f32 %v107_v56, %v106_v37  ;;  %v4273_v0 = vld [vmem:[%s9065_s5 + $0xf0] ss:$8 sps:$4 sm:$0xff]  }
  0x31   :  { %v134_v6 = vadd.f32 %v133_v44, %v132_v30  ;;  %v175_v10 = vrot.slane %v174_v24, 4  ;;  %v182_v28 = vrot.slane %v181_v63, 4  ;;  %v196_v30 = vrot.slane %v195_v12, 4 }
  0x32   :  { %v129_v4 = vadd.f32 %v128_v2, %v127_v46  ;;  %v162_v34 = vadd.f32 %v161_v62, %v160_v60  ;;  %v102_v37 = vrot.slane %v101_v14, 1  ;;  %v109_v38 = vrot.slane %v108_v15, 1 }
  0x33   :  { %2977 = vmatpush1.bf16.msra.mxu0 %v4264_v7  ;;  %3026 = vmatpush1.bf16.msra.mxu1 %v4264_v7  ;;  %v141_v7 = vadd.f32 %v140_v47, %v139_v31  ;;  %v135_v27 = vrot.slane %v134_v6, 2  ;;  %v176_v36 = vadd.f32 %v175_v10, %v174_v24  ;;  %v183_v47 = vadd.f32 %v182_v28, %v181_v63 }
  0x34   :  { %2978 = vmatprep.subr.bf16.mxu0 %v4265_v13  ;;  %3027 = vmatprep.subr.bf16.mxu1 %v4265_v13  ;;  %v202_v13 = vsel %vm96_vm0, %v4509_v5, 0.0  ;;  %v130_v55 = vrot.slane %v129_v4, 1  ;;  %v150_v56 = vadd.f32 %v149_v32, %v148_v8  ;;  %v163_v59 = vrot.slane %v162_v34, 2 }
  0x35   :  { %v142_v31 = vrot.slane %v141_v7, 2  ;;  %v203_v5 = vrot.slane %v202_v13, 4  ;;  %v136_v44 = vadd.f32 %v135_v27, %v134_v6  ;;  %v170_v60 = vrot.slane %v169_v35, 2 }
  0x36   :  { %v177_v1 = vrot.slane %v176_v36, 2  ;;  %v4629_v24 = vadd.f32 %v102_v37, %v101_v14  ;;  %v4633_v2 = vadd.f32 %v116_v39, %v115_v20  ;;  %v184_v61 = vrot.slane %v183_v47, 2 }
  0x37   :  { %2979 = vmatpush1.bf16.msra.mxu0 %v4267_v45  ;;  %3028 = vmatpush1.bf16.msra.mxu1 %v4267_v45  ;;  %v123_v45 = vrot.slane %v122_v21, 1  ;;  %v143_v46 = vadd.f32 %v142_v31, %v141_v7  ;;  %v204_v57 = vadd.f32 %v203_v5, %v202_v13  ;;  %v137_v6 = vrot.slane %v136_v44, 1 }
  0x38   :  { %2980 = vmatprep.subr.bf16.mxu0 %v4268_v49  ;;  %3029 = vmatprep.subr.bf16.mxu1 %v4268_v49  ;;  %v197_v49 = vadd.f32 %v196_v30, %v195_v12  ;;  %9074 = vst [vmem:[#allocation6_spill] sm:$0xff] %v4633_v2  ;;  %v191_v62 = vrot.slane %v190_v48, 2  ;;  %v4637_v7 = vadd.f32 %v130_v55, %v129_v4  ;;  %v151_v10 = vrot.slane %v150_v56, 1 }
  0x39   :  { %v144_v8 = vrot.slane %v143_v46, 1  ;;  %v205_v63 = vrot.slane %v204_v57, 2  ;;  %v164_v12 = vadd.f32 %v163_v59, %v162_v34  ;;  %v171_v13 = vadd.f32 %v170_v60, %v169_v35 }
  0x3a   :  { %v198_v9 = vrot.slane %v197_v49, 2  ;;  %9076 = vst [vmem:[#allocation8_spill] sm:$0xff] %v4637_v7  ;;  %v178_v14 = vadd.f32 %v177_v1, %v176_v36  ;;  %v216_v20 = vsel %vm96_vm0, %v4531_v17, 0.0  ;;  %v4647_v27 = vadd.f32 %v137_v6, %v136_v44 }
  0x3b   :  { %2981 = vmatpush1.bf16.msra.mxu0 %v4270_v25  ;;  %3030 = vmatpush1.bf16.msra.mxu1 %v4270_v25  ;;  %v4631_v25 = vadd.f32 %v109_v38, %v108_v15  ;;  %v209_v15 = vsel %vm96_vm0, %v4528_v16, 0.0  ;;  %v185_v28 = vadd.f32 %v184_v61, %v183_v47  ;;  %v192_v3 = vadd.f32 %v191_v62, %v190_v48 }
  0x3c   :  { %2982 = vmatprep.subr.bf16.mxu0 %v4271_v51  ;;  %3031 = vmatprep.subr.bf16.mxu1 %v4271_v51  ;;  %v4635_v51 = vadd.f32 %v123_v45, %v122_v21  ;;  %v223_v21 = vsel %vm96_vm0, %v4534_v18, 0.0  ;;  %9077 = vst [vmem:[#allocation9_spill] sm:$0xff] %v4647_v27  ;;  %v199_v30 = vadd.f32 %v198_v9, %v197_v49  ;;  %v237_v16 = vsel %vm96_vm0, %v4547_v22, 0.0 }
  0x3d   :  { %9073 = vst [vmem:[#allocation5_spill] sm:$0xff] %v4631_v25  ;;  %v4649_v4 = vadd.f32 %v144_v8, %v143_v46  ;;  %v4651_v31 = vadd.f32 %v151_v10, %v150_v56  ;;  %v206_v32 = vadd.f32 %v205_v63, %v204_v57  ;;  %v210_v17 = vrot.slane %v209_v15, 4 }
  0x3e   :  { %9075 = vst [vmem:[#allocation7_spill] sm:$0xff] %v4635_v51  ;;  %v217_v5 = vrot.slane %v216_v20, 4  ;;  %v224_v33 = vrot.slane %v223_v21, 4  ;;  %v158_v34 = vrot.slane %v157_v11, 1  ;;  %v165_v35 = vrot.slane %v164_v12, 1 }
  0x3f   :  { %2983 = vmatpush1.bf16.msra.mxu0 %v4273_v0  ;;  %3032 = vmatpush1.bf16.msra.mxu1 %v4273_v0  ;;  %v230_v0 = vsel %vm96_vm0, %v4537_v19, 0.0  ;;  %9078 = vst [vmem:[#allocation10_spill] sm:$0xff] %v4649_v4  ;;  %9079 = vst [vmem:[#allocation11_spill] sm:$0xff] %v4651_v31  ;;  %v172_v19 = vrot.slane %v171_v13, 1  ;;  %v179_v36 = vrot.slane %v178_v14, 1  ;;  %v186_v37 = vrot.slane %v185_v28, 1 }
  0x40   :  { %v231_v18 = vrot.slane %v230_v0, 4  ;;  %v193_v38 = vrot.slane %v192_v3, 1  ;;  %v200_v39 = vrot.slane %v199_v30, 1  ;;  %v238_v45 = vrot.slane %v237_v16, 4 }
  0x41   :  { %v207_v44 = vrot.slane %v206_v32, 1  ;;  %v244_v47 = vsel %vm96_vm0, %v4550_v23, 0.0  ;;  %v251_v48 = vsel %vm96_vm0, %v4553_v26, 0.0  ;;  %v258_v22 = vsel %vm96_vm0, %v4559_v29, 0.0 }
  0x42   :  { %v211_v49 = vadd.f32 %v210_v17, %v209_v15  ;;  %v218_v55 = vadd.f32 %v217_v5, %v216_v20  ;;  %v225_v46 = vadd.f32 %v224_v33, %v223_v21  ;;  %v232_v56 = vadd.f32 %v231_v18, %v230_v0 }
  0x43   :  { %v4661_v57 = vadd.f32 %v158_v34, %v157_v11  ;;  %v4663_v58 = vadd.f32 %v165_v35, %v164_v12  ;;  %v4665_v59 = vadd.f32 %v172_v19, %v171_v13  ;;  %v4667_v60 = vadd.f32 %v179_v36, %v178_v14 }
  0x44   :  { %v239_v1 = vadd.f32 %v238_v45, %v237_v16  ;;  %v245_v23 = vrot.slane %v244_v47, 4  ;;  %v252_v6 = vrot.slane %v251_v48, 4  ;;  %v259_v61 = vrot.slane %v258_v22, 4 }
  0x45   :  { %9080 = vst [vmem:[#allocation12_spill] sm:$0xff] %v4661_v57  ;;  %9081 = vst [vmem:[#allocation13_spill] sm:$0xff] %v4663_v58  ;;  %v4669_v26 = vadd.f32 %v186_v37, %v185_v28  ;;  %v4671_v62 = vadd.f32 %v193_v38, %v192_v3  ;;  %v4673_v29 = vadd.f32 %v200_v39, %v199_v30  ;;  %v212_v8 = vrot.slane %v211_v49, 2 }
  0x46   :  { %9082 = vst [vmem:[#allocation14_spill] sm:$0xff] %v4665_v59  ;;  %9083 = vst [vmem:[#allocation15_spill] sm:$0xff] %v4667_v60  ;;  %v4675_v9 = vadd.f32 %v207_v44, %v206_v32  ;;  %v219_v10 = vrot.slane %v218_v55, 2  ;;  %v226_v63 = vrot.slane %v225_v46, 2  ;;  %v233_v11 = vrot.slane %v232_v56, 2 }
  0x47   :  { %9084 = vst [vmem:[#allocation16_spill] sm:$0xff] %v4669_v26  ;;  %9085 = vst [vmem:[#allocation17_spill] sm:$0xff] %v4671_v62  ;;  %v265_v12 = vsel %vm96_vm0, %v4575_v40, 0.0  ;;  %v272_v13 = vsel %vm96_vm0, %v4578_v41, 0.0  ;;  %v279_v14 = vsel %vm96_vm0, %v4581_v42, 0.0  ;;  %v286_v15 = vsel %vm96_vm0, %v4584_v43, 0.0 }
  0x48   :  { %9086 = vst [vmem:[#allocation18_spill] sm:$0xff] %v4673_v29  ;;  %9087 = vst [vmem:[#allocation19_spill] sm:$0xff] %v4675_v9  ;;  %v240_v20 = vrot.slane %v239_v1, 2  ;;  %v246_v21 = vadd.f32 %v245_v23, %v244_v47  ;;  %v253_v0 = vadd.f32 %v252_v6, %v251_v48  ;;  %v260_v28 = vadd.f32 %v259_v61, %v258_v22 }
  0x49   :  { %v266_v3 = vrot.slane %v265_v12, 4  ;;  %v273_v30 = vrot.slane %v272_v13, 4  ;;  %v280_v32 = vrot.slane %v279_v14, 4  ;;  %v287_v16 = vrot.slane %v286_v15, 4 }
  0x4a   :  { %v293_v40 = vsel %vm96_vm0, %v4593_v50, 0.0  ;;  %v300_v41 = vsel %vm96_vm0, %v4596_v53, 0.0  ;;  %v307_v42 = vsel %vm96_vm0, %v4599_v52, 0.0  ;;  %v314_v43 = vsel %vm96_vm0, %v4602_v54, 0.0 }
  0x4b   :  { %v267_v17 = vadd.f32 %v266_v3, %v265_v12  ;;  %v274_v5 = vadd.f32 %v273_v30, %v272_v13  ;;  %v281_v33 = vadd.f32 %v280_v32, %v279_v14  ;;  %v288_v18 = vadd.f32 %v287_v16, %v286_v15 }
  0x4c   :  { %v294_v34 = vrot.slane %v293_v40, 4  ;;  %v301_v35 = vrot.slane %v300_v41, 4  ;;  %v308_v19 = vrot.slane %v307_v42, 4  ;;  %v315_v36 = vrot.slane %v314_v43, 4 }
  0x4d   :  { %v247_v37 = vrot.slane %v246_v21, 2  ;;  %v254_v38 = vrot.slane %v253_v0, 2  ;;  %v261_v50 = vrot.slane %v260_v28, 2  ;;  %v268_v39 = vrot.slane %v267_v17, 2 }
  0x4e   :  { %v295_v45 = vadd.f32 %v294_v34, %v293_v40  ;;  %v302_v53 = vadd.f32 %v301_v35, %v300_v41  ;;  %v309_v44 = vadd.f32 %v308_v19, %v307_v42  ;;  %v316_v47 = vadd.f32 %v315_v36, %v314_v43  ;;  %v3992_v19 = vld [vmem:[%s9066_s0 + $0x88] sm:$0x7f]  ;;  %v4716_v36 = vld [vmem:[%s9067_s1 + $0x10] sm:$0x7f] }
  0x4f   :  { %v213_v52 = vadd.f32 %v212_v8, %v211_v49  ;;  %v220_v48 = vadd.f32 %v219_v10, %v218_v55  ;;  %v227_v22 = vadd.f32 %v226_v63, %v225_v46  ;;  %v234_v54 = vadd.f32 %v233_v11, %v232_v56 }
  0x50   :  { %v275_v23 = vrot.slane %v274_v5, 2  ;;  %v282_v6 = vrot.slane %v281_v33, 2  ;;  %v289_v61 = vrot.slane %v288_v18, 2  ;;  %v296_v12 = vrot.slane %v295_v45, 2 }
  0x51   :  { %v241_v13 = vadd.f32 %v240_v20, %v239_v1  ;;  %v303_v14 = vrot.slane %v302_v53, 2  ;;  %v310_v15 = vrot.slane %v309_v44, 2  ;;  %v317_v3 = vrot.slane %v316_v47, 2 }
  0x52   :  { %v248_v30 = vadd.f32 %v247_v37, %v246_v21  ;;  %v255_v32 = vadd.f32 %v254_v38, %v253_v0  ;;  %v262_v16 = vadd.f32 %v261_v50, %v260_v28  ;;  %v269_v9 = vadd.f32 %v268_v39, %v267_v17  ;;  %v3989_v21 = vld [vmem:[%s9066_s0 + $0x10] sm:$0x7f]  ;;  %v3990_v0 = vld [vmem:[%s9066_s0 + $0x18] sm:$0x7f] }
  0x53   :  { %v214_v40 = vrot.slane %v213_v52, 1  ;;  %v221_v41 = vrot.slane %v220_v48, 1  ;;  %v228_v42 = vrot.slane %v227_v22, 1  ;;  %v235_v43 = vrot.slane %v234_v54, 1 }
  0x54   :  { %v276_v49 = vadd.f32 %v275_v23, %v274_v5  ;;  %v283_v55 = vadd.f32 %v282_v6, %v281_v33  ;;  %v290_v46 = vadd.f32 %v289_v61, %v288_v18  ;;  %v297_v56 = vadd.f32 %v296_v12, %v295_v45  ;;  %v3991_v18 = vld [vmem:[%s9066_s0 + $0x80] sm:$0x7f]  ;;  %v4721_v45 = vld [vmem:[%s9067_s1 + $0x18] sm:$0x7f]  ;;  %v3993_v6 = vld [vmem:[%s9066_s0 + $0xf0] sm:$0x7f] }
  0x55   :  { %v242_v8 = vrot.slane %v241_v13, 1  ;;  %v304_v10 = vadd.f32 %v303_v14, %v302_v53  ;;  %v311_v63 = vadd.f32 %v310_v15, %v309_v44  ;;  %v318_v11 = vadd.f32 %v317_v3, %v316_v47  ;;  %v3994_v61 = vld [vmem:[%s9066_s0 + $0xf8] sm:$0x7f]  ;;  %v3995_v12 = vld [vmem:[%s9066_s0 + $0x160] sm:$0x7f] }
  0x56   :  { %v249_v1 = vrot.slane %v248_v30, 1  ;;  %v256_v20 = vrot.slane %v255_v32, 1  ;;  %v263_v34 = vrot.slane %v262_v16, 1  ;;  %v270_v35 = vrot.slane %v269_v9, 1 }
  0x57   :  { %v4699_v28 = vadd.f32 %v214_v40, %v213_v52  ;;  %v4701_v17 = vadd.f32 %v221_v41, %v220_v48  ;;  %v4703_v5 = vadd.f32 %v228_v42, %v227_v22  ;;  %v4705_v33 = vadd.f32 %v235_v43, %v234_v54  ;;  %v3998_v42 = vld [vmem:[%s9066_s0 + $0x1d8] sm:$0x7f]  ;;  %v3999_v43 = vld [vmem:[%s9066_s0 + $0x240] sm:$0x7f] }
  0x58   :  { %v277_v37 = vrot.slane %v276_v49, 1  ;;  %v284_v38 = vrot.slane %v283_v55, 1  ;;  %v291_v50 = vrot.slane %v290_v46, 1  ;;  %v298_v39 = vrot.slane %v297_v56, 1 }
  0x59   :  { %9088 = vst [vmem:[#allocation20_spill] sm:$0xff] %v4699_v28  ;;  %9089 = vst [vmem:[#allocation21_spill] sm:$0xff] %v4701_v17  ;;  %v4723_v53 = vadd.f32 %v242_v8, %v241_v13  ;;  %v305_v44 = vrot.slane %v304_v10, 1  ;;  %v312_v47 = vrot.slane %v311_v63, 1  ;;  %v319_v52 = vrot.slane %v318_v11, 1 }
  0x5a   :  { %9090 = vst [vmem:[#allocation22_spill] sm:$0xff] %v4703_v5  ;;  %9091 = vst [vmem:[#allocation23_spill] sm:$0xff] %v4705_v33  ;;  %v4725_v48 = vadd.f32 %v249_v1, %v248_v30  ;;  %v4727_v22 = vadd.f32 %v256_v20, %v255_v32  ;;  %v4729_v54 = vadd.f32 %v263_v34, %v262_v16  ;;  %v3996_v13 = vld [vmem:[%s9066_s0 + $0x168] sm:$0x7f] }
  0x5b   :  { %9092 = vst [vmem:[#allocation24_spill] sm:$0xff] %v4723_v53  ;;  %v4731_v23 = vadd.f32 %v270_v35, %v269_v9  ;;  %v3997_v9 = vld [vmem:[%s9066_s0 + $0x1d0] sm:$0x7f]  ;;  %v389_v14 = vmul.f32 %v4716_v36, %v3989_v21  ;;  %v390_v15 = vmul.f32 %v4721_v45, %v3990_v0  ;;  %v391_v3 = vmul.f32 %v4716_v36, %v3991_v18  ;;  %v4006_v18 = vld [vmem:[%s9066_s0 + $0x398] sm:$0x7f] }
  0x5c   :  { %9093 = vst [vmem:[#allocation25_spill] sm:$0xff] %v4725_v48  ;;  %9094 = vst [vmem:[#allocation26_spill] sm:$0xff] %v4727_v22  ;;  %v392_v30 = vmul.f32 %v4721_v45, %v3992_v19  ;;  %v4752_v32 = vadd.f32 %v277_v37, %v276_v49  ;;  %v4754_v16 = vadd.f32 %v284_v38, %v283_v55  ;;  %v4000_v55 = vld [vmem:[%s9066_s0 + $0x248] sm:$0x7f] }
  0x5d   :  { %9095 = vst [vmem:[#allocation27_spill] sm:$0xff] %v4729_v54  ;;  %9096 = vst [vmem:[#allocation28_spill] sm:$0xff] %v4731_v23  ;;  %v4756_v40 = vadd.f32 %v291_v50, %v290_v46  ;;  %v4758_v41 = vadd.f32 %v298_v39, %v297_v56  ;;  %v4766_v8 = vadd.f32 %v305_v44, %v304_v10  ;;  %v4001_v46 = vld [vmem:[%s9066_s0 + $0x2b0] sm:$0x7f]  ;;  %v4002_v56 = vld [vmem:[%s9066_s0 + $0x2b8] sm:$0x7f] }
  0x5e   :  { %9097 = vst [vmem:[#allocation29_spill] sm:$0xff] %v4752_v32  ;;  %9098 = vst [vmem:[#allocation30_spill] sm:$0xff] %v4754_v16  ;;  %v4768_v1 = vadd.f32 %v312_v47, %v311_v63  ;;  %v4770_v49 = vadd.f32 %v319_v52, %v318_v11  ;;  %v393_v20 = vmul.f32 %v4716_v36, %v3993_v6  ;;  %v4003_v10 = vld [vmem:[%s9066_s0 + $0x320] sm:$0x7f]  ;;  %v4004_v63 = vld [vmem:[%s9066_s0 + $0x328] sm:$0x7f] }
  0x5f   :  { %9099 = vst [vmem:[#allocation31_spill] sm:$0xff] %v4756_v40  ;;  %9100 = vst [vmem:[#allocation32_spill] sm:$0xff] %v4758_v41  ;;  %v4005_v11 = vld [vmem:[%s9066_s0 + $0x390] sm:$0x7f]  ;;  %v394_v34 = vmul.f32 %v4721_v45, %v3994_v61  ;;  %v395_v35 = vmul.f32 %v4716_v36, %v3995_v12  ;;  %v396_v21 = vmul.f32 %v4721_v45, %v3996_v13  ;;  %v421_v19 = vsel %vm96_vm0, %v389_v14, 0.0 }
  0x60   :  { %9101 = vst [vmem:[#allocation33_spill] sm:$0xff] %v4766_v8  ;;  %9102 = vst [vmem:[#allocation34_spill] sm:$0xff] %v4768_v1  ;;  %v4795_v0 = vmul.f32 %v4716_v36, %v3997_v9  ;;  %v428_v37 = vsel %vm96_vm0, %v390_v15, 0.0  ;;  %v435_v38 = vsel %vm96_vm0, %v391_v3, 0.0  ;;  %v442_v50 = vsel %vm96_vm0, %v392_v30, 0.0 }
  0x61   :  { %9103 = vst [vmem:[#allocation35_spill] sm:$0xff] %v4770_v49  ;;  %v4007_v39 = vld [vmem:[%s9066_s0 + $0x400] sm:$0x7f]  ;;  %v4008_v44 = vld [vmem:[%s9066_s0 + $0x408] sm:$0x7f]  ;;  %v398_v52 = vmul.f32 %v4721_v45, %v3998_v42  ;;  %v399_v6 = vmul.f32 %v4716_v36, %v3999_v43  ;;  %v400_v61 = vmul.f32 %v4721_v45, %v4000_v55  ;;  %v4817_v12 = vmul.f32 %v4716_v36, %v4001_v46 }
  0x62   :  { %v4009_v47 = vld [vmem:[%s9066_s0 + $0x470] sm:$0x7f]  ;;  %v4010_v13 = vld [vmem:[%s9066_s0 + $0x478] sm:$0x7f]  ;;  %v4011_v9 = vld [vmem:[%s9066_s0 + $0x4e0] sm:$0x7f]  ;;  %v402_v14 = vmul.f32 %v4721_v45, %v4002_v56  ;;  %v403_v15 = vmul.f32 %v4716_v36, %v4003_v10  ;;  %v404_v3 = vmul.f32 %v4721_v45, %v4004_v63  ;;  %v4839_v10 = vmul.f32 %v4716_v36, %v4005_v11 }
  0x63   :  { %v449_v30 = vsel %vm96_vm0, %v393_v20, 0.0  ;;  %v4012_v42 = vld [vmem:[%s9066_s0 + $0x4e8] sm:$0x7f]  ;;  %v422_v43 = vrot.slane %v421_v19, 4  ;;  %v429_v55 = vrot.slane %v428_v37, 4  ;;  %v436_v46 = vrot.slane %v435_v38, 4 }
  0x64   :  { %v443_v49 = vrot.slane %v442_v50, 4  ;;  %v4013_v1 = vld [vmem:[%s9066_s0 + $0x550] sm:$0x7f]  ;;  %v4014_v56 = vld [vmem:[%s9066_s0 + $0x558] sm:$0x7f]  ;;  %v4842_v20 = vmul.f32 %v4721_v45, %v4006_v18  ;;  %v4845_v63 = vmul.f32 %v4716_v36, %v4007_v39  ;;  %v4848_v8 = vmul.f32 %v4721_v45, %v4008_v44 }
  0x65   :  { %v4015_v41 = vld [vmem:[%s9066_s0 + $0x5c0] sm:$0x7f]  ;;  %v4016_v40 = vld [vmem:[%s9066_s0 + $0x5c8] sm:$0x7f]  ;;  %v4857_v11 = vmul.f32 %v4716_v36, %v4009_v47  ;;  %v4860_v18 = vmul.f32 %v4721_v45, %v4010_v13  ;;  %v4863_v39 = vmul.f32 %v4716_v36, %v4011_v9  ;;  %v450_v16 = vrot.slane %v449_v30, 4 }
  0x66   :  { %v4017_v44 = vld [vmem:[%s9066_s0 + $0x630] sm:$0x7f]  ;;  %v4869_v32 = vmul.f32 %v4721_v45, %v4012_v42  ;;  %v456_v23 = vsel %vm96_vm0, %v394_v34, 0.0  ;;  %v463_v54 = vsel %vm96_vm0, %v395_v35, 0.0  ;;  %v470_v47 = vsel %vm96_vm0, %v396_v21, 0.0 }
  0x67   :  { %v4018_v13 = vld [vmem:[%s9066_s0 + $0x638] sm:$0x7f]  ;;  %v4019_v9 = vld [vmem:[%s9066_s0 + $0x6a0] sm:$0x7f]  ;;  %v4020_v22 = vld [vmem:[%s9066_s0 + $0x6a8] sm:$0x7f]  ;;  %v423_v42 = vadd.f32 %v422_v43, %v421_v19  ;;  %v430_v48 = vadd.f32 %v429_v55, %v428_v37  ;;  %v437_v53 = vadd.f32 %v436_v46, %v435_v38  ;;  %v444_v34 = vadd.f32 %v443_v49, %v442_v50 }
  0x68   :  { %v4884_v35 = vmul.f32 %v4716_v36, %v4013_v1  ;;  %v4887_v21 = vmul.f32 %v4721_v45, %v4014_v56  ;;  %v4890_v33 = vmul.f32 %v4716_v36, %v4015_v41  ;;  %v4893_v5 = vmul.f32 %v4721_v45, %v4016_v40 }
  0x69   :  { %v451_v17 = vadd.f32 %v450_v16, %v449_v30  ;;  %v457_v28 = vrot.slane %v456_v23, 4  ;;  %v464_v29 = vrot.slane %v463_v54, 4  ;;  %v471_v62 = vrot.slane %v470_v47, 4 }
  0x6a   :  { %v4896_v19 = vmul.f32 %v4716_v36, %v4017_v44  ;;  %v4899_v49 = vmul.f32 %v4721_v45, %v4018_v13  ;;  %v4902_v1 = vmul.f32 %v4716_v36, %v4019_v9  ;;  %v4905_v37 = vmul.f32 %v4721_v45, %v4020_v22 }
  0x6b   :  { %v424_v41 = vrot.slane %v423_v42, 2  ;;  %v431_v38 = vrot.slane %v430_v48, 2  ;;  %v438_v40 = vrot.slane %v437_v53, 2  ;;  %v445_v50 = vrot.slane %v444_v34, 2 }
  0x6c   :  { %v477_v16 = vsel %vm96_vm0, %v4795_v0, 0.0  ;;  %v484_v30 = vsel %vm96_vm0, %v398_v52, 0.0  ;;  %v491_v43 = vsel %vm96_vm0, %v399_v6, 0.0  ;;  %v498_v55 = vsel %vm96_vm0, %v400_v61, 0.0 }
  0x6d   :  { %v452_v46 = vrot.slane %v451_v17, 2  ;;  %v458_v56 = vadd.f32 %v457_v28, %v456_v23  ;;  %v465_v36 = vadd.f32 %v464_v29, %v463_v54  ;;  %v472_v44 = vadd.f32 %v471_v62, %v470_v47 }
  0x6e   :  { %v478_v13 = vrot.slane %v477_v16, 4  ;;  %v485_v45 = vrot.slane %v484_v30, 4  ;;  %v492_v22 = vrot.slane %v491_v43, 4  ;;  %v499_v9 = vrot.slane %v498_v55, 4 }
  0x6f   :  { %v505_v26 = vsel %vm96_vm0, %v4817_v12, 0.0  ;;  %v512_v60 = vsel %vm96_vm0, %v402_v14, 0.0  ;;  %v519_v0 = vsel %vm96_vm0, %v403_v15, 0.0  ;;  %v526_v52 = vsel %vm96_vm0, %v404_v3, 0.0 }
  0x70   :  { %v425_v6 = vadd.f32 %v424_v41, %v423_v42  ;;  %v432_v59 = vadd.f32 %v431_v38, %v430_v48  ;;  %v439_v61 = vadd.f32 %v438_v40, %v437_v53  ;;  %v446_v58 = vadd.f32 %v445_v50, %v444_v34 }
  0x71   :  { %v459_v28 = vrot.slane %v458_v56, 2  ;;  %v506_v29 = vrot.slane %v505_v26, 4  ;;  %v513_v62 = vrot.slane %v512_v60, 4  ;;  %v520_v54 = vrot.slane %v519_v0, 4 }
  0x72   :  { %v453_v23 = vadd.f32 %v452_v46, %v451_v17  ;;  %v466_v47 = vrot.slane %v465_v36, 2  ;;  %v473_v57 = vrot.slane %v472_v44, 2  ;;  %v527_v31 = vrot.slane %v526_v52, 4 }
  0x73   :  { %v479_v4 = vadd.f32 %v478_v13, %v477_v16  ;;  %v486_v12 = vadd.f32 %v485_v45, %v484_v30  ;;  %v493_v27 = vadd.f32 %v492_v22, %v491_v43  ;;  %v500_v14 = vadd.f32 %v499_v9, %v498_v55 }
  0x74   :  { %v426_v7 = vrot.slane %v425_v6, 1  ;;  %v433_v15 = vrot.slane %v432_v59, 1  ;;  %v440_v51 = vrot.slane %v439_v61, 1  ;;  %v447_v3 = vrot.slane %v446_v58, 1 }
  0x75   :  { %v460_v42 = vadd.f32 %v459_v28, %v458_v56  ;;  %v507_v48 = vadd.f32 %v506_v29, %v505_v26  ;;  %v514_v53 = vadd.f32 %v513_v62, %v512_v60  ;;  %v521_v34 = vadd.f32 %v520_v54, %v519_v0 }
  0x76   :  { %v454_v41 = vrot.slane %v453_v23, 1  ;;  %v467_v38 = vadd.f32 %v466_v47, %v465_v36  ;;  %v474_v40 = vadd.f32 %v473_v57, %v472_v44  ;;  %v528_v50 = vadd.f32 %v527_v31, %v526_v52 }
  0x77   :  { %v480_v17 = vrot.slane %v479_v4, 2  ;;  %v487_v46 = vrot.slane %v486_v12, 2  ;;  %v494_v2 = vrot.slane %v493_v27, 2  ;;  %v501_v25 = vrot.slane %v500_v14, 2 }
  0x78   :  { %v4917_v16 = vadd.f32 %v426_v7, %v425_v6  ;;  %v4919_v30 = vadd.f32 %v433_v15, %v432_v59  ;;  %v4921_v43 = vadd.f32 %v440_v51, %v439_v61  ;;  %v4923_v55 = vadd.f32 %v447_v3, %v446_v58 }
  0x79   :  { %v461_v56 = vrot.slane %v460_v42, 1  ;;  %v508_v26 = vrot.slane %v507_v48, 2  ;;  %v515_v60 = vrot.slane %v514_v53, 2  ;;  %v522_v13 = vrot.slane %v521_v34, 2 }
  0x7a   :  { %v4925_v45 = vadd.f32 %v454_v41, %v453_v23  ;;  %v468_v57 = vrot.slane %v467_v38, 1  ;;  %v475_v31 = vrot.slane %v474_v40, 1  ;;  %v529_v36 = vrot.slane %v528_v50, 2 }
  0x7b   :  { %v481_v44 = vadd.f32 %v480_v17, %v479_v4  ;;  %v488_v22 = vadd.f32 %v487_v46, %v486_v12  ;;  %v495_v9 = vadd.f32 %v494_v2, %v493_v27  ;;  %v502_v7 = vadd.f32 %v501_v25, %v500_v14 }
  0x7c   :  { %v533_v59 = vsel %vm96_vm0, %v4839_v10, 0.0  ;;  %v540_v51 = vsel %vm96_vm0, %v4842_v20, 0.0  ;;  %v547_v58 = vsel %vm96_vm0, %v4845_v63, 0.0  ;;  %v554_v0 = vsel %vm96_vm0, %v4848_v8, 0.0 }
  0x7d   :  { %v4935_v52 = vadd.f32 %v461_v56, %v460_v42  ;;  %v509_v6 = vadd.f32 %v508_v26, %v507_v48  ;;  %v516_v61 = vadd.f32 %v515_v60, %v514_v53  ;;  %v523_v4 = vadd.f32 %v522_v13, %v521_v34 }
  0x7e   :  { %v4937_v28 = vadd.f32 %v468_v57, %v467_v38  ;;  %v4939_v25 = vadd.f32 %v475_v31, %v474_v40  ;;  %v530_v2 = vadd.f32 %v529_v36, %v528_v50  ;;  %v561_v27 = vsel %vm96_vm0, %v4857_v11, 0.0 }
  0x7f   :  { %v534_v10 = vrot.slane %v533_v59, 4  ;;  %v541_v20 = vrot.slane %v540_v51, 4  ;;  %v548_v29 = vrot.slane %v547_v58, 4  ;;  %v555_v63 = vrot.slane %v554_v0, 4 }
  0x80   :  { %v482_v62 = vrot.slane %v481_v44, 1  ;;  %v489_v54 = vrot.slane %v488_v22, 1  ;;  %v496_v8 = vrot.slane %v495_v9, 1  ;;  %v503_v23 = vrot.slane %v502_v7, 1 }
  0x81   :  { %v510_v47 = vrot.slane %v509_v6, 1  ;;  %v517_v12 = vrot.slane %v516_v61, 1  ;;  %v524_v14 = vrot.slane %v523_v4, 1  ;;  %v562_v15 = vrot.slane %v561_v27, 4 }
  0x82   :  { %v531_v3 = vrot.slane %v530_v2, 1  ;;  %v568_v42 = vsel %vm96_vm0, %v4860_v18, 0.0  ;;  %v575_v48 = vsel %vm96_vm0, %v4863_v39, 0.0  ;;  %v582_v11 = vsel %vm96_vm0, %v4869_v32, 0.0 }
  0x83   :  { %v535_v53 = vadd.f32 %v534_v10, %v533_v59  ;;  %v542_v34 = vadd.f32 %v541_v20, %v540_v51  ;;  %v549_v41 = vadd.f32 %v548_v29, %v547_v58  ;;  %v556_v38 = vadd.f32 %v555_v63, %v554_v0 }
  0x84   :  { %v4949_v40 = vadd.f32 %v482_v62, %v481_v44  ;;  %v4951_v50 = vadd.f32 %v489_v54, %v488_v22  ;;  %v4953_v17 = vadd.f32 %v496_v8, %v495_v9  ;;  %v4955_v46 = vadd.f32 %v503_v23, %v502_v7 }
  0x85   :  { %v563_v56 = vadd.f32 %v562_v15, %v561_v27  ;;  %v569_v18 = vrot.slane %v568_v42, 4  ;;  %v576_v26 = vrot.slane %v575_v48, 4  ;;  %v583_v60 = vrot.slane %v582_v11, 4 }
  0x86   :  { %v4957_v39 = vadd.f32 %v510_v47, %v509_v6  ;;  %v4959_v13 = vadd.f32 %v517_v12, %v516_v61  ;;  %v4961_v32 = vadd.f32 %v524_v14, %v523_v4  ;;  %v4963_v57 = vadd.f32 %v531_v3, %v530_v2 }
  0x87   :  { %v536_v31 = vrot.slane %v535_v53, 2  ;;  %v543_v36 = vrot.slane %v542_v34, 2  ;;  %v550_v44 = vrot.slane %v549_v41, 2  ;;  %v557_v22 = vrot.slane %v556_v38, 2 }
  0x88   :  { %9104 = vst [vmem:[#allocation36_spill] sm:$0xff] %v4961_v32  ;;  %9105 = vst [vmem:[#allocation37_spill] sm:$0xff] %v4963_v57  ;;  %v589_v9 = vsel %vm96_vm0, %v4884_v35, 0.0  ;;  %v596_v7 = vsel %vm96_vm0, %v4887_v21, 0.0  ;;  %v603_v59 = vsel %vm96_vm0, %v4890_v33, 0.0  ;;  %v610_v51 = vsel %vm96_vm0, %v4893_v5, 0.0 }
  0x89   :  { %v564_v58 = vrot.slane %v563_v56, 2  ;;  %v570_v0 = vadd.f32 %v569_v18, %v568_v42  ;;  %v577_v6 = vadd.f32 %v576_v26, %v575_v48  ;;  %v584_v61 = vadd.f32 %v583_v60, %v582_v11 }
  0x8a   :  { %v590_v4 = vrot.slane %v589_v9, 4  ;;  %v597_v2 = vrot.slane %v596_v7, 4  ;;  %v604_v27 = vrot.slane %v603_v59, 4  ;;  %v611_v10 = vrot.slane %v610_v51, 4 }
  0x8b   :  { %v617_v35 = vsel %vm96_vm0, %v4896_v19, 0.0  ;;  %v624_v21 = vsel %vm96_vm0, %v4899_v49, 0.0  ;;  %v631_v33 = vsel %vm96_vm0, %v4902_v1, 0.0  ;;  %v638_v5 = vsel %vm96_vm0, %v4905_v37, 0.0 }
  0x8c   :  { %v591_v20 = vadd.f32 %v590_v4, %v589_v9  ;;  %v598_v29 = vadd.f32 %v597_v2, %v596_v7  ;;  %v605_v63 = vadd.f32 %v604_v27, %v603_v59  ;;  %v612_v62 = vadd.f32 %v611_v10, %v610_v51 }
  0x8d   :  { %v618_v54 = vrot.slane %v617_v35, 4  ;;  %v625_v8 = vrot.slane %v624_v21, 4  ;;  %v632_v23 = vrot.slane %v631_v33, 4  ;;  %v639_v47 = vrot.slane %v638_v5, 4 }
  0x8e   :  { %v571_v12 = vrot.slane %v570_v0, 2  ;;  %v578_v14 = vrot.slane %v577_v6, 2  ;;  %v585_v19 = vrot.slane %v584_v61, 2  ;;  %v592_v15 = vrot.slane %v591_v20, 2 }
  0x8f   :  { %v619_v3 = vadd.f32 %v618_v54, %v617_v35  ;;  %v626_v49 = vadd.f32 %v625_v8, %v624_v21  ;;  %v633_v42 = vadd.f32 %v632_v23, %v631_v33  ;;  %v640_v48 = vadd.f32 %v639_v47, %v638_v5 }
  0x90   :  { %v537_v1 = vadd.f32 %v536_v31, %v535_v53  ;;  %v599_v11 = vrot.slane %v598_v29, 2  ;;  %v606_v18 = vrot.slane %v605_v63, 2  ;;  %v613_v37 = vrot.slane %v612_v62, 2 }
  0x91   :  { %v544_v26 = vadd.f32 %v543_v36, %v542_v34  ;;  %v551_v60 = vadd.f32 %v550_v44, %v549_v41  ;;  %v558_v9 = vadd.f32 %v557_v22, %v556_v38  ;;  %v620_v7 = vrot.slane %v619_v3, 2 }
  0x92   :  { %v565_v59 = vadd.f32 %v564_v58, %v563_v56  ;;  %v627_v51 = vrot.slane %v626_v49, 2  ;;  %v634_v4 = vrot.slane %v633_v42, 2  ;;  %v641_v2 = vrot.slane %v640_v48, 2 }
  0x93   :  { %v572_v27 = vadd.f32 %v571_v12, %v570_v0  ;;  %v579_v10 = vadd.f32 %v578_v14, %v577_v6  ;;  %v586_v57 = vadd.f32 %v585_v19, %v584_v61  ;;  %v593_v32 = vadd.f32 %v592_v15, %v591_v20 }
  0x94   :  { %v538_v35 = vrot.slane %v537_v1, 1  ;;  %v600_v21 = vadd.f32 %v599_v11, %v598_v29  ;;  %v607_v33 = vadd.f32 %v606_v18, %v605_v63  ;;  %v614_v5 = vadd.f32 %v613_v37, %v612_v62 }
  0x95   :  { %v545_v53 = vrot.slane %v544_v26, 1  ;;  %v552_v31 = vrot.slane %v551_v60, 1  ;;  %v559_v54 = vrot.slane %v558_v9, 1  ;;  %v621_v8 = vadd.f32 %v620_v7, %v619_v3 }
  0x96   :  { %v566_v34 = vrot.slane %v565_v59, 1  ;;  %v628_v41 = vadd.f32 %v627_v51, %v626_v49  ;;  %v635_v38 = vadd.f32 %v634_v4, %v633_v42  ;;  %v642_v36 = vadd.f32 %v641_v2, %v640_v48  ;;  %v9112_v2 = vld [vmem:[#allocation8_spill] sm:$0xff] }
  0x97   :  { %v573_v56 = vrot.slane %v572_v27, 1  ;;  %v580_v44 = vrot.slane %v579_v10, 1  ;;  %v587_v22 = vrot.slane %v586_v57, 1  ;;  %v594_v58 = vrot.slane %v593_v32, 1 }
  0x98   :  { %v539_v0 = vadd.f32 %v538_v35, %v537_v1  ;;  %v601_v6 = vrot.slane %v600_v21, 1  ;;  %v608_v61 = vrot.slane %v607_v33, 1  ;;  %v615_v20 = vrot.slane %v614_v5, 1 }
  0x99   :  { %v546_v23 = vadd.f32 %v545_v53, %v544_v26  ;;  %v553_v29 = vadd.f32 %v552_v31, %v551_v60  ;;  %v560_v63 = vadd.f32 %v559_v54, %v558_v9  ;;  %v622_v62 = vrot.slane %v621_v8, 1  ;;  %v9106_v26 = vld [vmem:[#allocation5_spill] sm:$0xff]  ;;  %v9108_v9 = vld [vmem:[#allocation6_spill] sm:$0xff]  ;;  %v9126_v53 = vld [vmem:[#allocation15_spill] sm:$0xff] }
  0x9a   :  { %v567_v47 = vadd.f32 %v566_v34, %v565_v59  ;;  %v629_v12 = vrot.slane %v628_v41, 1  ;;  %v636_v14 = vrot.slane %v635_v38, 1  ;;  %v643_v19 = vrot.slane %v642_v36, 1  ;;  %v9110_v59 = vld [vmem:[#allocation7_spill] sm:$0xff]  ;;  %v9128_v31 = vld [vmem:[#allocation16_spill] sm:$0xff]  ;;  %v9130_v54 = vld [vmem:[#allocation17_spill] sm:$0xff] }
  0x9b   :  { %v574_v15 = vadd.f32 %v573_v56, %v572_v27  ;;  %v581_v3 = vadd.f32 %v580_v44, %v579_v10  ;;  %v588_v49 = vadd.f32 %v587_v22, %v586_v57  ;;  %v595_v42 = vadd.f32 %v594_v58, %v593_v32  ;;  %v9133_v34 = vld [vmem:[#allocation36_spill] sm:$0xff]  ;;  %v5068_v58 = vld [vmem:[%s9067_s1 + $0x28] sm:$0x7f] }
  0x9c   :  { %v602_v48 = vadd.f32 %v601_v6, %v600_v21  ;;  %v609_v11 = vadd.f32 %v608_v61, %v607_v33  ;;  %v616_v18 = vadd.f32 %v615_v20, %v614_v5  ;;  %v4983_v1 = vadd.f32 %v4917_v16, %v4629_v24  ;;  %v9114_v16 = vld [vmem:[#allocation9_spill] sm:$0xff]  ;;  %v9124_v5 = vld [vmem:[#allocation14_spill] sm:$0xff]  ;;  %v9138_v56 = vld [vmem:[#allocation20_spill] sm:$0xff] }
  0x9d   :  { %v623_v37 = vadd.f32 %v622_v62, %v621_v8  ;;  %v4987_v60 = vadd.f32 %v4919_v30, %v9106_v26  ;;  %v4991_v7 = vadd.f32 %v4921_v43, %v9108_v9  ;;  %v4995_v57 = vadd.f32 %v4923_v55, %v9110_v59  ;;  %v9116_v30 = vld [vmem:[#allocation10_spill] sm:$0xff]  ;;  %v9118_v43 = vld [vmem:[#allocation11_spill] sm:$0xff]  ;;  %v9120_v55 = vld [vmem:[#allocation12_spill] sm:$0xff] }
  0x9e   :  { %v630_v32 = vadd.f32 %v629_v12, %v628_v41  ;;  %v637_v51 = vadd.f32 %v636_v14, %v635_v38  ;;  %v644_v4 = vadd.f32 %v643_v19, %v642_v36  ;;  %v4999_v24 = vadd.f32 %v4925_v45, %v9112_v2  ;;  %v9122_v33 = vld [vmem:[#allocation13_spill] sm:$0xff]  ;;  %v9132_v8 = vld [vmem:[#allocation18_spill] sm:$0xff]  ;;  %v9135_v41 = vld [vmem:[#allocation19_spill] sm:$0xff] }
  0x9f   :  { %9107 = vst [vmem:[#allocation5_spill] sm:$0xff] %v4987_v60  ;;  %9109 = vst [vmem:[#allocation6_spill] sm:$0xff] %v4991_v7  ;;  %v5003_v27 = vadd.f32 %v4935_v52, %v9114_v16  ;;  %v5007_v10 = vadd.f32 %v4937_v28, %v9116_v30  ;;  %v5011_v35 = vadd.f32 %v4939_v25, %v9118_v43  ;;  %v9136_v38 = vld [vmem:[#allocation37_spill] sm:$0xff]  ;;  %v4026_v22 = vld [vmem:[%s9066_s0 + $0x98] sm:$0x7f] }
  0xa0   :  { %9111 = vst [vmem:[#allocation7_spill] sm:$0xff] %v4995_v57  ;;  %9113 = vst [vmem:[#allocation8_spill] sm:$0xff] %v4999_v24  ;;  %v5015_v21 = vadd.f32 %v4949_v40, %v9120_v55  ;;  %v5019_v45 = vadd.f32 %v4951_v50, %v9122_v33  ;;  %v5023_v52 = vadd.f32 %v4953_v17, %v9124_v5  ;;  %v4023_v40 = vld [vmem:[%s9066_s0 + $0x20] sm:$0x7f]  ;;  %v4024_v50 = vld [vmem:[%s9066_s0 + $0x28] sm:$0x7f] }
  0xa1   :  { %9115 = vst [vmem:[#allocation9_spill] sm:$0xff] %v5003_v27  ;;  %9117 = vst [vmem:[#allocation10_spill] sm:$0xff] %v5007_v10  ;;  %v5027_v28 = vadd.f32 %v4955_v46, %v9126_v53  ;;  %v5031_v25 = vadd.f32 %v4957_v39, %v9128_v31  ;;  %v4025_v17 = vld [vmem:[%s9066_s0 + $0x90] sm:$0x7f]  ;;  %v5044_v46 = vadd.f32 %v4959_v13, %v9130_v54  ;;  %v5063_v13 = vld [vmem:[%s9067_s1 + $0x20] sm:$0x7f] }
  0xa2   :  { %9119 = vst [vmem:[#allocation11_spill] sm:$0xff] %v5011_v35  ;;  %9121 = vst [vmem:[#allocation12_spill] sm:$0xff] %v5015_v21  ;;  %v5048_v39 = vadd.f32 %v9133_v34, %v9132_v8  ;;  %v5052_v36 = vadd.f32 %v9136_v38, %v9135_v41  ;;  %v5055_v44 = vadd.f32 %v539_v0, %v9138_v56  ;;  %v9140_v6 = vld [vmem:[#allocation21_spill] sm:$0xff]  ;;  %v9142_v20 = vld [vmem:[#allocation22_spill] sm:$0xff] }
  0xa3   :  { %9123 = vst [vmem:[#allocation13_spill] sm:$0xff] %v5019_v45  ;;  %9125 = vst [vmem:[#allocation14_spill] sm:$0xff] %v5023_v52  ;;  %v5071_v61 = vadd.f32 %v546_v23, %v9140_v6  ;;  %v5074_v0 = vadd.f32 %v553_v29, %v9142_v20  ;;  %v9144_v62 = vld [vmem:[#allocation23_spill] sm:$0xff]  ;;  %v9146_v14 = vld [vmem:[#allocation24_spill] sm:$0xff]  ;;  %v715_v55 = vmul.f32 %v5063_v13, %v4025_v17 }
  0xa4   :  { %9127 = vst [vmem:[#allocation15_spill] sm:$0xff] %v5027_v28  ;;  %9129 = vst [vmem:[#allocation16_spill] sm:$0xff] %v5031_v25  ;;  %v5077_v12 = vadd.f32 %v560_v63, %v9144_v62  ;;  %v5080_v19 = vadd.f32 %v567_v47, %v9146_v14  ;;  %v9148_v26 = vld [vmem:[#allocation25_spill] sm:$0xff]  ;;  %v9150_v59 = vld [vmem:[#allocation26_spill] sm:$0xff]  ;;  %v716_v33 = vmul.f32 %v5068_v58, %v4026_v22 }
  0xa5   :  { %9131 = vst [vmem:[#allocation17_spill] sm:$0xff] %v5044_v46  ;;  %9134 = vst [vmem:[#allocation18_spill] sm:$0xff] %v5048_v39  ;;  %v5083_v9 = vadd.f32 %v574_v15, %v9148_v26  ;;  %v5086_v2 = vadd.f32 %v581_v3, %v9150_v59  ;;  %v9152_v16 = vld [vmem:[#allocation27_spill] sm:$0xff]  ;;  %v9154_v23 = vld [vmem:[#allocation28_spill] sm:$0xff] }
  0xa6   :  { %9137 = vst [vmem:[#allocation36_spill] sm:$0xff] %v5052_v36  ;;  %9139 = vst [vmem:[#allocation19_spill] sm:$0xff] %v5055_v44  ;;  %v5089_v30 = vadd.f32 %v588_v49, %v9152_v16  ;;  %v5092_v43 = vadd.f32 %v595_v42, %v9154_v23  ;;  %v4027_v29 = vld [vmem:[%s9066_s0 + $0x100] sm:$0x7f]  ;;  %v4028_v63 = vld [vmem:[%s9066_s0 + $0x108] sm:$0x7f]  ;;  %v713_v49 = vmul.f32 %v5063_v13, %v4023_v40 }
  0xa7   :  { %9141 = vst [vmem:[#allocation37_spill] sm:$0xff] %v5071_v61  ;;  %9143 = vst [vmem:[#allocation20_spill] sm:$0xff] %v5074_v0  ;;  %v4029_v47 = vld [vmem:[%s9066_s0 + $0x170] sm:$0x7f]  ;;  %v4030_v15 = vld [vmem:[%s9066_s0 + $0x178] sm:$0x7f]  ;;  %v714_v42 = vmul.f32 %v5068_v58, %v4024_v50  ;;  %v718_v14 = vmul.f32 %v5068_v58, %v4028_v63 }
  0xa8   :  { %9145 = vst [vmem:[#allocation21_spill] sm:$0xff] %v5077_v12  ;;  %9147 = vst [vmem:[#allocation22_spill] sm:$0xff] %v5080_v19  ;;  %v4031_v3 = vld [vmem:[%s9066_s0 + $0x1e0] sm:$0x7f]  ;;  %v9158_v31 = vld [vmem:[#allocation30_spill] sm:$0xff]  ;;  %v719_v26 = vmul.f32 %v5063_v13, %v4029_v47  ;;  %v720_v59 = vmul.f32 %v5068_v58, %v4030_v15 }
  0xa9   :  { %9149 = vst [vmem:[#allocation23_spill] sm:$0xff] %v5083_v9  ;;  %9151 = vst [vmem:[#allocation24_spill] sm:$0xff] %v5086_v2  ;;  %v9156_v5 = vld [vmem:[#allocation29_spill] sm:$0xff]  ;;  %v5117_v54 = vadd.f32 %v609_v11, %v9158_v31  ;;  %v9160_v8 = vld [vmem:[#allocation31_spill] sm:$0xff]  ;;  %v5163_v16 = vmul.f32 %v5063_v13, %v4031_v3  ;;  %v759_v31 = vsel %vm96_vm0, %v715_v55, 0.0 }
  0xaa   :  { %9153 = vst [vmem:[#allocation25_spill] sm:$0xff] %v5089_v30  ;;  %9155 = vst [vmem:[#allocation26_spill] sm:$0xff] %v5092_v43  ;;  %v5114_v53 = vadd.f32 %v602_v48, %v9156_v5  ;;  %v5120_v34 = vadd.f32 %v616_v18, %v9160_v8  ;;  %v9162_v41 = vld [vmem:[#allocation32_spill] sm:$0xff]  ;;  %v4032_v40 = vld [vmem:[%s9066_s0 + $0x1e8] sm:$0x7f]  ;;  %v752_v5 = vsel %vm96_vm0, %v714_v42, 0.0 }
  0xab   :  { %9159 = vst [vmem:[#allocation28_spill] sm:$0xff] %v5117_v54  ;;  %v5123_v38 = vadd.f32 %v623_v37, %v9162_v41  ;;  %v4033_v50 = vld [vmem:[%s9066_s0 + $0x250] sm:$0x7f]  ;;  %v9164_v17 = vld [vmem:[#allocation33_spill] sm:$0xff]  ;;  %v4034_v37 = vld [vmem:[%s9066_s0 + $0x258] sm:$0x7f]  ;;  %v722_v3 = vmul.f32 %v5068_v58, %v4032_v40 }
  0xac   :  { %9157 = vst [vmem:[#allocation27_spill] sm:$0xff] %v5114_v53  ;;  %9161 = vst [vmem:[#allocation29_spill] sm:$0xff] %v5120_v34  ;;  %v5132_v48 = vadd.f32 %v630_v32, %v9164_v17  ;;  %v9166_v56 = vld [vmem:[#allocation34_spill] sm:$0xff]  ;;  %v9168_v22 = vld [vmem:[#allocation35_spill] sm:$0xff]  ;;  %v717_v32 = vmul.f32 %v5063_v13, %v4027_v29  ;;  %v745_v29 = vsel %vm96_vm0, %v713_v49, 0.0  ;;  %v766_v8 = vsel %vm96_vm0, %v716_v33, 0.0 }
  0xad   :  { %9163 = vst [vmem:[#allocation30_spill] sm:$0xff] %v5123_v38  ;;  %v5135_v11 = vadd.f32 %v637_v51, %v9166_v56  ;;  %v5138_v18 = vadd.f32 %v644_v4, %v9168_v22  ;;  %v4035_v6 = vld [vmem:[%s9066_s0 + $0x2c0] sm:$0x7f]  ;;  %v4036_v20 = vld [vmem:[%s9066_s0 + $0x2c8] sm:$0x7f]  ;;  %v723_v49 = vmul.f32 %v5063_v13, %v4033_v50  ;;  %v724_v42 = vmul.f32 %v5068_v58, %v4034_v37 }
  0xae   :  { %9165 = vst [vmem:[#allocation31_spill] sm:$0xff] %v5132_v48  ;;  %v4037_v51 = vld [vmem:[%s9066_s0 + $0x330] sm:$0x7f]  ;;  %v4038_v4 = vld [vmem:[%s9066_s0 + $0x338] sm:$0x7f]  ;;  %v5185_v55 = vmul.f32 %v5063_v13, %v4035_v6  ;;  %v726_v17 = vmul.f32 %v5068_v58, %v4036_v20  ;;  %v773_v50 = vsel %vm96_vm0, %v717_v32, 0.0 }
  0xaf   :  { %9167 = vst [vmem:[#allocation32_spill] sm:$0xff] %v5135_v11  ;;  %9169 = vst [vmem:[#allocation33_spill] sm:$0xff] %v5138_v18  ;;  %v4039_v62 = vld [vmem:[%s9066_s0 + $0x3a0] sm:$0x7f]  ;;  %v4040_v23 = vld [vmem:[%s9066_s0 + $0x3a8] sm:$0x7f]  ;;  %v727_v56 = vmul.f32 %v5063_v13, %v4037_v51  ;;  %v728_v40 = vmul.f32 %v5068_v58, %v4038_v4 }
  0xb0   :  { %v4041_v63 = vld [vmem:[%s9066_s0 + $0x410] sm:$0x7f]  ;;  %v4042_v47 = vld [vmem:[%s9066_s0 + $0x418] sm:$0x7f]  ;;  %v4043_v15 = vld [vmem:[%s9066_s0 + $0x480] sm:$0x7f]  ;;  %v5207_v51 = vmul.f32 %v5063_v13, %v4039_v62  ;;  %v5210_v32 = vmul.f32 %v5068_v58, %v4040_v23 }
  0xb1   :  { %v4044_v33 = vld [vmem:[%s9066_s0 + $0x488] sm:$0x7f]  ;;  %v4045_v41 = vld [vmem:[%s9066_s0 + $0x4f0] sm:$0x7f]  ;;  %v4046_v22 = vld [vmem:[%s9066_s0 + $0x4f8] sm:$0x7f]  ;;  %v5213_v4 = vmul.f32 %v5063_v13, %v4041_v63  ;;  %v5216_v38 = vmul.f32 %v5068_v58, %v4042_v47  ;;  %v5225_v62 = vmul.f32 %v5063_v13, %v4043_v15 }
  0xb2   :  { %v746_v37 = vrot.slane %v745_v29, 4  ;;  %v753_v6 = vrot.slane %v752_v5, 4  ;;  %v760_v18 = vrot.slane %v759_v31, 4  ;;  %v767_v11 = vrot.slane %v766_v8, 4  ;;  %v4047_v48 = vld [vmem:[%s9066_s0 + $0x560] sm:$0x7f] }
  0xb3   :  { %v4048_v20 = vld [vmem:[%s9066_s0 + $0x568] sm:$0x7f]  ;;  %v4049_v34 = vld [vmem:[%s9066_s0 + $0x5d0] sm:$0x7f]  ;;  %v4050_v54 = vld [vmem:[%s9066_s0 + $0x5d8] sm:$0x7f]  ;;  %v5228_v23 = vmul.f32 %v5068_v58, %v4044_v33  ;;  %v5231_v63 = vmul.f32 %v5063_v13, %v4045_v41  ;;  %v5237_v43 = vmul.f32 %v5068_v58, %v4046_v22 }
  0xb4   :  { %v774_v53 = vrot.slane %v773_v50, 4  ;;  %v4051_v47 = vld [vmem:[%s9066_s0 + $0x640] sm:$0x7f]  ;;  %v780_v30 = vsel %vm96_vm0, %v718_v14, 0.0  ;;  %v787_v2 = vsel %vm96_vm0, %v719_v26, 0.0  ;;  %v794_v15 = vsel %vm96_vm0, %v720_v59, 0.0 }
  0xb5   :  { %v4052_v33 = vld [vmem:[%s9066_s0 + $0x648] sm:$0x7f]  ;;  %v4053_v41 = vld [vmem:[%s9066_s0 + $0x6b0] sm:$0x7f]  ;;  %v4054_v9 = vld [vmem:[%s9066_s0 + $0x6b8] sm:$0x7f]  ;;  %v747_v22 = vadd.f32 %v746_v37, %v745_v29  ;;  %v754_v19 = vadd.f32 %v753_v6, %v752_v5  ;;  %v761_v12 = vadd.f32 %v760_v18, %v759_v31  ;;  %v768_v14 = vadd.f32 %v767_v11, %v766_v8 }
  0xb6   :  { %v5252_v26 = vmul.f32 %v5063_v13, %v4047_v48  ;;  %v5255_v59 = vmul.f32 %v5068_v58, %v4048_v20  ;;  %v5258_v0 = vmul.f32 %v5063_v13, %v4049_v34  ;;  %v5261_v61 = vmul.f32 %v5068_v58, %v4050_v54 }
  0xb7   :  { %v775_v44 = vadd.f32 %v774_v53, %v773_v50  ;;  %v781_v36 = vrot.slane %v780_v30, 4  ;;  %v788_v39 = vrot.slane %v787_v2, 4  ;;  %v795_v46 = vrot.slane %v794_v15, 4 }
  0xb8   :  { %v5264_v29 = vmul.f32 %v5063_v13, %v4051_v47  ;;  %v5267_v11 = vmul.f32 %v5068_v58, %v4052_v33  ;;  %v5270_v48 = vmul.f32 %v5063_v13, %v4053_v41  ;;  %v5273_v18 = vmul.f32 %v5068_v58, %v4054_v9 }
  0xb9   :  { %v748_v34 = vrot.slane %v747_v22, 2  ;;  %v755_v5 = vrot.slane %v754_v19, 2  ;;  %v762_v54 = vrot.slane %v761_v12, 2  ;;  %v769_v31 = vrot.slane %v768_v14, 2 }
  0xba   :  { %v801_v53 = vsel %vm96_vm0, %v5163_v16, 0.0  ;;  %v808_v8 = vsel %vm96_vm0, %v722_v3, 0.0  ;;  %v815_v50 = vsel %vm96_vm0, %v723_v49, 0.0  ;;  %v822_v37 = vsel %vm96_vm0, %v724_v42, 0.0 }
  0xbb   :  { %v776_v6 = vrot.slane %v775_v44, 2  ;;  %v782_v20 = vadd.f32 %v781_v36, %v780_v30  ;;  %v789_v13 = vadd.f32 %v788_v39, %v787_v2  ;;  %v796_v47 = vadd.f32 %v795_v46, %v794_v15 }
  0xbc   :  { %v802_v33 = vrot.slane %v801_v53, 4  ;;  %v809_v58 = vrot.slane %v808_v8, 4  ;;  %v816_v9 = vrot.slane %v815_v50, 4  ;;  %v823_v41 = vrot.slane %v822_v37, 4 }
  0xbd   :  { %v829_v25 = vsel %vm96_vm0, %v5185_v55, 0.0  ;;  %v836_v28 = vsel %vm96_vm0, %v726_v17, 0.0  ;;  %v843_v16 = vsel %vm96_vm0, %v727_v56, 0.0  ;;  %v850_v3 = vsel %vm96_vm0, %v728_v40, 0.0 }
  0xbe   :  { %v749_v49 = vadd.f32 %v748_v34, %v747_v22  ;;  %v756_v52 = vadd.f32 %v755_v5, %v754_v19  ;;  %v763_v42 = vadd.f32 %v762_v54, %v761_v12  ;;  %v770_v45 = vadd.f32 %v769_v31, %v768_v14 }
  0xbf   :  { %v783_v36 = vrot.slane %v782_v20, 2  ;;  %v830_v39 = vrot.slane %v829_v25, 4  ;;  %v837_v46 = vrot.slane %v836_v28, 4  ;;  %v844_v2 = vrot.slane %v843_v16, 4 }
  0xc0   :  { %v777_v30 = vadd.f32 %v776_v6, %v775_v44  ;;  %v790_v15 = vrot.slane %v789_v13, 2  ;;  %v797_v21 = vrot.slane %v796_v47, 2  ;;  %v851_v35 = vrot.slane %v850_v3, 4 }
  0xc1   :  { %v803_v10 = vadd.f32 %v802_v33, %v801_v53  ;;  %v810_v55 = vadd.f32 %v809_v58, %v808_v8  ;;  %v817_v27 = vadd.f32 %v816_v9, %v815_v50  ;;  %v824_v17 = vadd.f32 %v823_v41, %v822_v37 }
  0xc2   :  { %v750_v24 = vrot.slane %v749_v49, 1  ;;  %v757_v56 = vrot.slane %v756_v52, 1  ;;  %v764_v57 = vrot.slane %v763_v42, 1  ;;  %v771_v40 = vrot.slane %v770_v45, 1 }
  0xc3   :  { %v784_v22 = vadd.f32 %v783_v36, %v782_v20  ;;  %v831_v19 = vadd.f32 %v830_v39, %v829_v25  ;;  %v838_v12 = vadd.f32 %v837_v46, %v836_v28  ;;  %v845_v14 = vadd.f32 %v844_v2, %v843_v16 }
  0xc4   :  { %v778_v34 = vrot.slane %v777_v30, 1  ;;  %v791_v5 = vadd.f32 %v790_v15, %v789_v13  ;;  %v798_v54 = vadd.f32 %v797_v21, %v796_v47  ;;  %v852_v31 = vadd.f32 %v851_v35, %v850_v3 }
  0xc5   :  { %v804_v44 = vrot.slane %v803_v10, 2  ;;  %v811_v6 = vrot.slane %v810_v55, 2  ;;  %v818_v7 = vrot.slane %v817_v27, 2  ;;  %v825_v60 = vrot.slane %v824_v17, 2 }
  0xc6   :  { %v5285_v53 = vadd.f32 %v750_v24, %v749_v49  ;;  %v5287_v8 = vadd.f32 %v757_v56, %v756_v52  ;;  %v5289_v50 = vadd.f32 %v764_v57, %v763_v42  ;;  %v5291_v37 = vadd.f32 %v771_v40, %v770_v45 }
  0xc7   :  { %v785_v20 = vrot.slane %v784_v22, 1  ;;  %v832_v25 = vrot.slane %v831_v19, 2  ;;  %v839_v28 = vrot.slane %v838_v12, 2  ;;  %v846_v33 = vrot.slane %v845_v14, 2 }
  0xc8   :  { %v5293_v58 = vadd.f32 %v778_v34, %v777_v30  ;;  %v792_v21 = vrot.slane %v791_v5, 1  ;;  %v799_v35 = vrot.slane %v798_v54, 1  ;;  %v853_v13 = vrot.slane %v852_v31, 2 }
  0xc9   :  { %v805_v47 = vadd.f32 %v804_v44, %v803_v10  ;;  %v812_v9 = vadd.f32 %v811_v6, %v810_v55  ;;  %v819_v41 = vadd.f32 %v818_v7, %v817_v27  ;;  %v826_v24 = vadd.f32 %v825_v60, %v824_v17 }
  0xca   :  { %v857_v52 = vsel %vm96_vm0, %v5207_v51, 0.0  ;;  %v864_v57 = vsel %vm96_vm0, %v5210_v32, 0.0  ;;  %v871_v45 = vsel %vm96_vm0, %v5213_v4, 0.0  ;;  %v878_v16 = vsel %vm96_vm0, %v5216_v38, 0.0 }
  0xcb   :  { %v5303_v3 = vadd.f32 %v785_v20, %v784_v22  ;;  %v833_v49 = vadd.f32 %v832_v25, %v831_v19  ;;  %v840_v42 = vadd.f32 %v839_v28, %v838_v12  ;;  %v847_v10 = vadd.f32 %v846_v33, %v845_v14 }
  0xcc   :  { %v5305_v36 = vadd.f32 %v792_v21, %v791_v5  ;;  %v5307_v60 = vadd.f32 %v799_v35, %v798_v54  ;;  %v854_v7 = vadd.f32 %v853_v13, %v852_v31  ;;  %v885_v27 = vsel %vm96_vm0, %v5225_v62, 0.0 }
  0xcd   :  { %v858_v51 = vrot.slane %v857_v52, 4  ;;  %v865_v32 = vrot.slane %v864_v57, 4  ;;  %v872_v39 = vrot.slane %v871_v45, 4  ;;  %v879_v4 = vrot.slane %v878_v16, 4 }
  0xce   :  { %v806_v46 = vrot.slane %v805_v47, 1  ;;  %v813_v2 = vrot.slane %v812_v9, 1  ;;  %v820_v38 = vrot.slane %v819_v41, 1  ;;  %v827_v30 = vrot.slane %v826_v24, 1 }
  0xcf   :  { %v834_v15 = vrot.slane %v833_v49, 1  ;;  %v841_v55 = vrot.slane %v840_v42, 1  ;;  %v848_v17 = vrot.slane %v847_v10, 1  ;;  %v886_v56 = vrot.slane %v885_v27, 4 }
  0xd0   :  { %v855_v40 = vrot.slane %v854_v7, 1  ;;  %v892_v22 = vsel %vm96_vm0, %v5228_v23, 0.0  ;;  %v899_v19 = vsel %vm96_vm0, %v5231_v63, 0.0  ;;  %v906_v62 = vsel %vm96_vm0, %v5237_v43, 0.0 }
  0xd1   :  { %v859_v12 = vadd.f32 %v858_v51, %v857_v52  ;;  %v866_v14 = vadd.f32 %v865_v32, %v864_v57  ;;  %v873_v34 = vadd.f32 %v872_v39, %v871_v45  ;;  %v880_v5 = vadd.f32 %v879_v4, %v878_v16 }
  0xd2   :  { %v5317_v54 = vadd.f32 %v806_v46, %v805_v47  ;;  %v5319_v31 = vadd.f32 %v813_v2, %v812_v9  ;;  %v5321_v44 = vadd.f32 %v820_v38, %v819_v41  ;;  %v5323_v6 = vadd.f32 %v827_v30, %v826_v24 }
  0xd3   :  { %v887_v20 = vadd.f32 %v886_v56, %v885_v27  ;;  %v893_v23 = vrot.slane %v892_v22, 4  ;;  %v900_v25 = vrot.slane %v899_v19, 4  ;;  %v907_v28 = vrot.slane %v906_v62, 4 }
  0xd4   :  { %v5325_v63 = vadd.f32 %v834_v15, %v833_v49  ;;  %v5327_v33 = vadd.f32 %v841_v55, %v840_v42  ;;  %v5329_v43 = vadd.f32 %v848_v17, %v847_v10  ;;  %v5331_v21 = vadd.f32 %v855_v40, %v854_v7 }
  0xd5   :  { %v860_v35 = vrot.slane %v859_v12, 2  ;;  %v867_v13 = vrot.slane %v866_v14, 2  ;;  %v874_v47 = vrot.slane %v873_v34, 2  ;;  %v881_v9 = vrot.slane %v880_v5, 2 }
  0xd6   :  { %9170 = vst [vmem:[#allocation34_spill] sm:$0xff] %v5329_v43  ;;  %9171 = vst [vmem:[#allocation35_spill] sm:$0xff] %v5331_v21  ;;  %v913_v41 = vsel %vm96_vm0, %v5252_v26, 0.0  ;;  %v920_v24 = vsel %vm96_vm0, %v5255_v59, 0.0  ;;  %v927_v52 = vsel %vm96_vm0, %v5258_v0, 0.0  ;;  %v934_v57 = vsel %vm96_vm0, %v5261_v61, 0.0 }
  0xd7   :  { %v888_v45 = vrot.slane %v887_v20, 2  ;;  %v894_v16 = vadd.f32 %v893_v23, %v892_v22  ;;  %v901_v49 = vadd.f32 %v900_v25, %v899_v19  ;;  %v908_v42 = vadd.f32 %v907_v28, %v906_v62 }
  0xd8   :  { %v914_v10 = vrot.slane %v913_v41, 4  ;;  %v921_v7 = vrot.slane %v920_v24, 4  ;;  %v928_v27 = vrot.slane %v927_v52, 4  ;;  %v935_v51 = vrot.slane %v934_v57, 4 }
  0xd9   :  { %v941_v26 = vsel %vm96_vm0, %v5264_v29, 0.0  ;;  %v948_v59 = vsel %vm96_vm0, %v5267_v11, 0.0  ;;  %v955_v0 = vsel %vm96_vm0, %v5270_v48, 0.0  ;;  %v962_v61 = vsel %vm96_vm0, %v5273_v18, 0.0 }
  0xda   :  { %v915_v32 = vadd.f32 %v914_v10, %v913_v41  ;;  %v922_v39 = vadd.f32 %v921_v7, %v920_v24  ;;  %v929_v4 = vadd.f32 %v928_v27, %v927_v52  ;;  %v936_v46 = vadd.f32 %v935_v51, %v934_v57 }
  0xdb   :  { %v942_v2 = vrot.slane %v941_v26, 4  ;;  %v949_v38 = vrot.slane %v948_v59, 4  ;;  %v956_v30 = vrot.slane %v955_v0, 4  ;;  %v963_v15 = vrot.slane %v962_v61, 4 }
  0xdc   :  { %v895_v55 = vrot.slane %v894_v16, 2  ;;  %v902_v17 = vrot.slane %v901_v49, 2  ;;  %v909_v29 = vrot.slane %v908_v42, 2  ;;  %v916_v56 = vrot.slane %v915_v32, 2 }
  0xdd   :  { %v943_v40 = vadd.f32 %v942_v2, %v941_v26  ;;  %v950_v11 = vadd.f32 %v949_v38, %v948_v59  ;;  %v957_v22 = vadd.f32 %v956_v30, %v955_v0  ;;  %v964_v19 = vadd.f32 %v963_v15, %v962_v61 }
  0xde   :  { %v861_v48 = vadd.f32 %v860_v35, %v859_v12  ;;  %v923_v62 = vrot.slane %v922_v39, 2  ;;  %v930_v23 = vrot.slane %v929_v4, 2  ;;  %v937_v18 = vrot.slane %v936_v46, 2 }
  0xdf   :  { %v868_v25 = vadd.f32 %v867_v13, %v866_v14  ;;  %v875_v28 = vadd.f32 %v874_v47, %v873_v34  ;;  %v882_v41 = vadd.f32 %v881_v9, %v880_v5  ;;  %v944_v24 = vrot.slane %v943_v40, 2 }
  0xe0   :  { %v889_v52 = vadd.f32 %v888_v45, %v887_v20  ;;  %v951_v57 = vrot.slane %v950_v11, 2  ;;  %v958_v10 = vrot.slane %v957_v22, 2  ;;  %v965_v7 = vrot.slane %v964_v19, 2 }
  0xe1   :  { %v896_v27 = vadd.f32 %v895_v55, %v894_v16  ;;  %v903_v51 = vadd.f32 %v902_v17, %v901_v49  ;;  %v910_v21 = vadd.f32 %v909_v29, %v908_v42  ;;  %v917_v43 = vadd.f32 %v916_v56, %v915_v32 }
  0xe2   :  { %v862_v26 = vrot.slane %v861_v48, 1  ;;  %v924_v59 = vadd.f32 %v923_v62, %v922_v39  ;;  %v931_v0 = vadd.f32 %v930_v23, %v929_v4  ;;  %v938_v61 = vadd.f32 %v937_v18, %v936_v46 }
  0xe3   :  { %v869_v12 = vrot.slane %v868_v25, 1  ;;  %v876_v35 = vrot.slane %v875_v28, 1  ;;  %v883_v2 = vrot.slane %v882_v41, 1  ;;  %v945_v38 = vadd.f32 %v944_v24, %v943_v40 }
  0xe4   :  { %v890_v14 = vrot.slane %v889_v52, 1  ;;  %v952_v34 = vadd.f32 %v951_v57, %v950_v11  ;;  %v959_v5 = vadd.f32 %v958_v10, %v957_v22  ;;  %v966_v13 = vadd.f32 %v965_v7, %v964_v19  ;;  %v9178_v7 = vld [vmem:[#allocation8_spill] sm:$0xff] }
  0xe5   :  { %v897_v20 = vrot.slane %v896_v27, 1  ;;  %v904_v47 = vrot.slane %v903_v51, 1  ;;  %v911_v9 = vrot.slane %v910_v21, 1  ;;  %v918_v45 = vrot.slane %v917_v43, 1 }
  0xe6   :  { %v863_v16 = vadd.f32 %v862_v26, %v861_v48  ;;  %v925_v49 = vrot.slane %v924_v59, 1  ;;  %v932_v42 = vrot.slane %v931_v0, 1  ;;  %v939_v32 = vrot.slane %v938_v61, 1 }
  0xe7   :  { %v870_v30 = vadd.f32 %v869_v12, %v868_v25  ;;  %v877_v39 = vadd.f32 %v876_v35, %v875_v28  ;;  %v884_v4 = vadd.f32 %v883_v2, %v882_v41  ;;  %v946_v46 = vrot.slane %v945_v38, 1  ;;  %v9172_v25 = vld [vmem:[#allocation5_spill] sm:$0xff]  ;;  %v9174_v41 = vld [vmem:[#allocation6_spill] sm:$0xff]  ;;  %v9192_v12 = vld [vmem:[#allocation15_spill] sm:$0xff] }
  0xe8   :  { %v891_v15 = vadd.f32 %v890_v14, %v889_v52  ;;  %v953_v55 = vrot.slane %v952_v34, 1  ;;  %v960_v17 = vrot.slane %v959_v5, 1  ;;  %v967_v29 = vrot.slane %v966_v13, 1  ;;  %v9176_v52 = vld [vmem:[#allocation7_spill] sm:$0xff]  ;;  %v9194_v35 = vld [vmem:[#allocation16_spill] sm:$0xff]  ;;  %v9196_v2 = vld [vmem:[#allocation17_spill] sm:$0xff] }
  0xe9   :  { %v898_v56 = vadd.f32 %v897_v20, %v896_v27  ;;  %v905_v40 = vadd.f32 %v904_v47, %v903_v51  ;;  %v912_v11 = vadd.f32 %v911_v9, %v910_v21  ;;  %v919_v22 = vadd.f32 %v918_v45, %v917_v43  ;;  %v9199_v14 = vld [vmem:[#allocation34_spill] sm:$0xff]  ;;  %v9204_v20 = vld [vmem:[#allocation19_spill] sm:$0xff] }
  0xea   :  { %v926_v19 = vadd.f32 %v925_v49, %v924_v59  ;;  %v933_v62 = vadd.f32 %v932_v42, %v931_v0  ;;  %v940_v23 = vadd.f32 %v939_v32, %v938_v61  ;;  %v5351_v48 = vadd.f32 %v5285_v53, %v4983_v1  ;;  %v9180_v53 = vld [vmem:[#allocation9_spill] sm:$0xff]  ;;  %v9190_v61 = vld [vmem:[#allocation14_spill] sm:$0xff]  ;;  %v4058_v9 = vld [vmem:[%s9066_s0 + $0x38] sm:$0x7f] }
  0xeb   :  { %v947_v18 = vadd.f32 %v946_v46, %v945_v38  ;;  %v5355_v28 = vadd.f32 %v5287_v8, %v9172_v25  ;;  %v5359_v24 = vadd.f32 %v5289_v50, %v9174_v41  ;;  %v5363_v21 = vadd.f32 %v5291_v37, %v9176_v52  ;;  %v9182_v8 = vld [vmem:[#allocation10_spill] sm:$0xff]  ;;  %v9184_v50 = vld [vmem:[#allocation11_spill] sm:$0xff]  ;;  %v9186_v37 = vld [vmem:[#allocation12_spill] sm:$0xff] }
  0xec   :  { %v954_v43 = vadd.f32 %v953_v55, %v952_v34  ;;  %v961_v57 = vadd.f32 %v960_v17, %v959_v5  ;;  %v968_v10 = vadd.f32 %v967_v29, %v966_v13  ;;  %v5367_v1 = vadd.f32 %v5293_v58, %v9178_v7  ;;  %v9188_v0 = vld [vmem:[#allocation13_spill] sm:$0xff]  ;;  %v9198_v38 = vld [vmem:[#allocation18_spill] sm:$0xff]  ;;  %v9201_v34 = vld [vmem:[#allocation36_spill] sm:$0xff] }
  0xed   :  { %9173 = vst [vmem:[#allocation5_spill] sm:$0xff] %v5355_v28  ;;  %9175 = vst [vmem:[#allocation6_spill] sm:$0xff] %v5359_v24  ;;  %v5371_v27 = vadd.f32 %v5303_v3, %v9180_v53  ;;  %v5375_v51 = vadd.f32 %v5305_v36, %v9182_v8  ;;  %v5379_v26 = vadd.f32 %v5307_v60, %v9184_v50  ;;  %v9202_v5 = vld [vmem:[#allocation35_spill] sm:$0xff]  ;;  %v9206_v49 = vld [vmem:[#allocation37_spill] sm:$0xff] }
  0xee   :  { %9177 = vst [vmem:[#allocation7_spill] sm:$0xff] %v5363_v21  ;;  %9179 = vst [vmem:[#allocation8_spill] sm:$0xff] %v5367_v1  ;;  %v5383_v59 = vadd.f32 %v5317_v54, %v9186_v37  ;;  %v5387_v58 = vadd.f32 %v5319_v31, %v9188_v0  ;;  %v5391_v3 = vadd.f32 %v5321_v44, %v9190_v61  ;;  %v4057_v54 = vld [vmem:[%s9066_s0 + $0x30] sm:$0x7f]  ;;  %v4059_v31 = vld [vmem:[%s9066_s0 + $0xa0] sm:$0x7f] }
  0xef   :  { %9181 = vst [vmem:[#allocation9_spill] sm:$0xff] %v5371_v27  ;;  %9183 = vst [vmem:[#allocation10_spill] sm:$0xff] %v5375_v51  ;;  %v5395_v36 = vadd.f32 %v5323_v6, %v9192_v12  ;;  %v5399_v60 = vadd.f32 %v5325_v63, %v9194_v35  ;;  %v4060_v44 = vld [vmem:[%s9066_s0 + $0xa8] sm:$0x7f]  ;;  %v5412_v6 = vadd.f32 %v5327_v33, %v9196_v2  ;;  %v5431_v33 = vld [vmem:[%s9067_s1 + $0x30] sm:$0x7f] }
  0xf0   :  { %9185 = vst [vmem:[#allocation11_spill] sm:$0xff] %v5379_v26  ;;  %9187 = vst [vmem:[#allocation12_spill] sm:$0xff] %v5383_v59  ;;  %v5416_v63 = vadd.f32 %v9199_v14, %v9198_v38  ;;  %v5420_v13 = vadd.f32 %v9202_v5, %v9201_v34  ;;  %v5423_v47 = vadd.f32 %v863_v16, %v9204_v20  ;;  %v5436_v45 = vld [vmem:[%s9067_s1 + $0x38] sm:$0x7f]  ;;  %v9210_v46 = vld [vmem:[#allocation21_spill] sm:$0xff] }
  0xf1   :  { %9189 = vst [vmem:[#allocation13_spill] sm:$0xff] %v5387_v58  ;;  %9191 = vst [vmem:[#allocation14_spill] sm:$0xff] %v5391_v3  ;;  %v5439_v42 = vadd.f32 %v870_v30, %v9206_v49  ;;  %v9208_v32 = vld [vmem:[#allocation20_spill] sm:$0xff]  ;;  %v5445_v55 = vadd.f32 %v884_v4, %v9210_v46  ;;  %v9212_v17 = vld [vmem:[#allocation22_spill] sm:$0xff]  ;;  %v1039_v37 = vmul.f32 %v5431_v33, %v4059_v31 }
  0xf2   :  { %9193 = vst [vmem:[#allocation15_spill] sm:$0xff] %v5395_v36  ;;  %9195 = vst [vmem:[#allocation16_spill] sm:$0xff] %v5399_v60  ;;  %v5442_v16 = vadd.f32 %v877_v39, %v9208_v32  ;;  %v5448_v29 = vadd.f32 %v891_v15, %v9212_v17  ;;  %v9214_v25 = vld [vmem:[#allocation23_spill] sm:$0xff]  ;;  %v9216_v52 = vld [vmem:[#allocation24_spill] sm:$0xff]  ;;  %v1040_v0 = vmul.f32 %v5436_v45, %v4060_v44 }
  0xf3   :  { %9197 = vst [vmem:[#allocation17_spill] sm:$0xff] %v5412_v6  ;;  %9200 = vst [vmem:[#allocation18_spill] sm:$0xff] %v5416_v63  ;;  %v5451_v41 = vadd.f32 %v898_v56, %v9214_v25  ;;  %v5454_v7 = vadd.f32 %v905_v40, %v9216_v52  ;;  %v9218_v53 = vld [vmem:[#allocation25_spill] sm:$0xff]  ;;  %v9220_v30 = vld [vmem:[#allocation26_spill] sm:$0xff] }
  0xf4   :  { %9203 = vst [vmem:[#allocation34_spill] sm:$0xff] %v5420_v13  ;;  %9205 = vst [vmem:[#allocation36_spill] sm:$0xff] %v5423_v47  ;;  %v5457_v8 = vadd.f32 %v912_v11, %v9218_v53  ;;  %v5460_v50 = vadd.f32 %v919_v22, %v9220_v30  ;;  %v4061_v39 = vld [vmem:[%s9066_s0 + $0x110] sm:$0x7f]  ;;  %v4062_v4 = vld [vmem:[%s9066_s0 + $0x118] sm:$0x7f]  ;;  %v1037_v11 = vmul.f32 %v5431_v33, %v4057_v54 }
  0xf5   :  { %9207 = vst [vmem:[#allocation35_spill] sm:$0xff] %v5439_v42  ;;  %9209 = vst [vmem:[#allocation19_spill] sm:$0xff] %v5442_v16  ;;  %v4063_v15 = vld [vmem:[%s9066_s0 + $0x180] sm:$0x7f]  ;;  %v4064_v56 = vld [vmem:[%s9066_s0 + $0x188] sm:$0x7f]  ;;  %v1038_v22 = vmul.f32 %v5436_v45, %v4058_v9  ;;  %v1042_v17 = vmul.f32 %v5436_v45, %v4062_v4 }
  0xf6   :  { %9211 = vst [vmem:[#allocation37_spill] sm:$0xff] %v5445_v55  ;;  %9213 = vst [vmem:[#allocation20_spill] sm:$0xff] %v5448_v29  ;;  %v4065_v40 = vld [vmem:[%s9066_s0 + $0x1f0] sm:$0x7f]  ;;  %v9224_v35 = vld [vmem:[#allocation28_spill] sm:$0xff]  ;;  %v1043_v25 = vmul.f32 %v5431_v33, %v4063_v15  ;;  %v1044_v52 = vmul.f32 %v5436_v45, %v4064_v56 }
  0xf7   :  { %9215 = vst [vmem:[#allocation21_spill] sm:$0xff] %v5451_v41  ;;  %9217 = vst [vmem:[#allocation22_spill] sm:$0xff] %v5454_v7  ;;  %v9222_v61 = vld [vmem:[#allocation27_spill] sm:$0xff]  ;;  %v5485_v2 = vadd.f32 %v933_v62, %v9224_v35  ;;  %v9226_v38 = vld [vmem:[#allocation29_spill] sm:$0xff]  ;;  %v5531_v53 = vmul.f32 %v5431_v33, %v4065_v40  ;;  %v1083_v35 = vsel %vm96_vm0, %v1039_v37, 0.0 }
  0xf8   :  { %9219 = vst [vmem:[#allocation23_spill] sm:$0xff] %v5457_v8  ;;  %9221 = vst [vmem:[#allocation24_spill] sm:$0xff] %v5460_v50  ;;  %v5482_v12 = vadd.f32 %v926_v19, %v9222_v61  ;;  %v5488_v14 = vadd.f32 %v940_v23, %v9226_v38  ;;  %v9228_v34 = vld [vmem:[#allocation30_spill] sm:$0xff]  ;;  %v4066_v54 = vld [vmem:[%s9066_s0 + $0x1f8] sm:$0x7f]  ;;  %v1076_v61 = vsel %vm96_vm0, %v1038_v22, 0.0 }
  0xf9   :  { %9225 = vst [vmem:[#allocation26_spill] sm:$0xff] %v5485_v2  ;;  %v5491_v5 = vadd.f32 %v947_v18, %v9228_v34  ;;  %v9230_v20 = vld [vmem:[#allocation31_spill] sm:$0xff]  ;;  %v9232_v44 = vld [vmem:[#allocation32_spill] sm:$0xff]  ;;  %v9234_v19 = vld [vmem:[#allocation33_spill] sm:$0xff]  ;;  %v1090_v38 = vsel %vm96_vm0, %v1040_v0, 0.0  ;;  %v1046_v40 = vmul.f32 %v5436_v45, %v4066_v54  ;;  %v1104_v8 = vsel %vm96_vm0, %v1042_v17, 0.0 }
  0xfa   :  { %9223 = vst [vmem:[#allocation25_spill] sm:$0xff] %v5482_v12  ;;  %9227 = vst [vmem:[#allocation27_spill] sm:$0xff] %v5488_v14  ;;  %v5497_v31 = vadd.f32 %v954_v43, %v9230_v20  ;;  %v5500_v9 = vadd.f32 %v961_v57, %v9232_v44  ;;  %v5503_v49 = vadd.f32 %v968_v10, %v9234_v19  ;;  %v4067_v62 = vld [vmem:[%s9066_s0 + $0x260] sm:$0x7f]  ;;  %v4068_v23 = vld [vmem:[%s9066_s0 + $0x268] sm:$0x7f] }
  0xfb   :  { %9229 = vst [vmem:[#allocation28_spill] sm:$0xff] %v5491_v5  ;;  %v4069_v18 = vld [vmem:[%s9066_s0 + $0x2d0] sm:$0x7f]  ;;  %v1041_v43 = vmul.f32 %v5431_v33, %v4061_v39  ;;  %v4070_v57 = vld [vmem:[%s9066_s0 + $0x2d8] sm:$0x7f]  ;;  %v1069_v39 = vsel %vm96_vm0, %v1037_v11, 0.0  ;;  %v1047_v11 = vmul.f32 %v5431_v33, %v4067_v62  ;;  %v1048_v22 = vmul.f32 %v5436_v45, %v4068_v23 }
  0xfc   :  { %9231 = vst [vmem:[#allocation29_spill] sm:$0xff] %v5497_v31  ;;  %9233 = vst [vmem:[#allocation30_spill] sm:$0xff] %v5500_v9  ;;  %v4071_v10 = vld [vmem:[%s9066_s0 + $0x340] sm:$0x7f]  ;;  %v4072_v32 = vld [vmem:[%s9066_s0 + $0x348] sm:$0x7f]  ;;  %v5553_v37 = vmul.f32 %v5431_v33, %v4069_v18  ;;  %v1050_v20 = vmul.f32 %v5436_v45, %v4070_v57 }
  0xfd   :  { %9235 = vst [vmem:[#allocation31_spill] sm:$0xff] %v5503_v49  ;;  %v4073_v46 = vld [vmem:[%s9066_s0 + $0x3b0] sm:$0x7f]  ;;  %v4074_v30 = vld [vmem:[%s9066_s0 + $0x3b8] sm:$0x7f]  ;;  %v1051_v44 = vmul.f32 %v5431_v33, %v4071_v10  ;;  %v1052_v54 = vmul.f32 %v5436_v45, %v4072_v32  ;;  %v1097_v19 = vsel %vm96_vm0, %v1041_v43, 0.0 }
  0xfe   :  { %v4075_v4 = vld [vmem:[%s9066_s0 + $0x420] sm:$0x7f]  ;;  %v4076_v15 = vld [vmem:[%s9066_s0 + $0x428] sm:$0x7f]  ;;  %v4077_v56 = vld [vmem:[%s9066_s0 + $0x490] sm:$0x7f]  ;;  %v5575_v10 = vmul.f32 %v5431_v33, %v4073_v46  ;;  %v5578_v43 = vmul.f32 %v5436_v45, %v4074_v30 }
  0xff   :  { %v4078_v0 = vld [vmem:[%s9066_s0 + $0x498] sm:$0x7f]  ;;  %v4079_v34 = vld [vmem:[%s9066_s0 + $0x500] sm:$0x7f]  ;;  %v4080_v62 = vld [vmem:[%s9066_s0 + $0x508] sm:$0x7f]  ;;  %v5581_v32 = vmul.f32 %v5431_v33, %v4075_v4  ;;  %v5584_v5 = vmul.f32 %v5436_v45, %v4076_v15  ;;  %v5593_v46 = vmul.f32 %v5431_v33, %v4077_v56 }
 0x100   :  { %v1070_v23 = vrot.slane %v1069_v39, 4  ;;  %v1077_v18 = vrot.slane %v1076_v61, 4  ;;  %v1084_v49 = vrot.slane %v1083_v35, 4  ;;  %v1091_v9 = vrot.slane %v1090_v38, 4  ;;  %v4081_v31 = vld [vmem:[%s9066_s0 + $0x570] sm:$0x7f] }
 0x101   :  { %v4082_v57 = vld [vmem:[%s9066_s0 + $0x578] sm:$0x7f]  ;;  %v4083_v14 = vld [vmem:[%s9066_s0 + $0x5e0] sm:$0x7f]  ;;  %v4084_v2 = vld [vmem:[%s9066_s0 + $0x5e8] sm:$0x7f]  ;;  %v5596_v30 = vmul.f32 %v5436_v45, %v4078_v0  ;;  %v5599_v4 = vmul.f32 %v5431_v33, %v4079_v34  ;;  %v5605_v50 = vmul.f32 %v5436_v45, %v4080_v62 }
 0x102   :  { %v1098_v12 = vrot.slane %v1097_v19, 4  ;;  %v4085_v15 = vld [vmem:[%s9066_s0 + $0x650] sm:$0x7f]  ;;  %v1111_v7 = vsel %vm96_vm0, %v1043_v25, 0.0  ;;  %v1118_v56 = vsel %vm96_vm0, %v1044_v52, 0.0  ;;  %v1071_v62 = vadd.f32 %v1070_v23, %v1069_v39 }
 0x103   :  { %v4086_v0 = vld [vmem:[%s9066_s0 + $0x658] sm:$0x7f]  ;;  %v4087_v34 = vld [vmem:[%s9066_s0 + $0x6c0] sm:$0x7f]  ;;  %v4088_v41 = vld [vmem:[%s9066_s0 + $0x6c8] sm:$0x7f]  ;;  %v1078_v29 = vadd.f32 %v1077_v18, %v1076_v61  ;;  %v1085_v55 = vadd.f32 %v1084_v49, %v1083_v35  ;;  %v1092_v17 = vadd.f32 %v1091_v9, %v1090_v38  ;;  %v5620_v25 = vmul.f32 %v5431_v33, %v4081_v31 }
 0x104   :  { %v5623_v52 = vmul.f32 %v5436_v45, %v4082_v57  ;;  %v5626_v16 = vmul.f32 %v5431_v33, %v4083_v14  ;;  %v5629_v42 = vmul.f32 %v5436_v45, %v4084_v2  ;;  %v1099_v47 = vadd.f32 %v1098_v12, %v1097_v19 }
 0x105   :  { %v1105_v13 = vrot.slane %v1104_v8, 4  ;;  %v1112_v63 = vrot.slane %v1111_v7, 4  ;;  %v1119_v6 = vrot.slane %v1118_v56, 4  ;;  %v5632_v39 = vmul.f32 %v5431_v33, %v4085_v15 }
 0x106   :  { %v5635_v9 = vmul.f32 %v5436_v45, %v4086_v0  ;;  %v5638_v31 = vmul.f32 %v5431_v33, %v4087_v34  ;;  %v5641_v49 = vmul.f32 %v5436_v45, %v4088_v41  ;;  %v1072_v14 = vrot.slane %v1071_v62, 2 }
 0x107   :  { %v1079_v61 = vrot.slane %v1078_v29, 2  ;;  %v1086_v2 = vrot.slane %v1085_v55, 2  ;;  %v1093_v35 = vrot.slane %v1092_v17, 2  ;;  %v1125_v12 = vsel %vm96_vm0, %v5531_v53, 0.0 }
 0x108   :  { %v1132_v38 = vsel %vm96_vm0, %v1046_v40, 0.0  ;;  %v1139_v19 = vsel %vm96_vm0, %v1047_v11, 0.0  ;;  %v1146_v23 = vsel %vm96_vm0, %v1048_v22, 0.0  ;;  %v1100_v18 = vrot.slane %v1099_v47, 2 }
 0x109   :  { %v1106_v57 = vadd.f32 %v1105_v13, %v1104_v8  ;;  %v1113_v33 = vadd.f32 %v1112_v63, %v1111_v7  ;;  %v1120_v15 = vadd.f32 %v1119_v6, %v1118_v56  ;;  %v1126_v0 = vrot.slane %v1125_v12, 4 }
 0x10a   :  { %v1133_v45 = vrot.slane %v1132_v38, 4  ;;  %v1140_v41 = vrot.slane %v1139_v19, 4  ;;  %v1147_v34 = vrot.slane %v1146_v23, 4  ;;  %v1153_v60 = vsel %vm96_vm0, %v5553_v37, 0.0 }
 0x10b   :  { %v1160_v36 = vsel %vm96_vm0, %v1050_v20, 0.0  ;;  %v1167_v53 = vsel %vm96_vm0, %v1051_v44, 0.0  ;;  %v1174_v40 = vsel %vm96_vm0, %v1052_v54, 0.0  ;;  %v1073_v11 = vadd.f32 %v1072_v14, %v1071_v62 }
 0x10c   :  { %v1080_v3 = vadd.f32 %v1079_v61, %v1078_v29  ;;  %v1087_v22 = vadd.f32 %v1086_v2, %v1085_v55  ;;  %v1094_v58 = vadd.f32 %v1093_v35, %v1092_v17  ;;  %v1107_v13 = vrot.slane %v1106_v57, 2 }
 0x10d   :  { %v1154_v63 = vrot.slane %v1153_v60, 4  ;;  %v1161_v6 = vrot.slane %v1160_v36, 4  ;;  %v1168_v7 = vrot.slane %v1167_v53, 4  ;;  %v1101_v8 = vadd.f32 %v1100_v18, %v1099_v47 }
 0x10e   :  { %v1114_v56 = vrot.slane %v1113_v33, 2  ;;  %v1121_v59 = vrot.slane %v1120_v15, 2  ;;  %v1175_v26 = vrot.slane %v1174_v40, 4  ;;  %v1127_v51 = vadd.f32 %v1126_v0, %v1125_v12 }
 0x10f   :  { %v1134_v37 = vadd.f32 %v1133_v45, %v1132_v38  ;;  %v1141_v27 = vadd.f32 %v1140_v41, %v1139_v19  ;;  %v1148_v20 = vadd.f32 %v1147_v34, %v1146_v23  ;;  %v1074_v1 = vrot.slane %v1073_v11, 1 }
 0x110   :  { %v1081_v44 = vrot.slane %v1080_v3, 1  ;;  %v1088_v21 = vrot.slane %v1087_v22, 1  ;;  %v1095_v54 = vrot.slane %v1094_v58, 1  ;;  %v1108_v62 = vadd.f32 %v1107_v13, %v1106_v57 }
 0x111   :  { %v1155_v29 = vadd.f32 %v1154_v63, %v1153_v60  ;;  %v1162_v55 = vadd.f32 %v1161_v6, %v1160_v36  ;;  %v1169_v17 = vadd.f32 %v1168_v7, %v1167_v53  ;;  %v1102_v14 = vrot.slane %v1101_v8, 1 }
 0x112   :  { %v1115_v61 = vadd.f32 %v1114_v56, %v1113_v33  ;;  %v1122_v2 = vadd.f32 %v1121_v59, %v1120_v15  ;;  %v1176_v35 = vadd.f32 %v1175_v26, %v1174_v40  ;;  %v1128_v47 = vrot.slane %v1127_v51, 2 }
 0x113   :  { %v1135_v18 = vrot.slane %v1134_v37, 2  ;;  %v1142_v24 = vrot.slane %v1141_v27, 2  ;;  %v1149_v28 = vrot.slane %v1148_v20, 2  ;;  %v5653_v12 = vadd.f32 %v1074_v1, %v1073_v11 }
 0x114   :  { %v5655_v38 = vadd.f32 %v1081_v44, %v1080_v3  ;;  %v5657_v19 = vadd.f32 %v1088_v21, %v1087_v22  ;;  %v5659_v23 = vadd.f32 %v1095_v54, %v1094_v58  ;;  %v1109_v57 = vrot.slane %v1108_v62, 1 }
 0x115   :  { %v1156_v60 = vrot.slane %v1155_v29, 2  ;;  %v1163_v36 = vrot.slane %v1162_v55, 2  ;;  %v1170_v0 = vrot.slane %v1169_v17, 2  ;;  %v5661_v45 = vadd.f32 %v1102_v14, %v1101_v8 }
 0x116   :  { %v1116_v59 = vrot.slane %v1115_v61, 1  ;;  %v1123_v26 = vrot.slane %v1122_v2, 1  ;;  %v1177_v33 = vrot.slane %v1176_v35, 2  ;;  %v1129_v15 = vadd.f32 %v1128_v47, %v1127_v51 }
 0x117   :  { %v1136_v41 = vadd.f32 %v1135_v18, %v1134_v37  ;;  %v1143_v34 = vadd.f32 %v1142_v24, %v1141_v27  ;;  %v1150_v1 = vadd.f32 %v1149_v28, %v1148_v20  ;;  %v1181_v3 = vsel %vm96_vm0, %v5575_v10, 0.0 }
 0x118   :  { %v1188_v21 = vsel %vm96_vm0, %v5578_v43, 0.0  ;;  %v1195_v58 = vsel %vm96_vm0, %v5581_v32, 0.0  ;;  %v1202_v53 = vsel %vm96_vm0, %v5584_v5, 0.0  ;;  %v5671_v40 = vadd.f32 %v1109_v57, %v1108_v62 }
 0x119   :  { %v1157_v11 = vadd.f32 %v1156_v60, %v1155_v29  ;;  %v1164_v22 = vadd.f32 %v1163_v36, %v1162_v55  ;;  %v1171_v51 = vadd.f32 %v1170_v0, %v1169_v17  ;;  %v5673_v13 = vadd.f32 %v1116_v59, %v1115_v61 }
 0x11a   :  { %v5675_v28 = vadd.f32 %v1123_v26, %v1122_v2  ;;  %v1178_v24 = vadd.f32 %v1177_v33, %v1176_v35  ;;  %v1209_v27 = vsel %vm96_vm0, %v5593_v46, 0.0  ;;  %v1182_v10 = vrot.slane %v1181_v3, 4 }
 0x11b   :  { %v1189_v43 = vrot.slane %v1188_v21, 4  ;;  %v1196_v63 = vrot.slane %v1195_v58, 4  ;;  %v1203_v32 = vrot.slane %v1202_v53, 4  ;;  %v1130_v6 = vrot.slane %v1129_v15, 1 }
 0x11c   :  { %v1137_v7 = vrot.slane %v1136_v41, 1  ;;  %v1144_v5 = vrot.slane %v1143_v34, 1  ;;  %v1151_v8 = vrot.slane %v1150_v1, 1  ;;  %v1158_v56 = vrot.slane %v1157_v11, 1 }
 0x11d   :  { %v1165_v37 = vrot.slane %v1164_v22, 1  ;;  %v1172_v20 = vrot.slane %v1171_v51, 1  ;;  %v1210_v44 = vrot.slane %v1209_v27, 4  ;;  %v1179_v54 = vrot.slane %v1178_v24, 1 }
 0x11e   :  { %v1216_v62 = vsel %vm96_vm0, %v5596_v30, 0.0  ;;  %v1223_v29 = vsel %vm96_vm0, %v5599_v4, 0.0  ;;  %v1230_v46 = vsel %vm96_vm0, %v5605_v50, 0.0  ;;  %v1183_v55 = vadd.f32 %v1182_v10, %v1181_v3 }
 0x11f   :  { %v1190_v17 = vadd.f32 %v1189_v43, %v1188_v21  ;;  %v1197_v14 = vadd.f32 %v1196_v63, %v1195_v58  ;;  %v1204_v61 = vadd.f32 %v1203_v32, %v1202_v53  ;;  %v5685_v2 = vadd.f32 %v1130_v6, %v1129_v15 }
 0x120   :  { %v5687_v35 = vadd.f32 %v1137_v7, %v1136_v41  ;;  %v5689_v47 = vadd.f32 %v1144_v5, %v1143_v34  ;;  %v5691_v18 = vadd.f32 %v1151_v8, %v1150_v1  ;;  %v1211_v57 = vadd.f32 %v1210_v44, %v1209_v27 }
 0x121   :  { %v1217_v30 = vrot.slane %v1216_v62, 4  ;;  %v1224_v60 = vrot.slane %v1223_v29, 4  ;;  %v1231_v36 = vrot.slane %v1230_v46, 4  ;;  %v5693_v4 = vadd.f32 %v1158_v56, %v1157_v11 }
 0x122   :  { %v5695_v0 = vadd.f32 %v1165_v37, %v1164_v22  ;;  %v5697_v50 = vadd.f32 %v1172_v20, %v1171_v51  ;;  %v5699_v59 = vadd.f32 %v1179_v54, %v1178_v24  ;;  %v1184_v26 = vrot.slane %v1183_v55, 2 }
 0x123   :  { %v1191_v33 = vrot.slane %v1190_v17, 2  ;;  %v1198_v15 = vrot.slane %v1197_v14, 2  ;;  %v1205_v41 = vrot.slane %v1204_v61, 2  ;;  %v1237_v34 = vsel %vm96_vm0, %v5620_v25, 0.0 }
 0x124   :  { %9236 = vst [vmem:[#allocation32_spill] sm:$0xff] %v5697_v50  ;;  %9237 = vst [vmem:[#allocation33_spill] sm:$0xff] %v5699_v59  ;;  %v1244_v1 = vsel %vm96_vm0, %v5623_v52, 0.0  ;;  %v1251_v3 = vsel %vm96_vm0, %v5626_v16, 0.0  ;;  %v1258_v21 = vsel %vm96_vm0, %v5629_v42, 0.0  ;;  %v1212_v58 = vrot.slane %v1211_v57, 2 }
 0x125   :  { %v1218_v53 = vadd.f32 %v1217_v30, %v1216_v62  ;;  %v1225_v11 = vadd.f32 %v1224_v60, %v1223_v29  ;;  %v1232_v22 = vadd.f32 %v1231_v36, %v1230_v46  ;;  %v1238_v51 = vrot.slane %v1237_v34, 4 }
 0x126   :  { %v1245_v24 = vrot.slane %v1244_v1, 4  ;;  %v1252_v27 = vrot.slane %v1251_v3, 4  ;;  %v1259_v10 = vrot.slane %v1258_v21, 4  ;;  %v1265_v25 = vsel %vm96_vm0, %v5632_v39, 0.0 }
 0x127   :  { %v1272_v52 = vsel %vm96_vm0, %v5635_v9, 0.0  ;;  %v1279_v16 = vsel %vm96_vm0, %v5638_v31, 0.0  ;;  %v1286_v42 = vsel %vm96_vm0, %v5641_v49, 0.0  ;;  %v1239_v43 = vadd.f32 %v1238_v51, %v1237_v34 }
 0x128   :  { %v1246_v63 = vadd.f32 %v1245_v24, %v1244_v1  ;;  %v1253_v32 = vadd.f32 %v1252_v27, %v1251_v3  ;;  %v1260_v6 = vadd.f32 %v1259_v10, %v1258_v21  ;;  %v1266_v7 = vrot.slane %v1265_v25, 4 }
 0x129   :  { %v1273_v5 = vrot.slane %v1272_v52, 4  ;;  %v1280_v8 = vrot.slane %v1279_v16, 4  ;;  %v1287_v56 = vrot.slane %v1286_v42, 4  ;;  %v1219_v37 = vrot.slane %v1218_v53, 2 }
 0x12a   :  { %v1226_v20 = vrot.slane %v1225_v11, 2  ;;  %v1233_v39 = vrot.slane %v1232_v22, 2  ;;  %v1240_v44 = vrot.slane %v1239_v43, 2  ;;  %v1267_v54 = vadd.f32 %v1266_v7, %v1265_v25 }
 0x12b   :  { %v1274_v9 = vadd.f32 %v1273_v5, %v1272_v52  ;;  %v1281_v62 = vadd.f32 %v1280_v8, %v1279_v16  ;;  %v1288_v29 = vadd.f32 %v1287_v56, %v1286_v42  ;;  %v1185_v31 = vadd.f32 %v1184_v26, %v1183_v55 }
 0x12c   :  { %v1247_v46 = vrot.slane %v1246_v63, 2  ;;  %v1254_v30 = vrot.slane %v1253_v32, 2  ;;  %v1261_v49 = vrot.slane %v1260_v6, 2  ;;  %v1192_v60 = vadd.f32 %v1191_v33, %v1190_v17 }
 0x12d   :  { %v1199_v36 = vadd.f32 %v1198_v15, %v1197_v14  ;;  %v1206_v34 = vadd.f32 %v1205_v41, %v1204_v61  ;;  %v1268_v1 = vrot.slane %v1267_v54, 2  ;;  %v1213_v3 = vadd.f32 %v1212_v58, %v1211_v57 }
 0x12e   :  { %v1275_v21 = vrot.slane %v1274_v9, 2  ;;  %v1282_v51 = vrot.slane %v1281_v62, 2  ;;  %v1289_v24 = vrot.slane %v1288_v29, 2  ;;  %v1220_v27 = vadd.f32 %v1219_v37, %v1218_v53 }
 0x12f   :  { %v1227_v10 = vadd.f32 %v1226_v20, %v1225_v11  ;;  %v1234_v59 = vadd.f32 %v1233_v39, %v1232_v22  ;;  %v1241_v50 = vadd.f32 %v1240_v44, %v1239_v43  ;;  %v1186_v25 = vrot.slane %v1185_v31, 1 }
 0x130   :  { %v1248_v52 = vadd.f32 %v1247_v46, %v1246_v63  ;;  %v1255_v16 = vadd.f32 %v1254_v30, %v1253_v32  ;;  %v1262_v42 = vadd.f32 %v1261_v49, %v1260_v6  ;;  %v1193_v55 = vrot.slane %v1192_v60, 1 }
 0x131   :  { %v1200_v26 = vrot.slane %v1199_v36, 1  ;;  %v1207_v7 = vrot.slane %v1206_v34, 1  ;;  %v1269_v5 = vadd.f32 %v1268_v1, %v1267_v54  ;;  %v1214_v17 = vrot.slane %v1213_v3, 1 }
 0x132   :  { %v1276_v14 = vadd.f32 %v1275_v21, %v1274_v9  ;;  %v1283_v61 = vadd.f32 %v1282_v51, %v1281_v62  ;;  %v1290_v33 = vadd.f32 %v1289_v24, %v1288_v29  ;;  %v1221_v57 = vrot.slane %v1220_v27, 1  ;;  %v9244_v24 = vld [vmem:[#allocation8_spill] sm:$0xff] }
 0x133   :  { %v1228_v15 = vrot.slane %v1227_v10, 1  ;;  %v1235_v41 = vrot.slane %v1234_v59, 1  ;;  %v1242_v58 = vrot.slane %v1241_v50, 1  ;;  %v1187_v53 = vadd.f32 %v1186_v25, %v1185_v31 }
 0x134   :  { %v1249_v11 = vrot.slane %v1248_v52, 1  ;;  %v1256_v22 = vrot.slane %v1255_v16, 1  ;;  %v1263_v43 = vrot.slane %v1262_v42, 1  ;;  %v1194_v8 = vadd.f32 %v1193_v55, %v1192_v60  ;;  %v9238_v60 = vld [vmem:[#allocation5_spill] sm:$0xff]  ;;  %v9258_v55 = vld [vmem:[#allocation15_spill] sm:$0xff] }
 0x135   :  { %v1201_v63 = vadd.f32 %v1200_v26, %v1199_v36  ;;  %v1208_v32 = vadd.f32 %v1207_v7, %v1206_v34  ;;  %v1270_v6 = vrot.slane %v1269_v5, 1  ;;  %v1215_v56 = vadd.f32 %v1214_v17, %v1213_v3  ;;  %v9240_v34 = vld [vmem:[#allocation6_spill] sm:$0xff]  ;;  %v9242_v3 = vld [vmem:[#allocation7_spill] sm:$0xff]  ;;  %v9260_v26 = vld [vmem:[#allocation16_spill] sm:$0xff] }
 0x136   :  { %v1277_v37 = vrot.slane %v1276_v14, 1  ;;  %v1284_v20 = vrot.slane %v1283_v61, 1  ;;  %v1291_v39 = vrot.slane %v1290_v33, 1  ;;  %v1222_v44 = vadd.f32 %v1221_v57, %v1220_v27  ;;  %v9262_v7 = vld [vmem:[#allocation17_spill] sm:$0xff]  ;;  %v9265_v17 = vld [vmem:[#allocation32_spill] sm:$0xff] }
 0x137   :  { %v1229_v54 = vadd.f32 %v1228_v15, %v1227_v10  ;;  %v1236_v9 = vadd.f32 %v1235_v41, %v1234_v59  ;;  %v1243_v62 = vadd.f32 %v1242_v58, %v1241_v50  ;;  %v1250_v29 = vadd.f32 %v1249_v11, %v1248_v52  ;;  %v9270_v57 = vld [vmem:[#allocation36_spill] sm:$0xff]  ;;  %v4092_v41 = vld [vmem:[%s9066_s0 + $0x48] sm:$0x7f]  ;;  %v9272_v11 = vld [vmem:[#allocation35_spill] sm:$0xff] }
 0x138   :  { %v1257_v46 = vadd.f32 %v1256_v22, %v1255_v16  ;;  %v1264_v30 = vadd.f32 %v1263_v43, %v1262_v42  ;;  %v5719_v31 = vadd.f32 %v5653_v12, %v5351_v48  ;;  %v1271_v49 = vadd.f32 %v1270_v6, %v1269_v5  ;;  %v9246_v12 = vld [vmem:[#allocation9_spill] sm:$0xff]  ;;  %v9256_v42 = vld [vmem:[#allocation14_spill] sm:$0xff]  ;;  %v9274_v43 = vld [vmem:[#allocation19_spill] sm:$0xff] }
 0x139   :  { %v5723_v36 = vadd.f32 %v5655_v38, %v9238_v60  ;;  %v5727_v1 = vadd.f32 %v5657_v19, %v9240_v34  ;;  %v5731_v59 = vadd.f32 %v5659_v23, %v9242_v3  ;;  %v1278_v50 = vadd.f32 %v1277_v37, %v1276_v14  ;;  %v9248_v38 = vld [vmem:[#allocation10_spill] sm:$0xff]  ;;  %v9250_v19 = vld [vmem:[#allocation11_spill] sm:$0xff]  ;;  %v9252_v23 = vld [vmem:[#allocation12_spill] sm:$0xff] }
 0x13a   :  { %v1285_v21 = vadd.f32 %v1284_v20, %v1283_v61  ;;  %v1292_v51 = vadd.f32 %v1291_v39, %v1290_v33  ;;  %v5735_v48 = vadd.f32 %v5661_v45, %v9244_v24  ;;  %v5739_v27 = vadd.f32 %v5671_v40, %v9246_v12  ;;  %v9254_v16 = vld [vmem:[#allocation13_spill] sm:$0xff]  ;;  %v9264_v5 = vld [vmem:[#allocation18_spill] sm:$0xff]  ;;  %v9278_v20 = vld [vmem:[#allocation20_spill] sm:$0xff] }
 0x13b   :  { %9239 = vst [vmem:[#allocation5_spill] sm:$0xff] %v5723_v36  ;;  %9241 = vst [vmem:[#allocation6_spill] sm:$0xff] %v5727_v1  ;;  %v5743_v10 = vadd.f32 %v5673_v13, %v9248_v38  ;;  %v5747_v25 = vadd.f32 %v5675_v28, %v9250_v19  ;;  %v5751_v52 = vadd.f32 %v5685_v2, %v9252_v23  ;;  %v4091_v2 = vld [vmem:[%s9066_s0 + $0x40] sm:$0x7f]  ;;  %v9267_v14 = vld [vmem:[#allocation34_spill] sm:$0xff] }
 0x13c   :  { %9243 = vst [vmem:[#allocation7_spill] sm:$0xff] %v5731_v59  ;;  %9245 = vst [vmem:[#allocation8_spill] sm:$0xff] %v5735_v48  ;;  %v5755_v45 = vadd.f32 %v5687_v35, %v9254_v16  ;;  %v5759_v40 = vadd.f32 %v5689_v47, %v9256_v42  ;;  %v5763_v13 = vadd.f32 %v5691_v18, %v9258_v55  ;;  %v4093_v35 = vld [vmem:[%s9066_s0 + $0xb0] sm:$0x7f]  ;;  %v4094_v47 = vld [vmem:[%s9066_s0 + $0xb8] sm:$0x7f] }
 0x13d   :  { %9247 = vst [vmem:[#allocation9_spill] sm:$0xff] %v5739_v27  ;;  %9249 = vst [vmem:[#allocation10_spill] sm:$0xff] %v5743_v10  ;;  %v5767_v28 = vadd.f32 %v5693_v4, %v9260_v26  ;;  %v5780_v18 = vadd.f32 %v5695_v0, %v9262_v7  ;;  %v5784_v4 = vadd.f32 %v9265_v17, %v9264_v5  ;;  %v9268_v61 = vld [vmem:[#allocation33_spill] sm:$0xff]  ;;  %v9282_v3 = vld [vmem:[#allocation22_spill] sm:$0xff] }
 0x13e   :  { %9251 = vst [vmem:[#allocation11_spill] sm:$0xff] %v5747_v25  ;;  %9253 = vst [vmem:[#allocation12_spill] sm:$0xff] %v5751_v52  ;;  %v5788_v33 = vadd.f32 %v9268_v61, %v9267_v14  ;;  %v5791_v15 = vadd.f32 %v1187_v53, %v9270_v57  ;;  %v5799_v0 = vld [vmem:[%s9067_s1 + $0x40] sm:$0x7f]  ;;  %v5804_v58 = vld [vmem:[%s9067_s1 + $0x48] sm:$0x7f]  ;;  %v5807_v22 = vadd.f32 %v1194_v8, %v9272_v11 }
 0x13f   :  { %9255 = vst [vmem:[#allocation13_spill] sm:$0xff] %v5755_v45  ;;  %9257 = vst [vmem:[#allocation14_spill] sm:$0xff] %v5759_v40  ;;  %v5810_v53 = vadd.f32 %v1201_v63, %v9274_v43  ;;  %v9276_v6 = vld [vmem:[#allocation37_spill] sm:$0xff]  ;;  %v5816_v39 = vadd.f32 %v1215_v56, %v9278_v20  ;;  %v5822_v24 = vadd.f32 %v1229_v54, %v9282_v3  ;;  %v9284_v12 = vld [vmem:[#allocation23_spill] sm:$0xff] }
 0x140   :  { %9259 = vst [vmem:[#allocation15_spill] sm:$0xff] %v5763_v13  ;;  %9261 = vst [vmem:[#allocation16_spill] sm:$0xff] %v5767_v28  ;;  %v5813_v37 = vadd.f32 %v1208_v32, %v9276_v6  ;;  %v9280_v60 = vld [vmem:[#allocation21_spill] sm:$0xff]  ;;  %v5825_v38 = vadd.f32 %v1236_v9, %v9284_v12  ;;  %v9286_v8 = vld [vmem:[#allocation24_spill] sm:$0xff]  ;;  %v1361_v9 = vmul.f32 %v5799_v0, %v4091_v2 }
 0x141   :  { %9263 = vst [vmem:[#allocation17_spill] sm:$0xff] %v5780_v18  ;;  %9266 = vst [vmem:[#allocation18_spill] sm:$0xff] %v5784_v4  ;;  %v5819_v34 = vadd.f32 %v1222_v44, %v9280_v60  ;;  %v5828_v19 = vadd.f32 %v1243_v62, %v9286_v8  ;;  %v4095_v63 = vld [vmem:[%s9066_s0 + $0x120] sm:$0x7f]  ;;  %v4096_v32 = vld [vmem:[%s9066_s0 + $0x128] sm:$0x7f]  ;;  %v1362_v62 = vmul.f32 %v5804_v58, %v4092_v41 }
 0x142   :  { %9269 = vst [vmem:[#allocation32_spill] sm:$0xff] %v5788_v33  ;;  %9271 = vst [vmem:[#allocation34_spill] sm:$0xff] %v5791_v15  ;;  %v4097_v56 = vld [vmem:[%s9066_s0 + $0x190] sm:$0x7f]  ;;  %v4098_v44 = vld [vmem:[%s9066_s0 + $0x198] sm:$0x7f]  ;;  %v1363_v23 = vmul.f32 %v5799_v0, %v4093_v35  ;;  %v1364_v16 = vmul.f32 %v5804_v58, %v4094_v47  ;;  %v1366_v20 = vmul.f32 %v5804_v58, %v4096_v32 }
 0x143   :  { %9273 = vst [vmem:[#allocation33_spill] sm:$0xff] %v5807_v22  ;;  %9275 = vst [vmem:[#allocation36_spill] sm:$0xff] %v5810_v53  ;;  %v4099_v54 = vld [vmem:[%s9066_s0 + $0x200] sm:$0x7f]  ;;  %v9290_v26 = vld [vmem:[#allocation26_spill] sm:$0xff]  ;;  %v1367_v60 = vmul.f32 %v5799_v0, %v4097_v56  ;;  %v1368_v3 = vmul.f32 %v5804_v58, %v4098_v44 }
 0x144   :  { %9277 = vst [vmem:[#allocation35_spill] sm:$0xff] %v5813_v37  ;;  %9279 = vst [vmem:[#allocation19_spill] sm:$0xff] %v5816_v39  ;;  %v9288_v42 = vld [vmem:[#allocation25_spill] sm:$0xff]  ;;  %v5853_v7 = vadd.f32 %v1257_v46, %v9290_v26  ;;  %v9292_v5 = vld [vmem:[#allocation27_spill] sm:$0xff]  ;;  %v5899_v12 = vmul.f32 %v5799_v0, %v4099_v54  ;;  %v1407_v26 = vsel %vm96_vm0, %v1363_v23, 0.0 }
 0x145   :  { %9281 = vst [vmem:[#allocation37_spill] sm:$0xff] %v5819_v34  ;;  %9283 = vst [vmem:[#allocation20_spill] sm:$0xff] %v5822_v24  ;;  %v5850_v55 = vadd.f32 %v1250_v29, %v9288_v42  ;;  %v5856_v17 = vadd.f32 %v1264_v30, %v9292_v5  ;;  %v9294_v14 = vld [vmem:[#allocation28_spill] sm:$0xff]  ;;  %v4100_v2 = vld [vmem:[%s9066_s0 + $0x208] sm:$0x7f]  ;;  %v1400_v42 = vsel %vm96_vm0, %v1362_v62, 0.0 }
 0x146   :  { %9285 = vst [vmem:[#allocation21_spill] sm:$0xff] %v5825_v38  ;;  %9287 = vst [vmem:[#allocation22_spill] sm:$0xff] %v5828_v19  ;;  %v5859_v61 = vadd.f32 %v1271_v49, %v9294_v14  ;;  %v9296_v57 = vld [vmem:[#allocation29_spill] sm:$0xff]  ;;  %v9298_v47 = vld [vmem:[#allocation30_spill] sm:$0xff]  ;;  %v1414_v5 = vsel %vm96_vm0, %v1364_v16, 0.0  ;;  %v1370_v54 = vmul.f32 %v5804_v58, %v4100_v2  ;;  %v1428_v38 = vsel %vm96_vm0, %v1366_v20, 0.0 }
 0x147   :  { %9289 = vst [vmem:[#allocation23_spill] sm:$0xff] %v5850_v55  ;;  %9291 = vst [vmem:[#allocation24_spill] sm:$0xff] %v5853_v7  ;;  %v5865_v35 = vadd.f32 %v1278_v50, %v9296_v57  ;;  %v5868_v41 = vadd.f32 %v1285_v21, %v9298_v47  ;;  %v9300_v29 = vld [vmem:[#allocation31_spill] sm:$0xff]  ;;  %v4103_v49 = vld [vmem:[%s9066_s0 + $0x2e0] sm:$0x7f]  ;;  %v1365_v50 = vmul.f32 %v5799_v0, %v4095_v63  ;;  %v1393_v63 = vsel %vm96_vm0, %v1361_v9, 0.0 }
 0x148   :  { %9293 = vst [vmem:[#allocation25_spill] sm:$0xff] %v5856_v17  ;;  %9295 = vst [vmem:[#allocation26_spill] sm:$0xff] %v5859_v61  ;;  %v5871_v11 = vadd.f32 %v1292_v51, %v9300_v29  ;;  %v4101_v46 = vld [vmem:[%s9066_s0 + $0x270] sm:$0x7f]  ;;  %v4102_v30 = vld [vmem:[%s9066_s0 + $0x278] sm:$0x7f]  ;;  %v5921_v23 = vmul.f32 %v5799_v0, %v4103_v49 }
 0x149   :  { %9297 = vst [vmem:[#allocation27_spill] sm:$0xff] %v5865_v35  ;;  %9299 = vst [vmem:[#allocation28_spill] sm:$0xff] %v5868_v41  ;;  %v4104_v21 = vld [vmem:[%s9066_s0 + $0x2e8] sm:$0x7f]  ;;  %v4105_v51 = vld [vmem:[%s9066_s0 + $0x350] sm:$0x7f]  ;;  %v1371_v9 = vmul.f32 %v5799_v0, %v4101_v46  ;;  %v1372_v62 = vmul.f32 %v5804_v58, %v4102_v30 }
 0x14a   :  { %9301 = vst [vmem:[#allocation29_spill] sm:$0xff] %v5871_v11  ;;  %v4106_v43 = vld [vmem:[%s9066_s0 + $0x358] sm:$0x7f]  ;;  %v4109_v6 = vld [vmem:[%s9066_s0 + $0x430] sm:$0x7f]  ;;  %v1374_v57 = vmul.f32 %v5804_v58, %v4104_v21  ;;  %v1375_v47 = vmul.f32 %v5799_v0, %v4105_v51  ;;  %v1421_v29 = vsel %vm96_vm0, %v1365_v50, 0.0 }
 0x14b   :  { %v4110_v8 = vld [vmem:[%s9066_s0 + $0x438] sm:$0x7f]  ;;  %v4107_v32 = vld [vmem:[%s9066_s0 + $0x3c0] sm:$0x7f]  ;;  %v4108_v56 = vld [vmem:[%s9066_s0 + $0x3c8] sm:$0x7f]  ;;  %v1376_v2 = vmul.f32 %v5804_v58, %v4106_v43  ;;  %v5949_v43 = vmul.f32 %v5799_v0, %v4109_v6 }
 0x14c   :  { %v4111_v44 = vld [vmem:[%s9066_s0 + $0x4a0] sm:$0x7f]  ;;  %v4112_v16 = vld [vmem:[%s9066_s0 + $0x4a8] sm:$0x7f]  ;;  %v4113_v14 = vld [vmem:[%s9066_s0 + $0x510] sm:$0x7f]  ;;  %v5943_v51 = vmul.f32 %v5799_v0, %v4107_v32  ;;  %v5946_v50 = vmul.f32 %v5804_v58, %v4108_v56  ;;  %v5952_v61 = vmul.f32 %v5804_v58, %v4110_v8 }
 0x14d   :  { %v4114_v46 = vld [vmem:[%s9066_s0 + $0x518] sm:$0x7f]  ;;  %v1394_v30 = vrot.slane %v1393_v63, 4  ;;  %v1401_v49 = vrot.slane %v1400_v42, 4  ;;  %v1408_v11 = vrot.slane %v1407_v26, 4  ;;  %v1415_v41 = vrot.slane %v1414_v5, 4 }
 0x14e   :  { %v4115_v35 = vld [vmem:[%s9066_s0 + $0x580] sm:$0x7f]  ;;  %v4116_v21 = vld [vmem:[%s9066_s0 + $0x588] sm:$0x7f]  ;;  %v4117_v17 = vld [vmem:[%s9066_s0 + $0x5f0] sm:$0x7f]  ;;  %v5961_v32 = vmul.f32 %v5799_v0, %v4111_v44  ;;  %v5964_v56 = vmul.f32 %v5804_v58, %v4112_v16  ;;  %v5967_v6 = vmul.f32 %v5799_v0, %v4113_v14  ;;  %v5973_v19 = vmul.f32 %v5804_v58, %v4114_v46 }
 0x14f   :  { %v4118_v7 = vld [vmem:[%s9066_s0 + $0x5f8] sm:$0x7f]  ;;  %v1422_v55 = vrot.slane %v1421_v29, 4  ;;  %v4119_v8 = vld [vmem:[%s9066_s0 + $0x660] sm:$0x7f]  ;;  %v1435_v24 = vsel %vm96_vm0, %v1367_v60, 0.0  ;;  %v1395_v46 = vadd.f32 %v1394_v30, %v1393_v63  ;;  %v1402_v39 = vadd.f32 %v1401_v49, %v1400_v42 }
 0x150   :  { %v1442_v44 = vsel %vm96_vm0, %v1368_v3, 0.0  ;;  %v4120_v16 = vld [vmem:[%s9066_s0 + $0x668] sm:$0x7f]  ;;  %v4121_v14 = vld [vmem:[%s9066_s0 + $0x6d0] sm:$0x7f]  ;;  %v1409_v37 = vadd.f32 %v1408_v11, %v1407_v26  ;;  %v1416_v20 = vadd.f32 %v1415_v41, %v1414_v5  ;;  %v5988_v60 = vmul.f32 %v5799_v0, %v4115_v35 }
 0x151   :  { %v4122_v34 = vld [vmem:[%s9066_s0 + $0x6d8] sm:$0x7f]  ;;  %v5991_v3 = vmul.f32 %v5804_v58, %v4116_v21  ;;  %v5994_v53 = vmul.f32 %v5799_v0, %v4117_v17  ;;  %v5997_v22 = vmul.f32 %v5804_v58, %v4118_v7  ;;  %v1423_v15 = vadd.f32 %v1422_v55, %v1421_v29 }
 0x152   :  { %v1429_v33 = vrot.slane %v1428_v38, 4  ;;  %v1436_v4 = vrot.slane %v1435_v24, 4  ;;  %v1443_v18 = vrot.slane %v1442_v44, 4  ;;  %v6000_v63 = vmul.f32 %v5799_v0, %v4119_v8 }
 0x153   :  { %v6003_v41 = vmul.f32 %v5804_v58, %v4120_v16  ;;  %v6006_v35 = vmul.f32 %v5799_v0, %v4121_v14  ;;  %v6009_v11 = vmul.f32 %v5804_v58, %v4122_v34  ;;  %v1396_v17 = vrot.slane %v1395_v46, 2 }
 0x154   :  { %v1403_v42 = vrot.slane %v1402_v39, 2  ;;  %v1410_v7 = vrot.slane %v1409_v37, 2  ;;  %v1417_v26 = vrot.slane %v1416_v20, 2  ;;  %v1449_v55 = vsel %vm96_vm0, %v5899_v12, 0.0 }
 0x155   :  { %v1456_v5 = vsel %vm96_vm0, %v1370_v54, 0.0  ;;  %v1463_v29 = vsel %vm96_vm0, %v1371_v9, 0.0  ;;  %v1470_v30 = vsel %vm96_vm0, %v1372_v62, 0.0  ;;  %v1424_v49 = vrot.slane %v1423_v15, 2 }
 0x156   :  { %v1430_v21 = vadd.f32 %v1429_v33, %v1428_v38  ;;  %v1437_v0 = vadd.f32 %v1436_v4, %v1435_v24  ;;  %v1444_v8 = vadd.f32 %v1443_v18, %v1442_v44  ;;  %v1450_v16 = vrot.slane %v1449_v55, 4 }
 0x157   :  { %v1457_v58 = vrot.slane %v1456_v5, 4  ;;  %v1464_v34 = vrot.slane %v1463_v29, 4  ;;  %v1471_v14 = vrot.slane %v1470_v30, 4  ;;  %v1477_v28 = vsel %vm96_vm0, %v5921_v23, 0.0 }
 0x158   :  { %v1484_v13 = vsel %vm96_vm0, %v1374_v57, 0.0  ;;  %v1491_v12 = vsel %vm96_vm0, %v1375_v47, 0.0  ;;  %v1498_v54 = vsel %vm96_vm0, %v1376_v2, 0.0  ;;  %v1397_v9 = vadd.f32 %v1396_v17, %v1395_v46 }
 0x159   :  { %v1404_v40 = vadd.f32 %v1403_v42, %v1402_v39  ;;  %v1411_v62 = vadd.f32 %v1410_v7, %v1409_v37  ;;  %v1418_v45 = vadd.f32 %v1417_v26, %v1416_v20  ;;  %v1431_v33 = vrot.slane %v1430_v21, 2 }
 0x15a   :  { %v1478_v4 = vrot.slane %v1477_v28, 4  ;;  %v1485_v18 = vrot.slane %v1484_v13, 4  ;;  %v1492_v24 = vrot.slane %v1491_v12, 4  ;;  %v1425_v38 = vadd.f32 %v1424_v49, %v1423_v15 }
 0x15b   :  { %v1438_v44 = vrot.slane %v1437_v0, 2  ;;  %v1445_v52 = vrot.slane %v1444_v8, 2  ;;  %v1499_v25 = vrot.slane %v1498_v54, 4  ;;  %v1451_v10 = vadd.f32 %v1450_v16, %v1449_v55 }
 0x15c   :  { %v1458_v23 = vadd.f32 %v1457_v58, %v1456_v5  ;;  %v1465_v27 = vadd.f32 %v1464_v34, %v1463_v29  ;;  %v1472_v57 = vadd.f32 %v1471_v14, %v1470_v30  ;;  %v1398_v48 = vrot.slane %v1397_v9, 1 }
 0x15d   :  { %v1405_v47 = vrot.slane %v1404_v40, 1  ;;  %v1412_v59 = vrot.slane %v1411_v62, 1  ;;  %v1419_v2 = vrot.slane %v1418_v45, 1  ;;  %v1432_v46 = vadd.f32 %v1431_v33, %v1430_v21 }
 0x15e   :  { %v1479_v39 = vadd.f32 %v1478_v4, %v1477_v28  ;;  %v1486_v37 = vadd.f32 %v1485_v18, %v1484_v13  ;;  %v1493_v20 = vadd.f32 %v1492_v24, %v1491_v12  ;;  %v1426_v17 = vrot.slane %v1425_v38, 1 }
 0x15f   :  { %v1439_v42 = vadd.f32 %v1438_v44, %v1437_v0  ;;  %v1446_v7 = vadd.f32 %v1445_v52, %v1444_v8  ;;  %v1500_v26 = vadd.f32 %v1499_v25, %v1498_v54  ;;  %v1452_v15 = vrot.slane %v1451_v10, 2 }
 0x160   :  { %v1459_v49 = vrot.slane %v1458_v23, 2  ;;  %v1466_v1 = vrot.slane %v1465_v27, 2  ;;  %v1473_v36 = vrot.slane %v1472_v57, 2  ;;  %v6021_v55 = vadd.f32 %v1398_v48, %v1397_v9 }
 0x161   :  { %v6023_v5 = vadd.f32 %v1405_v47, %v1404_v40  ;;  %v6025_v29 = vadd.f32 %v1412_v59, %v1411_v62  ;;  %v6027_v30 = vadd.f32 %v1419_v2, %v1418_v45  ;;  %v1433_v21 = vrot.slane %v1432_v46, 1 }
 0x162   :  { %v1480_v28 = vrot.slane %v1479_v39, 2  ;;  %v1487_v13 = vrot.slane %v1486_v37, 2  ;;  %v1494_v16 = vrot.slane %v1493_v20, 2  ;;  %v6029_v58 = vadd.f32 %v1426_v17, %v1425_v38 }
 0x163   :  { %v1440_v52 = vrot.slane %v1439_v42, 1  ;;  %v1447_v25 = vrot.slane %v1446_v7, 1  ;;  %v1501_v0 = vrot.slane %v1500_v26, 2  ;;  %v1453_v8 = vadd.f32 %v1452_v15, %v1451_v10 }
 0x164   :  { %v1460_v34 = vadd.f32 %v1459_v49, %v1458_v23  ;;  %v1467_v14 = vadd.f32 %v1466_v1, %v1465_v27  ;;  %v1474_v48 = vadd.f32 %v1473_v36, %v1472_v57  ;;  %v1505_v40 = vsel %vm96_vm0, %v5943_v51, 0.0 }
 0x165   :  { %v1512_v59 = vsel %vm96_vm0, %v5946_v50, 0.0  ;;  %v1519_v45 = vsel %vm96_vm0, %v5949_v43, 0.0  ;;  %v1526_v12 = vsel %vm96_vm0, %v5952_v61, 0.0  ;;  %v6039_v54 = vadd.f32 %v1433_v21, %v1432_v46 }
 0x166   :  { %v1481_v9 = vadd.f32 %v1480_v28, %v1479_v39  ;;  %v1488_v62 = vadd.f32 %v1487_v13, %v1486_v37  ;;  %v1495_v10 = vadd.f32 %v1494_v16, %v1493_v20  ;;  %v6041_v33 = vadd.f32 %v1440_v52, %v1439_v42 }
 0x167   :  { %v6043_v36 = vadd.f32 %v1447_v25, %v1446_v7  ;;  %v1502_v1 = vadd.f32 %v1501_v0, %v1500_v26  ;;  %v1533_v27 = vsel %vm96_vm0, %v5961_v32, 0.0  ;;  %v1506_v51 = vrot.slane %v1505_v40, 4 }
 0x168   :  { %v1513_v50 = vrot.slane %v1512_v59, 4  ;;  %v1520_v4 = vrot.slane %v1519_v45, 4  ;;  %v1527_v43 = vrot.slane %v1526_v12, 4  ;;  %v1454_v18 = vrot.slane %v1453_v8, 1 }
 0x169   :  { %v1461_v24 = vrot.slane %v1460_v34, 1  ;;  %v1468_v61 = vrot.slane %v1467_v14, 1  ;;  %v1475_v38 = vrot.slane %v1474_v48, 1  ;;  %v1482_v44 = vrot.slane %v1481_v9, 1 }
 0x16a   :  { %v1489_v23 = vrot.slane %v1488_v62, 1  ;;  %v1496_v57 = vrot.slane %v1495_v10, 1  ;;  %v1534_v47 = vrot.slane %v1533_v27, 4  ;;  %v1503_v2 = vrot.slane %v1502_v1, 1 }
 0x16b   :  { %v1540_v46 = vsel %vm96_vm0, %v5964_v56, 0.0  ;;  %v1547_v39 = vsel %vm96_vm0, %v5967_v6, 0.0  ;;  %v1554_v32 = vsel %vm96_vm0, %v5973_v19, 0.0  ;;  %v1507_v37 = vadd.f32 %v1506_v51, %v1505_v40 }
 0x16c   :  { %v1514_v20 = vadd.f32 %v1513_v50, %v1512_v59  ;;  %v1521_v17 = vadd.f32 %v1520_v4, %v1519_v45  ;;  %v1528_v42 = vadd.f32 %v1527_v43, %v1526_v12  ;;  %v6053_v7 = vadd.f32 %v1454_v18, %v1453_v8 }
 0x16d   :  { %v6055_v26 = vadd.f32 %v1461_v24, %v1460_v34  ;;  %v6057_v15 = vadd.f32 %v1468_v61, %v1467_v14  ;;  %v6059_v49 = vadd.f32 %v1475_v38, %v1474_v48  ;;  %v1535_v21 = vadd.f32 %v1534_v47, %v1533_v27 }
 0x16e   :  { %v1541_v56 = vrot.slane %v1540_v46, 4  ;;  %v1548_v28 = vrot.slane %v1547_v39, 4  ;;  %v1555_v13 = vrot.slane %v1554_v32, 4  ;;  %v6061_v6 = vadd.f32 %v1482_v44, %v1481_v9 }
 0x16f   :  { %v6063_v16 = vadd.f32 %v1489_v23, %v1488_v62  ;;  %v6065_v19 = vadd.f32 %v1496_v57, %v1495_v10  ;;  %v6067_v52 = vadd.f32 %v1503_v2, %v1502_v1  ;;  %v1508_v25 = vrot.slane %v1507_v37, 2 }
 0x170   :  { %v1515_v0 = vrot.slane %v1514_v20, 2  ;;  %v1522_v8 = vrot.slane %v1521_v17, 2  ;;  %v1529_v34 = vrot.slane %v1528_v42, 2  ;;  %v1561_v14 = vsel %vm96_vm0, %v5988_v60, 0.0 }
 0x171   :  { %9302 = vst [vmem:[#allocation30_spill] sm:$0xff] %v6065_v19  ;;  %9303 = vst [vmem:[#allocation31_spill] sm:$0xff] %v6067_v52  ;;  %v1568_v48 = vsel %vm96_vm0, %v5991_v3, 0.0  ;;  %v1575_v40 = vsel %vm96_vm0, %v5994_v53, 0.0  ;;  %v1582_v59 = vsel %vm96_vm0, %v5997_v22, 0.0  ;;  %v1536_v45 = vrot.slane %v1535_v21, 2 }
 0x172   :  { %v1542_v12 = vadd.f32 %v1541_v56, %v1540_v46  ;;  %v1549_v9 = vadd.f32 %v1548_v28, %v1547_v39  ;;  %v1556_v62 = vadd.f32 %v1555_v13, %v1554_v32  ;;  %v1562_v10 = vrot.slane %v1561_v14, 4 }
 0x173   :  { %v1569_v1 = vrot.slane %v1568_v48, 4  ;;  %v1576_v27 = vrot.slane %v1575_v40, 4  ;;  %v1583_v51 = vrot.slane %v1582_v59, 4  ;;  %v1589_v60 = vsel %vm96_vm0, %v6000_v63, 0.0 }
 0x174   :  { %v1596_v3 = vsel %vm96_vm0, %v6003_v41, 0.0  ;;  %v1603_v53 = vsel %vm96_vm0, %v6006_v35, 0.0  ;;  %v1610_v22 = vsel %vm96_vm0, %v6009_v11, 0.0  ;;  %v1563_v50 = vadd.f32 %v1562_v10, %v1561_v14 }
 0x175   :  { %v1570_v4 = vadd.f32 %v1569_v1, %v1568_v48  ;;  %v1577_v43 = vadd.f32 %v1576_v27, %v1575_v40  ;;  %v1584_v18 = vadd.f32 %v1583_v51, %v1582_v59  ;;  %v1590_v24 = vrot.slane %v1589_v60, 4 }
 0x176   :  { %v1597_v61 = vrot.slane %v1596_v3, 4  ;;  %v1604_v38 = vrot.slane %v1603_v53, 4  ;;  %v1611_v44 = vrot.slane %v1610_v22, 4  ;;  %v1543_v23 = vrot.slane %v1542_v12, 2 }
 0x177   :  { %v1550_v57 = vrot.slane %v1549_v9, 2  ;;  %v1557_v63 = vrot.slane %v1556_v62, 2  ;;  %v1564_v47 = vrot.slane %v1563_v50, 2  ;;  %v1591_v2 = vadd.f32 %v1590_v24, %v1589_v60 }
 0x178   :  { %v1598_v41 = vadd.f32 %v1597_v61, %v1596_v3  ;;  %v1605_v46 = vadd.f32 %v1604_v38, %v1603_v53  ;;  %v1612_v39 = vadd.f32 %v1611_v44, %v1610_v22  ;;  %v1509_v35 = vadd.f32 %v1508_v25, %v1507_v37 }
 0x179   :  { %v1571_v32 = vrot.slane %v1570_v4, 2  ;;  %v1578_v56 = vrot.slane %v1577_v43, 2  ;;  %v1585_v11 = vrot.slane %v1584_v18, 2  ;;  %v1516_v28 = vadd.f32 %v1515_v0, %v1514_v20 }
 0x17a   :  { %v1523_v13 = vadd.f32 %v1522_v8, %v1521_v17  ;;  %v1530_v14 = vadd.f32 %v1529_v34, %v1528_v42  ;;  %v1592_v48 = vrot.slane %v1591_v2, 2  ;;  %v1537_v40 = vadd.f32 %v1536_v45, %v1535_v21 }
 0x17b   :  { %v1599_v59 = vrot.slane %v1598_v41, 2  ;;  %v1606_v10 = vrot.slane %v1605_v46, 2  ;;  %v1613_v1 = vrot.slane %v1612_v39, 2  ;;  %v1544_v27 = vadd.f32 %v1543_v23, %v1542_v12 }
 0x17c   :  { %v1551_v51 = vadd.f32 %v1550_v57, %v1549_v9  ;;  %v1558_v52 = vadd.f32 %v1557_v63, %v1556_v62  ;;  %v1565_v19 = vadd.f32 %v1564_v47, %v1563_v50  ;;  %v1510_v60 = vrot.slane %v1509_v35, 1 }
 0x17d   :  { %v1572_v3 = vadd.f32 %v1571_v32, %v1570_v4  ;;  %v1579_v53 = vadd.f32 %v1578_v56, %v1577_v43  ;;  %v1586_v22 = vadd.f32 %v1585_v11, %v1584_v18  ;;  %v1517_v37 = vrot.slane %v1516_v28, 1 }
 0x17e   :  { %v1524_v25 = vrot.slane %v1523_v13, 1  ;;  %v1531_v24 = vrot.slane %v1530_v14, 1  ;;  %v1593_v61 = vadd.f32 %v1592_v48, %v1591_v2  ;;  %v1538_v20 = vrot.slane %v1537_v40, 1 }
 0x17f   :  { %v1600_v17 = vadd.f32 %v1599_v59, %v1598_v41  ;;  %v1607_v42 = vadd.f32 %v1606_v10, %v1605_v46  ;;  %v1614_v0 = vadd.f32 %v1613_v1, %v1612_v39  ;;  %v1545_v21 = vrot.slane %v1544_v27, 1  ;;  %v9310_v1 = vld [vmem:[#allocation8_spill] sm:$0xff] }
 0x180   :  { %v1552_v8 = vrot.slane %v1551_v51, 1  ;;  %v1559_v34 = vrot.slane %v1558_v52, 1  ;;  %v1566_v45 = vrot.slane %v1565_v19, 1  ;;  %v1511_v12 = vadd.f32 %v1510_v60, %v1509_v35 }
 0x181   :  { %v1573_v9 = vrot.slane %v1572_v3, 1  ;;  %v1580_v62 = vrot.slane %v1579_v53, 1  ;;  %v1587_v50 = vrot.slane %v1586_v22, 1  ;;  %v1518_v38 = vadd.f32 %v1517_v37, %v1516_v28  ;;  %v9304_v28 = vld [vmem:[#allocation5_spill] sm:$0xff]  ;;  %v9324_v37 = vld [vmem:[#allocation15_spill] sm:$0xff] }
 0x182   :  { %v1525_v4 = vadd.f32 %v1524_v25, %v1523_v13  ;;  %v1532_v43 = vadd.f32 %v1531_v24, %v1530_v14  ;;  %v1594_v18 = vrot.slane %v1593_v61, 1  ;;  %v1539_v44 = vadd.f32 %v1538_v20, %v1537_v40  ;;  %v9306_v14 = vld [vmem:[#allocation6_spill] sm:$0xff]  ;;  %v9308_v40 = vld [vmem:[#allocation7_spill] sm:$0xff]  ;;  %v9326_v25 = vld [vmem:[#allocation16_spill] sm:$0xff] }
 0x183   :  { %v1601_v23 = vrot.slane %v1600_v17, 1  ;;  %v1608_v57 = vrot.slane %v1607_v42, 1  ;;  %v1615_v63 = vrot.slane %v1614_v0, 1  ;;  %v1546_v47 = vadd.f32 %v1545_v21, %v1544_v27  ;;  %v9328_v24 = vld [vmem:[#allocation17_spill] sm:$0xff]  ;;  %v9331_v20 = vld [vmem:[#allocation30_spill] sm:$0xff] }
 0x184   :  { %v1553_v2 = vadd.f32 %v1552_v8, %v1551_v51  ;;  %v1560_v41 = vadd.f32 %v1559_v34, %v1558_v52  ;;  %v1567_v46 = vadd.f32 %v1566_v45, %v1565_v19  ;;  %v1574_v39 = vadd.f32 %v1573_v9, %v1572_v3  ;;  %v9336_v21 = vld [vmem:[#allocation34_spill] sm:$0xff]  ;;  %v4126_v34 = vld [vmem:[%s9066_s0 + $0x58] sm:$0x7f]  ;;  %v9338_v9 = vld [vmem:[#allocation33_spill] sm:$0xff] }
 0x185   :  { %v1581_v32 = vadd.f32 %v1580_v62, %v1579_v53  ;;  %v1588_v56 = vadd.f32 %v1587_v50, %v1586_v22  ;;  %v6087_v35 = vadd.f32 %v6021_v55, %v5719_v31  ;;  %v1595_v11 = vadd.f32 %v1594_v18, %v1593_v61  ;;  %v9312_v55 = vld [vmem:[#allocation9_spill] sm:$0xff]  ;;  %v9322_v22 = vld [vmem:[#allocation14_spill] sm:$0xff]  ;;  %v6172_v45 = vld [vmem:[%s9067_s1 + $0x58] sm:$0x7f] }
 0x186   :  { %v6091_v13 = vadd.f32 %v6023_v5, %v9304_v28  ;;  %v6095_v48 = vadd.f32 %v6025_v29, %v9306_v14  ;;  %v6099_v52 = vadd.f32 %v6027_v30, %v9308_v40  ;;  %v1602_v19 = vadd.f32 %v1601_v23, %v1600_v17  ;;  %v9314_v5 = vld [vmem:[#allocation10_spill] sm:$0xff]  ;;  %v9316_v29 = vld [vmem:[#allocation11_spill] sm:$0xff]  ;;  %v9318_v30 = vld [vmem:[#allocation12_spill] sm:$0xff] }
 0x187   :  { %v1609_v59 = vadd.f32 %v1608_v57, %v1607_v42  ;;  %v1616_v10 = vadd.f32 %v1615_v63, %v1614_v0  ;;  %v6103_v31 = vadd.f32 %v6029_v58, %v9310_v1  ;;  %v6107_v27 = vadd.f32 %v6039_v54, %v9312_v55  ;;  %v9320_v53 = vld [vmem:[#allocation13_spill] sm:$0xff]  ;;  %v9330_v61 = vld [vmem:[#allocation18_spill] sm:$0xff]  ;;  %v9333_v17 = vld [vmem:[#allocation32_spill] sm:$0xff] }
 0x188   :  { %9305 = vst [vmem:[#allocation5_spill] sm:$0xff] %v6091_v13  ;;  %9307 = vst [vmem:[#allocation6_spill] sm:$0xff] %v6095_v48  ;;  %v6111_v51 = vadd.f32 %v6041_v33, %v9314_v5  ;;  %v6115_v60 = vadd.f32 %v6043_v36, %v9316_v29  ;;  %v6119_v3 = vadd.f32 %v6053_v7, %v9318_v30  ;;  %v4125_v7 = vld [vmem:[%s9066_s0 + $0x50] sm:$0x7f]  ;;  %v9340_v50 = vld [vmem:[#allocation36_spill] sm:$0xff] }
 0x189   :  { %9309 = vst [vmem:[#allocation7_spill] sm:$0xff] %v6099_v52  ;;  %9311 = vst [vmem:[#allocation8_spill] sm:$0xff] %v6103_v31  ;;  %v6123_v58 = vadd.f32 %v6055_v26, %v9320_v53  ;;  %v6127_v54 = vadd.f32 %v6057_v15, %v9322_v22  ;;  %v6131_v33 = vadd.f32 %v6059_v49, %v9324_v37  ;;  %v4127_v26 = vld [vmem:[%s9066_s0 + $0xc0] sm:$0x7f]  ;;  %v4128_v15 = vld [vmem:[%s9066_s0 + $0xc8] sm:$0x7f] }
 0x18a   :  { %9313 = vst [vmem:[#allocation9_spill] sm:$0xff] %v6107_v27  ;;  %9315 = vst [vmem:[#allocation10_spill] sm:$0xff] %v6111_v51  ;;  %v6135_v36 = vadd.f32 %v6061_v6, %v9326_v25  ;;  %v6148_v49 = vadd.f32 %v6063_v16, %v9328_v24  ;;  %v6152_v6 = vadd.f32 %v9331_v20, %v9330_v61  ;;  %v9334_v42 = vld [vmem:[#allocation31_spill] sm:$0xff]  ;;  %v9346_v28 = vld [vmem:[#allocation37_spill] sm:$0xff] }
 0x18b   :  { %9317 = vst [vmem:[#allocation11_spill] sm:$0xff] %v6115_v60  ;;  %9319 = vst [vmem:[#allocation12_spill] sm:$0xff] %v6119_v3  ;;  %v6156_v0 = vadd.f32 %v9334_v42, %v9333_v17  ;;  %v6159_v8 = vadd.f32 %v1511_v12, %v9336_v21  ;;  %v6167_v16 = vld [vmem:[%s9067_s1 + $0x50] sm:$0x7f]  ;;  %v6175_v62 = vadd.f32 %v1518_v38, %v9338_v9  ;;  %v9348_v40 = vld [vmem:[#allocation20_spill] sm:$0xff] }
 0x18c   :  { %9321 = vst [vmem:[#allocation13_spill] sm:$0xff] %v6123_v58  ;;  %9323 = vst [vmem:[#allocation14_spill] sm:$0xff] %v6127_v54  ;;  %v6178_v12 = vadd.f32 %v1525_v4, %v9340_v50  ;;  %v9342_v18 = vld [vmem:[#allocation35_spill] sm:$0xff]  ;;  %v6187_v14 = vadd.f32 %v1546_v47, %v9346_v28  ;;  %v6190_v1 = vadd.f32 %v1553_v2, %v9348_v40  ;;  %v9350_v55 = vld [vmem:[#allocation21_spill] sm:$0xff] }
 0x18d   :  { %9325 = vst [vmem:[#allocation15_spill] sm:$0xff] %v6131_v33  ;;  %9327 = vst [vmem:[#allocation16_spill] sm:$0xff] %v6135_v36  ;;  %v6181_v23 = vadd.f32 %v1532_v43, %v9342_v18  ;;  %v9344_v57 = vld [vmem:[#allocation19_spill] sm:$0xff]  ;;  %v6193_v5 = vadd.f32 %v1560_v41, %v9350_v55  ;;  %v9352_v38 = vld [vmem:[#allocation22_spill] sm:$0xff]  ;;  %v1685_v41 = vmul.f32 %v6167_v16, %v4125_v7 }
 0x18e   :  { %9329 = vst [vmem:[#allocation17_spill] sm:$0xff] %v6148_v49  ;;  %9332 = vst [vmem:[#allocation18_spill] sm:$0xff] %v6152_v6  ;;  %v6184_v63 = vadd.f32 %v1539_v44, %v9344_v57  ;;  %v6196_v29 = vadd.f32 %v1567_v46, %v9352_v38  ;;  %v4129_v4 = vld [vmem:[%s9066_s0 + $0x130] sm:$0x7f]  ;;  %v4130_v43 = vld [vmem:[%s9066_s0 + $0x138] sm:$0x7f]  ;;  %v1686_v46 = vmul.f32 %v6172_v45, %v4126_v34 }
 0x18f   :  { %9335 = vst [vmem:[#allocation30_spill] sm:$0xff] %v6156_v0  ;;  %9337 = vst [vmem:[#allocation32_spill] sm:$0xff] %v6159_v8  ;;  %v4131_v44 = vld [vmem:[%s9066_s0 + $0x1a0] sm:$0x7f]  ;;  %v4132_v47 = vld [vmem:[%s9066_s0 + $0x1a8] sm:$0x7f]  ;;  %v1687_v30 = vmul.f32 %v6167_v16, %v4127_v26  ;;  %v1688_v53 = vmul.f32 %v6172_v45, %v4128_v15  ;;  %v1690_v57 = vmul.f32 %v6172_v45, %v4130_v43 }
 0x190   :  { %9339 = vst [vmem:[#allocation31_spill] sm:$0xff] %v6175_v62  ;;  %9341 = vst [vmem:[#allocation34_spill] sm:$0xff] %v6178_v12  ;;  %v4133_v2 = vld [vmem:[%s9066_s0 + $0x210] sm:$0x7f]  ;;  %v9356_v25 = vld [vmem:[#allocation24_spill] sm:$0xff]  ;;  %v1691_v28 = vmul.f32 %v6167_v16, %v4131_v44  ;;  %v1692_v40 = vmul.f32 %v6172_v45, %v4132_v47 }
 0x191   :  { %9343 = vst [vmem:[#allocation33_spill] sm:$0xff] %v6181_v23  ;;  %9345 = vst [vmem:[#allocation36_spill] sm:$0xff] %v6184_v63  ;;  %v9354_v22 = vld [vmem:[#allocation23_spill] sm:$0xff]  ;;  %v6221_v24 = vadd.f32 %v1581_v32, %v9356_v25  ;;  %v9358_v61 = vld [vmem:[#allocation25_spill] sm:$0xff]  ;;  %v6267_v55 = vmul.f32 %v6167_v16, %v4133_v2  ;;  %v1731_v25 = vsel %vm96_vm0, %v1687_v30, 0.0 }
 0x192   :  { %9347 = vst [vmem:[#allocation35_spill] sm:$0xff] %v6187_v14  ;;  %9349 = vst [vmem:[#allocation19_spill] sm:$0xff] %v6190_v1  ;;  %v6218_v37 = vadd.f32 %v1574_v39, %v9354_v22  ;;  %v6224_v20 = vadd.f32 %v1588_v56, %v9358_v61  ;;  %v9360_v17 = vld [vmem:[#allocation26_spill] sm:$0xff]  ;;  %v4134_v7 = vld [vmem:[%s9066_s0 + $0x218] sm:$0x7f]  ;;  %v1724_v22 = vsel %vm96_vm0, %v1686_v46, 0.0 }
 0x193   :  { %9351 = vst [vmem:[#allocation37_spill] sm:$0xff] %v6193_v5  ;;  %9353 = vst [vmem:[#allocation20_spill] sm:$0xff] %v6196_v29  ;;  %v6227_v42 = vadd.f32 %v1595_v11, %v9360_v17  ;;  %v9362_v21 = vld [vmem:[#allocation27_spill] sm:$0xff]  ;;  %v9364_v15 = vld [vmem:[#allocation28_spill] sm:$0xff]  ;;  %v1738_v61 = vsel %vm96_vm0, %v1688_v53, 0.0  ;;  %v1694_v2 = vmul.f32 %v6172_v45, %v4134_v7  ;;  %v1752_v5 = vsel %vm96_vm0, %v1690_v57, 0.0 }
 0x194   :  { %9355 = vst [vmem:[#allocation21_spill] sm:$0xff] %v6218_v37  ;;  %9357 = vst [vmem:[#allocation22_spill] sm:$0xff] %v6221_v24  ;;  %v6233_v26 = vadd.f32 %v1602_v19, %v9362_v21  ;;  %v6236_v34 = vadd.f32 %v1609_v59, %v9364_v15  ;;  %v9366_v39 = vld [vmem:[#allocation29_spill] sm:$0xff]  ;;  %v4137_v11 = vld [vmem:[%s9066_s0 + $0x2f0] sm:$0x7f]  ;;  %v1689_v19 = vmul.f32 %v6167_v16, %v4129_v4  ;;  %v1717_v4 = vsel %vm96_vm0, %v1685_v41, 0.0 }
 0x195   :  { %9359 = vst [vmem:[#allocation23_spill] sm:$0xff] %v6224_v20  ;;  %9361 = vst [vmem:[#allocation24_spill] sm:$0xff] %v6227_v42  ;;  %v6239_v9 = vadd.f32 %v1616_v10, %v9366_v39  ;;  %v4135_v32 = vld [vmem:[%s9066_s0 + $0x280] sm:$0x7f]  ;;  %v4136_v56 = vld [vmem:[%s9066_s0 + $0x288] sm:$0x7f]  ;;  %v6289_v30 = vmul.f32 %v6167_v16, %v4137_v11 }
 0x196   :  { %9363 = vst [vmem:[#allocation25_spill] sm:$0xff] %v6233_v26  ;;  %9365 = vst [vmem:[#allocation26_spill] sm:$0xff] %v6236_v34  ;;  %v4138_v59 = vld [vmem:[%s9066_s0 + $0x2f8] sm:$0x7f]  ;;  %v4139_v10 = vld [vmem:[%s9066_s0 + $0x360] sm:$0x7f]  ;;  %v1695_v41 = vmul.f32 %v6167_v16, %v4135_v32  ;;  %v1696_v46 = vmul.f32 %v6172_v45, %v4136_v56 }
 0x197   :  { %9367 = vst [vmem:[#allocation27_spill] sm:$0xff] %v6239_v9  ;;  %v4140_v50 = vld [vmem:[%s9066_s0 + $0x368] sm:$0x7f]  ;;  %v4143_v18 = vld [vmem:[%s9066_s0 + $0x440] sm:$0x7f]  ;;  %v1698_v21 = vmul.f32 %v6172_v45, %v4138_v59  ;;  %v1699_v15 = vmul.f32 %v6167_v16, %v4139_v10  ;;  %v1745_v39 = vsel %vm96_vm0, %v1689_v19, 0.0 }
 0x198   :  { %v4144_v38 = vld [vmem:[%s9066_s0 + $0x448] sm:$0x7f]  ;;  %v4141_v43 = vld [vmem:[%s9066_s0 + $0x3d0] sm:$0x7f]  ;;  %v4142_v44 = vld [vmem:[%s9066_s0 + $0x3d8] sm:$0x7f]  ;;  %v1700_v7 = vmul.f32 %v6172_v45, %v4140_v50  ;;  %v6317_v50 = vmul.f32 %v6167_v16, %v4143_v18 }
 0x199   :  { %v4145_v47 = vld [vmem:[%s9066_s0 + $0x4b0] sm:$0x7f]  ;;  %v4146_v53 = vld [vmem:[%s9066_s0 + $0x4b8] sm:$0x7f]  ;;  %v4147_v17 = vld [vmem:[%s9066_s0 + $0x520] sm:$0x7f]  ;;  %v6311_v10 = vmul.f32 %v6167_v16, %v4141_v43  ;;  %v6314_v19 = vmul.f32 %v6172_v45, %v4142_v44  ;;  %v6320_v42 = vmul.f32 %v6172_v45, %v4144_v38 }
 0x19a   :  { %v4148_v32 = vld [vmem:[%s9066_s0 + $0x528] sm:$0x7f]  ;;  %v1718_v56 = vrot.slane %v1717_v4, 4  ;;  %v1725_v11 = vrot.slane %v1724_v22, 4  ;;  %v1732_v9 = vrot.slane %v1731_v25, 4  ;;  %v1739_v34 = vrot.slane %v1738_v61, 4 }
 0x19b   :  { %v4149_v26 = vld [vmem:[%s9066_s0 + $0x590] sm:$0x7f]  ;;  %v4150_v59 = vld [vmem:[%s9066_s0 + $0x598] sm:$0x7f]  ;;  %v4151_v20 = vld [vmem:[%s9066_s0 + $0x600] sm:$0x7f]  ;;  %v6329_v43 = vmul.f32 %v6167_v16, %v4145_v47  ;;  %v6332_v44 = vmul.f32 %v6172_v45, %v4146_v53  ;;  %v6335_v18 = vmul.f32 %v6167_v16, %v4147_v17  ;;  %v6341_v29 = vmul.f32 %v6172_v45, %v4148_v32 }
 0x19c   :  { %v4152_v24 = vld [vmem:[%s9066_s0 + $0x608] sm:$0x7f]  ;;  %v1746_v37 = vrot.slane %v1745_v39, 4  ;;  %v4153_v38 = vld [vmem:[%s9066_s0 + $0x670] sm:$0x7f]  ;;  %v1759_v1 = vsel %vm96_vm0, %v1691_v28, 0.0  ;;  %v1719_v32 = vadd.f32 %v1718_v56, %v1717_v4  ;;  %v1726_v63 = vadd.f32 %v1725_v11, %v1724_v22 }
 0x19d   :  { %v1766_v47 = vsel %vm96_vm0, %v1692_v40, 0.0  ;;  %v4154_v53 = vld [vmem:[%s9066_s0 + $0x678] sm:$0x7f]  ;;  %v4155_v17 = vld [vmem:[%s9066_s0 + $0x6e0] sm:$0x7f]  ;;  %v1733_v23 = vadd.f32 %v1732_v9, %v1731_v25  ;;  %v1740_v57 = vadd.f32 %v1739_v34, %v1738_v61  ;;  %v6356_v28 = vmul.f32 %v6167_v16, %v4149_v26 }
 0x19e   :  { %v4156_v14 = vld [vmem:[%s9066_s0 + $0x6e8] sm:$0x7f]  ;;  %v6359_v40 = vmul.f32 %v6172_v45, %v4150_v59  ;;  %v6362_v12 = vmul.f32 %v6167_v16, %v4151_v20  ;;  %v6365_v62 = vmul.f32 %v6172_v45, %v4152_v24  ;;  %v1747_v8 = vadd.f32 %v1746_v37, %v1745_v39 }
 0x19f   :  { %v1753_v0 = vrot.slane %v1752_v5, 4  ;;  %v1760_v6 = vrot.slane %v1759_v1, 4  ;;  %v1767_v49 = vrot.slane %v1766_v47, 4  ;;  %v6368_v4 = vmul.f32 %v6167_v16, %v4153_v38 }
 0x1a0   :  { %v6371_v34 = vmul.f32 %v6172_v45, %v4154_v53  ;;  %v6374_v26 = vmul.f32 %v6167_v16, %v4155_v17  ;;  %v6377_v9 = vmul.f32 %v6172_v45, %v4156_v14  ;;  %v1720_v20 = vrot.slane %v1719_v32, 2 }
 0x1a1   :  { %v1727_v22 = vrot.slane %v1726_v63, 2  ;;  %v1734_v24 = vrot.slane %v1733_v23, 2  ;;  %v1741_v25 = vrot.slane %v1740_v57, 2  ;;  %v1773_v37 = vsel %vm96_vm0, %v6267_v55, 0.0 }
 0x1a2   :  { %v1780_v61 = vsel %vm96_vm0, %v1694_v2, 0.0  ;;  %v1787_v39 = vsel %vm96_vm0, %v1695_v41, 0.0  ;;  %v1794_v56 = vsel %vm96_vm0, %v1696_v46, 0.0  ;;  %v1748_v11 = vrot.slane %v1747_v8, 2 }
 0x1a3   :  { %v1754_v59 = vadd.f32 %v1753_v0, %v1752_v5  ;;  %v1761_v16 = vadd.f32 %v1760_v6, %v1759_v1  ;;  %v1768_v38 = vadd.f32 %v1767_v49, %v1766_v47  ;;  %v1774_v53 = vrot.slane %v1773_v37, 4 }
 0x1a4   :  { %v1781_v45 = vrot.slane %v1780_v61, 4  ;;  %v1788_v14 = vrot.slane %v1787_v39, 4  ;;  %v1795_v17 = vrot.slane %v1794_v56, 4  ;;  %v1801_v36 = vsel %vm96_vm0, %v6289_v30, 0.0 }
 0x1a5   :  { %v1808_v33 = vsel %vm96_vm0, %v1698_v21, 0.0  ;;  %v1815_v55 = vsel %vm96_vm0, %v1699_v15, 0.0  ;;  %v1822_v2 = vsel %vm96_vm0, %v1700_v7, 0.0  ;;  %v1721_v41 = vadd.f32 %v1720_v20, %v1719_v32 }
 0x1a6   :  { %v1728_v54 = vadd.f32 %v1727_v22, %v1726_v63  ;;  %v1735_v46 = vadd.f32 %v1734_v24, %v1733_v23  ;;  %v1742_v58 = vadd.f32 %v1741_v25, %v1740_v57  ;;  %v1755_v0 = vrot.slane %v1754_v59, 2 }
 0x1a7   :  { %v1802_v6 = vrot.slane %v1801_v36, 4  ;;  %v1809_v49 = vrot.slane %v1808_v33, 4  ;;  %v1816_v1 = vrot.slane %v1815_v55, 4  ;;  %v1749_v5 = vadd.f32 %v1748_v11, %v1747_v8 }
 0x1a8   :  { %v1762_v47 = vrot.slane %v1761_v16, 2  ;;  %v1769_v3 = vrot.slane %v1768_v38, 2  ;;  %v1823_v60 = vrot.slane %v1822_v2, 4  ;;  %v1775_v51 = vadd.f32 %v1774_v53, %v1773_v37 }
 0x1a9   :  { %v1782_v30 = vadd.f32 %v1781_v45, %v1780_v61  ;;  %v1789_v27 = vadd.f32 %v1788_v14, %v1787_v39  ;;  %v1796_v21 = vadd.f32 %v1795_v17, %v1794_v56  ;;  %v1722_v31 = vrot.slane %v1721_v41, 1 }
 0x1aa   :  { %v1729_v15 = vrot.slane %v1728_v54, 1  ;;  %v1736_v52 = vrot.slane %v1735_v46, 1  ;;  %v1743_v7 = vrot.slane %v1742_v58, 1  ;;  %v1756_v32 = vadd.f32 %v1755_v0, %v1754_v59 }
 0x1ab   :  { %v1803_v63 = vadd.f32 %v1802_v6, %v1801_v36  ;;  %v1810_v23 = vadd.f32 %v1809_v49, %v1808_v33  ;;  %v1817_v57 = vadd.f32 %v1816_v1, %v1815_v55  ;;  %v1750_v20 = vrot.slane %v1749_v5, 1 }
 0x1ac   :  { %v1763_v22 = vadd.f32 %v1762_v47, %v1761_v16  ;;  %v1770_v24 = vadd.f32 %v1769_v3, %v1768_v38  ;;  %v1824_v25 = vadd.f32 %v1823_v60, %v1822_v2  ;;  %v1776_v8 = vrot.slane %v1775_v51, 2 }
 0x1ad   :  { %v1783_v11 = vrot.slane %v1782_v30, 2  ;;  %v1790_v48 = vrot.slane %v1789_v27, 2  ;;  %v1797_v13 = vrot.slane %v1796_v21, 2  ;;  %v6389_v37 = vadd.f32 %v1722_v31, %v1721_v41 }
 0x1ae   :  { %v6391_v61 = vadd.f32 %v1729_v15, %v1728_v54  ;;  %v6393_v39 = vadd.f32 %v1736_v52, %v1735_v46  ;;  %v6395_v56 = vadd.f32 %v1743_v7, %v1742_v58  ;;  %v1757_v59 = vrot.slane %v1756_v32, 1 }
 0x1af   :  { %v1804_v36 = vrot.slane %v1803_v63, 2  ;;  %v1811_v33 = vrot.slane %v1810_v23, 2  ;;  %v1818_v53 = vrot.slane %v1817_v57, 2  ;;  %v6397_v45 = vadd.f32 %v1750_v20, %v1749_v5 }
 0x1b0   :  { %v1764_v3 = vrot.slane %v1763_v22, 1  ;;  %v1771_v60 = vrot.slane %v1770_v24, 1  ;;  %v1825_v16 = vrot.slane %v1824_v25, 2  ;;  %v1777_v38 = vadd.f32 %v1776_v8, %v1775_v51 }
 0x1b1   :  { %v1784_v14 = vadd.f32 %v1783_v11, %v1782_v30  ;;  %v1791_v17 = vadd.f32 %v1790_v48, %v1789_v27  ;;  %v1798_v31 = vadd.f32 %v1797_v13, %v1796_v21  ;;  %v1829_v54 = vsel %vm96_vm0, %v6311_v10, 0.0 }
 0x1b2   :  { %v1836_v52 = vsel %vm96_vm0, %v6314_v19, 0.0  ;;  %v1843_v58 = vsel %vm96_vm0, %v6317_v50, 0.0  ;;  %v1850_v55 = vsel %vm96_vm0, %v6320_v42, 0.0  ;;  %v6407_v2 = vadd.f32 %v1757_v59, %v1756_v32 }
 0x1b3   :  { %v1805_v41 = vadd.f32 %v1804_v36, %v1803_v63  ;;  %v1812_v46 = vadd.f32 %v1811_v33, %v1810_v23  ;;  %v1819_v51 = vadd.f32 %v1818_v53, %v1817_v57  ;;  %v6409_v0 = vadd.f32 %v1764_v3, %v1763_v22 }
 0x1b4   :  { %v6411_v13 = vadd.f32 %v1771_v60, %v1770_v24  ;;  %v1826_v48 = vadd.f32 %v1825_v16, %v1824_v25  ;;  %v1857_v27 = vsel %vm96_vm0, %v6329_v43, 0.0  ;;  %v1830_v10 = vrot.slane %v1829_v54, 4 }
 0x1b5   :  { %v1837_v19 = vrot.slane %v1836_v52, 4  ;;  %v1844_v6 = vrot.slane %v1843_v58, 4  ;;  %v1851_v50 = vrot.slane %v1850_v55, 4  ;;  %v1778_v49 = vrot.slane %v1777_v38, 1 }
 0x1b6   :  { %v1785_v1 = vrot.slane %v1784_v14, 1  ;;  %v1792_v42 = vrot.slane %v1791_v17, 1  ;;  %v1799_v5 = vrot.slane %v1798_v31, 1  ;;  %v1806_v47 = vrot.slane %v1805_v41, 1 }
 0x1b7   :  { %v1813_v30 = vrot.slane %v1812_v46, 1  ;;  %v1820_v21 = vrot.slane %v1819_v51, 1  ;;  %v1858_v15 = vrot.slane %v1857_v27, 4  ;;  %v1827_v7 = vrot.slane %v1826_v48, 1 }
 0x1b8   :  { %v1864_v32 = vsel %vm96_vm0, %v6332_v44, 0.0  ;;  %v1871_v63 = vsel %vm96_vm0, %v6335_v18, 0.0  ;;  %v1878_v43 = vsel %vm96_vm0, %v6341_v29, 0.0  ;;  %v1831_v23 = vadd.f32 %v1830_v10, %v1829_v54 }
 0x1b9   :  { %v1838_v57 = vadd.f32 %v1837_v19, %v1836_v52  ;;  %v1845_v20 = vadd.f32 %v1844_v6, %v1843_v58  ;;  %v1852_v22 = vadd.f32 %v1851_v50, %v1850_v55  ;;  %v6421_v24 = vadd.f32 %v1778_v49, %v1777_v38 }
 0x1ba   :  { %v6423_v25 = vadd.f32 %v1785_v1, %v1784_v14  ;;  %v6425_v8 = vadd.f32 %v1792_v42, %v1791_v17  ;;  %v6427_v11 = vadd.f32 %v1799_v5, %v1798_v31  ;;  %v1859_v59 = vadd.f32 %v1858_v15, %v1857_v27 }
 0x1bb   :  { %v1865_v44 = vrot.slane %v1864_v32, 4  ;;  %v1872_v36 = vrot.slane %v1871_v63, 4  ;;  %v1879_v33 = vrot.slane %v1878_v43, 4  ;;  %v6429_v18 = vadd.f32 %v1806_v47, %v1805_v41 }
 0x1bc   :  { %v6431_v53 = vadd.f32 %v1813_v30, %v1812_v46  ;;  %v6433_v29 = vadd.f32 %v1820_v21, %v1819_v51  ;;  %v6435_v3 = vadd.f32 %v1827_v7, %v1826_v48  ;;  %v1832_v60 = vrot.slane %v1831_v23, 2 }
 0x1bd   :  { %v1839_v16 = vrot.slane %v1838_v57, 2  ;;  %v1846_v38 = vrot.slane %v1845_v20, 2  ;;  %v1853_v14 = vrot.slane %v1852_v22, 2  ;;  %v1885_v17 = vsel %vm96_vm0, %v6356_v28, 0.0 }
 0x1be   :  { %9368 = vst [vmem:[#allocation28_spill] sm:$0xff] %v6433_v29  ;;  %9369 = vst [vmem:[#allocation29_spill] sm:$0xff] %v6435_v3  ;;  %v1892_v31 = vsel %vm96_vm0, %v6359_v40, 0.0  ;;  %v1899_v54 = vsel %vm96_vm0, %v6362_v12, 0.0  ;;  %v1906_v52 = vsel %vm96_vm0, %v6365_v62, 0.0  ;;  %v1860_v58 = vrot.slane %v1859_v59, 2 }
 0x1bf   :  { %v1866_v55 = vadd.f32 %v1865_v44, %v1864_v32  ;;  %v1873_v41 = vadd.f32 %v1872_v36, %v1871_v63  ;;  %v1880_v46 = vadd.f32 %v1879_v33, %v1878_v43  ;;  %v1886_v51 = vrot.slane %v1885_v17, 4 }
 0x1c0   :  { %v1893_v48 = vrot.slane %v1892_v31, 4  ;;  %v1900_v27 = vrot.slane %v1899_v54, 4  ;;  %v1907_v10 = vrot.slane %v1906_v52, 4  ;;  %v1913_v28 = vsel %vm96_vm0, %v6368_v4, 0.0 }
 0x1c1   :  { %v1920_v40 = vsel %vm96_vm0, %v6371_v34, 0.0  ;;  %v1927_v12 = vsel %vm96_vm0, %v6374_v26, 0.0  ;;  %v1934_v62 = vsel %vm96_vm0, %v6377_v9, 0.0  ;;  %v1887_v19 = vadd.f32 %v1886_v51, %v1885_v17 }
 0x1c2   :  { %v1894_v6 = vadd.f32 %v1893_v48, %v1892_v31  ;;  %v1901_v50 = vadd.f32 %v1900_v27, %v1899_v54  ;;  %v1908_v49 = vadd.f32 %v1907_v10, %v1906_v52  ;;  %v1914_v1 = vrot.slane %v1913_v28, 4 }
 0x1c3   :  { %v1921_v42 = vrot.slane %v1920_v40, 4  ;;  %v1928_v5 = vrot.slane %v1927_v12, 4  ;;  %v1935_v47 = vrot.slane %v1934_v62, 4  ;;  %v1867_v30 = vrot.slane %v1866_v55, 2 }
 0x1c4   :  { %v1874_v21 = vrot.slane %v1873_v41, 2  ;;  %v1881_v4 = vrot.slane %v1880_v46, 2  ;;  %v1888_v15 = vrot.slane %v1887_v19, 2  ;;  %v1915_v7 = vadd.f32 %v1914_v1, %v1913_v28 }
 0x1c5   :  { %v1922_v34 = vadd.f32 %v1921_v42, %v1920_v40  ;;  %v1929_v32 = vadd.f32 %v1928_v5, %v1927_v12  ;;  %v1936_v63 = vadd.f32 %v1935_v47, %v1934_v62  ;;  %v1833_v26 = vadd.f32 %v1832_v60, %v1831_v23 }
 0x1c6   :  { %v1895_v43 = vrot.slane %v1894_v6, 2  ;;  %v1902_v44 = vrot.slane %v1901_v50, 2  ;;  %v1909_v9 = vrot.slane %v1908_v49, 2  ;;  %v1840_v36 = vadd.f32 %v1839_v16, %v1838_v57 }
 0x1c7   :  { %v1847_v33 = vadd.f32 %v1846_v38, %v1845_v20  ;;  %v1854_v17 = vadd.f32 %v1853_v14, %v1852_v22  ;;  %v1916_v31 = vrot.slane %v1915_v7, 2  ;;  %v1861_v54 = vadd.f32 %v1860_v58, %v1859_v59 }
 0x1c8   :  { %v1923_v52 = vrot.slane %v1922_v34, 2  ;;  %v1930_v51 = vrot.slane %v1929_v32, 2  ;;  %v1937_v48 = vrot.slane %v1936_v63, 2  ;;  %v1868_v27 = vadd.f32 %v1867_v30, %v1866_v55 }
 0x1c9   :  { %v1875_v10 = vadd.f32 %v1874_v21, %v1873_v41  ;;  %v1882_v3 = vadd.f32 %v1881_v4, %v1880_v46  ;;  %v1889_v29 = vadd.f32 %v1888_v15, %v1887_v19  ;;  %v1834_v28 = vrot.slane %v1833_v26, 1 }
 0x1ca   :  { %v1896_v40 = vadd.f32 %v1895_v43, %v1894_v6  ;;  %v1903_v12 = vadd.f32 %v1902_v44, %v1901_v50  ;;  %v1910_v62 = vadd.f32 %v1909_v9, %v1908_v49  ;;  %v1841_v23 = vrot.slane %v1840_v36, 1 }
 0x1cb   :  { %v1848_v60 = vrot.slane %v1847_v33, 1  ;;  %v1855_v1 = vrot.slane %v1854_v17, 1  ;;  %v1917_v42 = vadd.f32 %v1916_v31, %v1915_v7  ;;  %v1862_v57 = vrot.slane %v1861_v54, 1 }
 0x1cc   :  { %v1924_v20 = vadd.f32 %v1923_v52, %v1922_v34  ;;  %v1931_v22 = vadd.f32 %v1930_v51, %v1929_v32  ;;  %v1938_v16 = vadd.f32 %v1937_v48, %v1936_v63  ;;  %v1869_v59 = vrot.slane %v1868_v27, 1  ;;  %v9376_v48 = vld [vmem:[#allocation8_spill] sm:$0xff] }
 0x1cd   :  { %v1876_v38 = vrot.slane %v1875_v10, 1  ;;  %v1883_v14 = vrot.slane %v1882_v3, 1  ;;  %v1890_v58 = vrot.slane %v1889_v29, 1  ;;  %v1835_v55 = vadd.f32 %v1834_v28, %v1833_v26 }
 0x1ce   :  { %v1897_v41 = vrot.slane %v1896_v40, 1  ;;  %v1904_v46 = vrot.slane %v1903_v12, 1  ;;  %v1911_v19 = vrot.slane %v1910_v62, 1  ;;  %v1842_v5 = vadd.f32 %v1841_v23, %v1840_v36  ;;  %v9370_v36 = vld [vmem:[#allocation5_spill] sm:$0xff]  ;;  %v9390_v23 = vld [vmem:[#allocation15_spill] sm:$0xff] }
 0x1cf   :  { %v1849_v6 = vadd.f32 %v1848_v60, %v1847_v33  ;;  %v1856_v50 = vadd.f32 %v1855_v1, %v1854_v17  ;;  %v1918_v49 = vrot.slane %v1917_v42, 1  ;;  %v1863_v47 = vadd.f32 %v1862_v57, %v1861_v54  ;;  %v9372_v17 = vld [vmem:[#allocation6_spill] sm:$0xff]  ;;  %v9374_v54 = vld [vmem:[#allocation7_spill] sm:$0xff]  ;;  %v9392_v60 = vld [vmem:[#allocation16_spill] sm:$0xff] }
 0x1d0   :  { %v1925_v30 = vrot.slane %v1924_v20, 1  ;;  %v1932_v21 = vrot.slane %v1931_v22, 1  ;;  %v1939_v4 = vrot.slane %v1938_v16, 1  ;;  %v1870_v15 = vadd.f32 %v1869_v59, %v1868_v27  ;;  %v9394_v1 = vld [vmem:[#allocation17_spill] sm:$0xff]  ;;  %v9397_v57 = vld [vmem:[#allocation28_spill] sm:$0xff] }
 0x1d1   :  { %v1877_v7 = vadd.f32 %v1876_v38, %v1875_v10  ;;  %v1884_v34 = vadd.f32 %v1883_v14, %v1882_v3  ;;  %v1891_v32 = vadd.f32 %v1890_v58, %v1889_v29  ;;  %v1898_v63 = vadd.f32 %v1897_v41, %v1896_v40  ;;  %v9402_v59 = vld [vmem:[#allocation32_spill] sm:$0xff]  ;;  %v4160_v14 = vld [vmem:[%s9066_s0 + $0x68] sm:$0x7f]  ;;  %v9404_v41 = vld [vmem:[#allocation31_spill] sm:$0xff] }
 0x1d2   :  { %v1905_v43 = vadd.f32 %v1904_v46, %v1903_v12  ;;  %v1912_v44 = vadd.f32 %v1911_v19, %v1910_v62  ;;  %v6455_v26 = vadd.f32 %v6389_v37, %v6087_v35  ;;  %v1919_v9 = vadd.f32 %v1918_v49, %v1917_v42  ;;  %v9378_v37 = vld [vmem:[#allocation9_spill] sm:$0xff]  ;;  %v9388_v62 = vld [vmem:[#allocation14_spill] sm:$0xff] }
 0x1d3   :  { %v6459_v33 = vadd.f32 %v6391_v61, %v9370_v36  ;;  %v6463_v31 = vadd.f32 %v6393_v39, %v9372_v17  ;;  %v6467_v3 = vadd.f32 %v6395_v56, %v9374_v54  ;;  %v1926_v29 = vadd.f32 %v1925_v30, %v1924_v20  ;;  %v9380_v61 = vld [vmem:[#allocation10_spill] sm:$0xff]  ;;  %v9382_v39 = vld [vmem:[#allocation11_spill] sm:$0xff]  ;;  %v9384_v56 = vld [vmem:[#allocation12_spill] sm:$0xff] }
 0x1d4   :  { %v1933_v52 = vadd.f32 %v1932_v21, %v1931_v22  ;;  %v1940_v51 = vadd.f32 %v1939_v4, %v1938_v16  ;;  %v6471_v35 = vadd.f32 %v6397_v45, %v9376_v48  ;;  %v6475_v27 = vadd.f32 %v6407_v2, %v9378_v37  ;;  %v9386_v12 = vld [vmem:[#allocation13_spill] sm:$0xff]  ;;  %v9396_v42 = vld [vmem:[#allocation18_spill] sm:$0xff]  ;;  %v9410_v21 = vld [vmem:[#allocation36_spill] sm:$0xff] }
 0x1d5   :  { %9371 = vst [vmem:[#allocation5_spill] sm:$0xff] %v6459_v33  ;;  %9373 = vst [vmem:[#allocation6_spill] sm:$0xff] %v6463_v31  ;;  %v6479_v10 = vadd.f32 %v6409_v0, %v9380_v61  ;;  %v6483_v28 = vadd.f32 %v6411_v13, %v9382_v39  ;;  %v6487_v40 = vadd.f32 %v6421_v24, %v9384_v56  ;;  %v4159_v24 = vld [vmem:[%s9066_s0 + $0x60] sm:$0x7f]  ;;  %v9399_v20 = vld [vmem:[#allocation30_spill] sm:$0xff] }
 0x1d6   :  { %9375 = vst [vmem:[#allocation7_spill] sm:$0xff] %v6467_v3  ;;  %9377 = vst [vmem:[#allocation8_spill] sm:$0xff] %v6471_v35  ;;  %v6491_v45 = vadd.f32 %v6423_v25, %v9386_v12  ;;  %v6495_v2 = vadd.f32 %v6425_v8, %v9388_v62  ;;  %v6499_v0 = vadd.f32 %v6427_v11, %v9390_v23  ;;  %v4161_v25 = vld [vmem:[%s9066_s0 + $0xd0] sm:$0x7f]  ;;  %v4162_v8 = vld [vmem:[%s9066_s0 + $0xd8] sm:$0x7f] }
 0x1d7   :  { %9379 = vst [vmem:[#allocation9_spill] sm:$0xff] %v6475_v27  ;;  %9381 = vst [vmem:[#allocation10_spill] sm:$0xff] %v6479_v10  ;;  %v6503_v13 = vadd.f32 %v6429_v18, %v9392_v60  ;;  %v6516_v11 = vadd.f32 %v6431_v53, %v9394_v1  ;;  %v6520_v18 = vadd.f32 %v9397_v57, %v9396_v42  ;;  %v9400_v22 = vld [vmem:[#allocation29_spill] sm:$0xff]  ;;  %v9406_v19 = vld [vmem:[#allocation34_spill] sm:$0xff] }
 0x1d8   :  { %9383 = vst [vmem:[#allocation11_spill] sm:$0xff] %v6483_v28  ;;  %9385 = vst [vmem:[#allocation12_spill] sm:$0xff] %v6487_v40  ;;  %v6524_v16 = vadd.f32 %v9400_v22, %v9399_v20  ;;  %v6527_v38 = vadd.f32 %v1835_v55, %v9402_v59  ;;  %v6535_v53 = vld [vmem:[%s9067_s1 + $0x60] sm:$0x7f]  ;;  %v6540_v58 = vld [vmem:[%s9067_s1 + $0x68] sm:$0x7f]  ;;  %v6543_v46 = vadd.f32 %v1842_v5, %v9404_v41 }
 0x1d9   :  { %9387 = vst [vmem:[#allocation13_spill] sm:$0xff] %v6491_v45  ;;  %9389 = vst [vmem:[#allocation14_spill] sm:$0xff] %v6495_v2  ;;  %v6546_v55 = vadd.f32 %v1849_v6, %v9406_v19  ;;  %v9408_v49 = vld [vmem:[#allocation33_spill] sm:$0xff]  ;;  %v6552_v4 = vadd.f32 %v1863_v47, %v9410_v21  ;;  %v9412_v36 = vld [vmem:[#allocation35_spill] sm:$0xff]  ;;  %v2011_v56 = vmul.f32 %v6535_v53, %v4161_v25 }
 0x1da   :  { %9391 = vst [vmem:[#allocation15_spill] sm:$0xff] %v6499_v0  ;;  %9393 = vst [vmem:[#allocation16_spill] sm:$0xff] %v6503_v13  ;;  %v6549_v30 = vadd.f32 %v1856_v50, %v9408_v49  ;;  %v6555_v17 = vadd.f32 %v1870_v15, %v9412_v36  ;;  %v9414_v54 = vld [vmem:[#allocation19_spill] sm:$0xff]  ;;  %v9416_v37 = vld [vmem:[#allocation37_spill] sm:$0xff]  ;;  %v2012_v12 = vmul.f32 %v6540_v58, %v4162_v8 }
 0x1db   :  { %9395 = vst [vmem:[#allocation17_spill] sm:$0xff] %v6516_v11  ;;  %9398 = vst [vmem:[#allocation18_spill] sm:$0xff] %v6520_v18  ;;  %v6558_v48 = vadd.f32 %v1877_v7, %v9414_v54  ;;  %v6561_v61 = vadd.f32 %v1884_v34, %v9416_v37  ;;  %v9418_v5 = vld [vmem:[#allocation20_spill] sm:$0xff]  ;;  %v4164_v50 = vld [vmem:[%s9066_s0 + $0x148] sm:$0x7f]  ;;  %v2009_v34 = vmul.f32 %v6535_v53, %v4159_v24 }
 0x1dc   :  { %9401 = vst [vmem:[#allocation28_spill] sm:$0xff] %v6524_v16  ;;  %9403 = vst [vmem:[#allocation30_spill] sm:$0xff] %v6527_v38  ;;  %v6564_v39 = vadd.f32 %v1891_v32, %v9418_v5  ;;  %v4163_v6 = vld [vmem:[%s9066_s0 + $0x140] sm:$0x7f]  ;;  %v4165_v47 = vld [vmem:[%s9066_s0 + $0x1b0] sm:$0x7f]  ;;  %v2010_v32 = vmul.f32 %v6540_v58, %v4160_v14  ;;  %v2014_v21 = vmul.f32 %v6540_v58, %v4164_v50 }
 0x1dd   :  { %9405 = vst [vmem:[#allocation29_spill] sm:$0xff] %v6543_v46  ;;  %9407 = vst [vmem:[#allocation32_spill] sm:$0xff] %v6546_v55  ;;  %v4166_v15 = vld [vmem:[%s9066_s0 + $0x1b8] sm:$0x7f]  ;;  %v4167_v7 = vld [vmem:[%s9066_s0 + $0x220] sm:$0x7f]  ;;  %v2015_v36 = vmul.f32 %v6535_v53, %v4165_v47 }
 0x1de   :  { %9409 = vst [vmem:[#allocation31_spill] sm:$0xff] %v6549_v30  ;;  %9411 = vst [vmem:[#allocation34_spill] sm:$0xff] %v6552_v4  ;;  %v9420_v62 = vld [vmem:[#allocation21_spill] sm:$0xff]  ;;  %v9422_v60 = vld [vmem:[#allocation22_spill] sm:$0xff]  ;;  %v2016_v54 = vmul.f32 %v6540_v58, %v4166_v15  ;;  %v6635_v37 = vmul.f32 %v6535_v53, %v4167_v7 }
 0x1df   :  { %9413 = vst [vmem:[#allocation33_spill] sm:$0xff] %v6555_v17  ;;  %9415 = vst [vmem:[#allocation36_spill] sm:$0xff] %v6558_v48  ;;  %v6586_v23 = vadd.f32 %v1898_v63, %v9420_v62  ;;  %v6589_v1 = vadd.f32 %v1905_v43, %v9422_v60  ;;  %v9424_v42 = vld [vmem:[#allocation23_spill] sm:$0xff]  ;;  %v9426_v20 = vld [vmem:[#allocation24_spill] sm:$0xff]  ;;  %v2048_v62 = vsel %vm96_vm0, %v2010_v32, 0.0  ;;  %v2055_v60 = vsel %vm96_vm0, %v2011_v56, 0.0 }
 0x1e0   :  { %9417 = vst [vmem:[#allocation35_spill] sm:$0xff] %v6561_v61  ;;  %9419 = vst [vmem:[#allocation19_spill] sm:$0xff] %v6564_v39  ;;  %v6592_v57 = vadd.f32 %v1912_v44, %v9424_v42  ;;  %v6595_v22 = vadd.f32 %v1919_v9, %v9426_v20  ;;  %v4168_v24 = vld [vmem:[%s9066_s0 + $0x228] sm:$0x7f]  ;;  %v9432_v63 = vld [vmem:[#allocation27_spill] sm:$0xff]  ;;  %v2062_v42 = vsel %vm96_vm0, %v2012_v12, 0.0 }
 0x1e1   :  { %9421 = vst [vmem:[#allocation37_spill] sm:$0xff] %v6586_v23  ;;  %9423 = vst [vmem:[#allocation20_spill] sm:$0xff] %v6589_v1  ;;  %v9428_v59 = vld [vmem:[#allocation25_spill] sm:$0xff]  ;;  %v9430_v8 = vld [vmem:[#allocation26_spill] sm:$0xff]  ;;  %v6607_v41 = vadd.f32 %v1940_v51, %v9432_v63  ;;  %v2018_v7 = vmul.f32 %v6540_v58, %v4168_v24  ;;  %v2076_v61 = vsel %vm96_vm0, %v2014_v21, 0.0  ;;  %v2083_v48 = vsel %vm96_vm0, %v2015_v36, 0.0 }
 0x1e2   :  { %9425 = vst [vmem:[#allocation21_spill] sm:$0xff] %v6592_v57  ;;  %9427 = vst [vmem:[#allocation22_spill] sm:$0xff] %v6595_v22  ;;  %v6601_v25 = vadd.f32 %v1926_v29, %v9428_v59  ;;  %v6604_v14 = vadd.f32 %v1933_v52, %v9430_v8  ;;  %v4169_v43 = vld [vmem:[%s9066_s0 + $0x290] sm:$0x7f]  ;;  %v4170_v44 = vld [vmem:[%s9066_s0 + $0x298] sm:$0x7f]  ;;  %v2013_v29 = vmul.f32 %v6535_v53, %v4163_v6 }
 0x1e3   :  { %9433 = vst [vmem:[#allocation25_spill] sm:$0xff] %v6607_v41  ;;  %v4171_v9 = vld [vmem:[%s9066_s0 + $0x300] sm:$0x7f]  ;;  %v4172_v52 = vld [vmem:[%s9066_s0 + $0x308] sm:$0x7f]  ;;  %v2041_v6 = vsel %vm96_vm0, %v2009_v34, 0.0  ;;  %v2019_v34 = vmul.f32 %v6535_v53, %v4169_v43  ;;  %v2020_v32 = vmul.f32 %v6540_v58, %v4170_v44 }
 0x1e4   :  { %9429 = vst [vmem:[#allocation23_spill] sm:$0xff] %v6601_v25  ;;  %9431 = vst [vmem:[#allocation24_spill] sm:$0xff] %v6604_v14  ;;  %v4173_v51 = vld [vmem:[%s9066_s0 + $0x370] sm:$0x7f]  ;;  %v4174_v19 = vld [vmem:[%s9066_s0 + $0x378] sm:$0x7f]  ;;  %v6657_v56 = vmul.f32 %v6535_v53, %v4171_v9  ;;  %v2022_v59 = vmul.f32 %v6540_v58, %v4172_v52 }
 0x1e5   :  { %v4177_v49 = vld [vmem:[%s9066_s0 + $0x450] sm:$0x7f]  ;;  %v4178_v5 = vld [vmem:[%s9066_s0 + $0x458] sm:$0x7f]  ;;  %v4175_v50 = vld [vmem:[%s9066_s0 + $0x3e0] sm:$0x7f]  ;;  %v2023_v8 = vmul.f32 %v6535_v53, %v4173_v51  ;;  %v2024_v24 = vmul.f32 %v6540_v58, %v4174_v19 }
 0x1e6   :  { %v4176_v47 = vld [vmem:[%s9066_s0 + $0x3e8] sm:$0x7f]  ;;  %v4179_v15 = vld [vmem:[%s9066_s0 + $0x4c0] sm:$0x7f]  ;;  %v4181_v20 = vld [vmem:[%s9066_s0 + $0x530] sm:$0x7f]  ;;  %v6679_v51 = vmul.f32 %v6535_v53, %v4175_v50  ;;  %v6685_v19 = vmul.f32 %v6535_v53, %v4177_v49  ;;  %v6688_v22 = vmul.f32 %v6540_v58, %v4178_v5 }
 0x1e7   :  { %v4180_v12 = vld [vmem:[%s9066_s0 + $0x4c8] sm:$0x7f]  ;;  %v2069_v63 = vsel %vm96_vm0, %v2013_v29, 0.0  ;;  %v4182_v43 = vld [vmem:[%s9066_s0 + $0x538] sm:$0x7f]  ;;  %v2042_v44 = vrot.slane %v2041_v6, 4  ;;  %v6682_v29 = vmul.f32 %v6540_v58, %v4176_v47  ;;  %v6697_v50 = vmul.f32 %v6535_v53, %v4179_v15 }
 0x1e8   :  { %v2049_v9 = vrot.slane %v2048_v62, 4  ;;  %v2056_v41 = vrot.slane %v2055_v60, 4  ;;  %v2063_v14 = vrot.slane %v2062_v42, 4  ;;  %v4183_v25 = vld [vmem:[%s9066_s0 + $0x5a0] sm:$0x7f]  ;;  %v6700_v47 = vmul.f32 %v6540_v58, %v4180_v12 }
 0x1e9   :  { %v4184_v52 = vld [vmem:[%s9066_s0 + $0x5a8] sm:$0x7f]  ;;  %v4185_v57 = vld [vmem:[%s9066_s0 + $0x610] sm:$0x7f]  ;;  %v4186_v1 = vld [vmem:[%s9066_s0 + $0x618] sm:$0x7f]  ;;  %v6703_v49 = vmul.f32 %v6535_v53, %v4181_v20  ;;  %v6709_v39 = vmul.f32 %v6540_v58, %v4182_v43  ;;  %v2043_v43 = vadd.f32 %v2042_v44, %v2041_v6  ;;  %v6724_v36 = vmul.f32 %v6535_v53, %v4183_v25 }
 0x1ea   :  { %v2070_v23 = vrot.slane %v2069_v63, 4  ;;  %v4187_v5 = vld [vmem:[%s9066_s0 + $0x680] sm:$0x7f]  ;;  %v2090_v15 = vsel %vm96_vm0, %v2016_v54, 0.0  ;;  %v4188_v12 = vld [vmem:[%s9066_s0 + $0x688] sm:$0x7f]  ;;  %v2050_v4 = vadd.f32 %v2049_v9, %v2048_v62  ;;  %v2057_v30 = vadd.f32 %v2056_v41, %v2055_v60 }
 0x1eb   :  { %v4189_v20 = vld [vmem:[%s9066_s0 + $0x6f0] sm:$0x7f]  ;;  %v4190_v17 = vld [vmem:[%s9066_s0 + $0x6f8] sm:$0x7f]  ;;  %v2064_v21 = vadd.f32 %v2063_v14, %v2062_v42  ;;  %v6727_v54 = vmul.f32 %v6540_v58, %v4184_v52  ;;  %v6730_v55 = vmul.f32 %v6535_v53, %v4185_v57  ;;  %v6733_v46 = vmul.f32 %v6540_v58, %v4186_v1 }
 0x1ec   :  { %v2071_v38 = vadd.f32 %v2070_v23, %v2069_v63  ;;  %v2077_v16 = vrot.slane %v2076_v61, 4  ;;  %v2084_v18 = vrot.slane %v2083_v48, 4  ;;  %v2091_v11 = vrot.slane %v2090_v15, 4 }
 0x1ed   :  { %v6736_v6 = vmul.f32 %v6535_v53, %v4187_v5  ;;  %v6739_v14 = vmul.f32 %v6540_v58, %v4188_v12  ;;  %v6742_v25 = vmul.f32 %v6535_v53, %v4189_v20  ;;  %v6745_v41 = vmul.f32 %v6540_v58, %v4190_v17 }
 0x1ee   :  { %v2044_v57 = vrot.slane %v2043_v43, 2  ;;  %v2051_v62 = vrot.slane %v2050_v4, 2  ;;  %v2058_v1 = vrot.slane %v2057_v30, 2  ;;  %v2065_v60 = vrot.slane %v2064_v21, 2 }
 0x1ef   :  { %v2097_v23 = vsel %vm96_vm0, %v6635_v37, 0.0  ;;  %v2104_v42 = vsel %vm96_vm0, %v2018_v7, 0.0  ;;  %v2111_v63 = vsel %vm96_vm0, %v2019_v34, 0.0  ;;  %v2118_v44 = vsel %vm96_vm0, %v2020_v32, 0.0 }
 0x1f0   :  { %v2072_v9 = vrot.slane %v2071_v38, 2  ;;  %v2078_v52 = vadd.f32 %v2077_v16, %v2076_v61  ;;  %v2085_v53 = vadd.f32 %v2084_v18, %v2083_v48  ;;  %v2092_v5 = vadd.f32 %v2091_v11, %v2090_v15 }
 0x1f1   :  { %v2098_v12 = vrot.slane %v2097_v23, 4  ;;  %v2105_v58 = vrot.slane %v2104_v42, 4  ;;  %v2112_v17 = vrot.slane %v2111_v63, 4  ;;  %v2119_v20 = vrot.slane %v2118_v44, 4 }
 0x1f2   :  { %v2125_v13 = vsel %vm96_vm0, %v6657_v56, 0.0  ;;  %v2132_v0 = vsel %vm96_vm0, %v2022_v59, 0.0  ;;  %v2139_v37 = vsel %vm96_vm0, %v2023_v8, 0.0  ;;  %v2146_v7 = vsel %vm96_vm0, %v2024_v24, 0.0 }
 0x1f3   :  { %v2045_v34 = vadd.f32 %v2044_v57, %v2043_v43  ;;  %v2052_v2 = vadd.f32 %v2051_v62, %v2050_v4  ;;  %v2059_v32 = vadd.f32 %v2058_v1, %v2057_v30  ;;  %v2066_v45 = vadd.f32 %v2065_v60, %v2064_v21 }
 0x1f4   :  { %v2079_v16 = vrot.slane %v2078_v52, 2  ;;  %v2126_v18 = vrot.slane %v2125_v13, 4  ;;  %v2133_v11 = vrot.slane %v2132_v0, 4  ;;  %v2140_v48 = vrot.slane %v2139_v37, 4 }
 0x1f5   :  { %v2073_v61 = vadd.f32 %v2072_v9, %v2071_v38  ;;  %v2086_v15 = vrot.slane %v2085_v53, 2  ;;  %v2093_v40 = vrot.slane %v2092_v5, 2  ;;  %v2147_v28 = vrot.slane %v2146_v7, 4 }
 0x1f6   :  { %v2099_v10 = vadd.f32 %v2098_v12, %v2097_v23  ;;  %v2106_v56 = vadd.f32 %v2105_v58, %v2104_v42  ;;  %v2113_v27 = vadd.f32 %v2112_v17, %v2111_v63  ;;  %v2120_v59 = vadd.f32 %v2119_v20, %v2118_v44 }
 0x1f7   :  { %v2046_v35 = vrot.slane %v2045_v34, 1  ;;  %v2053_v8 = vrot.slane %v2052_v2, 1  ;;  %v2060_v3 = vrot.slane %v2059_v32, 1  ;;  %v2067_v24 = vrot.slane %v2066_v45, 1 }
 0x1f8   :  { %v2080_v43 = vadd.f32 %v2079_v16, %v2078_v52  ;;  %v2127_v4 = vadd.f32 %v2126_v18, %v2125_v13  ;;  %v2134_v30 = vadd.f32 %v2133_v11, %v2132_v0  ;;  %v2141_v21 = vadd.f32 %v2140_v48, %v2139_v37 }
 0x1f9   :  { %v2074_v57 = vrot.slane %v2073_v61, 1  ;;  %v2087_v62 = vadd.f32 %v2086_v15, %v2085_v53  ;;  %v2094_v1 = vadd.f32 %v2093_v40, %v2092_v5  ;;  %v2148_v60 = vadd.f32 %v2147_v28, %v2146_v7 }
 0x1fa   :  { %v2100_v38 = vrot.slane %v2099_v10, 2  ;;  %v2107_v9 = vrot.slane %v2106_v56, 2  ;;  %v2114_v31 = vrot.slane %v2113_v27, 2  ;;  %v2121_v33 = vrot.slane %v2120_v59, 2 }
 0x1fb   :  { %v6757_v23 = vadd.f32 %v2046_v35, %v2045_v34  ;;  %v6759_v42 = vadd.f32 %v2053_v8, %v2052_v2  ;;  %v6761_v63 = vadd.f32 %v2060_v3, %v2059_v32  ;;  %v6763_v44 = vadd.f32 %v2067_v24, %v2066_v45 }
 0x1fc   :  { %v2081_v52 = vrot.slane %v2080_v43, 1  ;;  %v2128_v13 = vrot.slane %v2127_v4, 2  ;;  %v2135_v0 = vrot.slane %v2134_v30, 2  ;;  %v2142_v12 = vrot.slane %v2141_v21, 2 }
 0x1fd   :  { %v6765_v58 = vadd.f32 %v2074_v57, %v2073_v61  ;;  %v2088_v40 = vrot.slane %v2087_v62, 1  ;;  %v2095_v28 = vrot.slane %v2094_v1, 1  ;;  %v2149_v53 = vrot.slane %v2148_v60, 2 }
 0x1fe   :  { %v2101_v5 = vadd.f32 %v2100_v38, %v2099_v10  ;;  %v2108_v17 = vadd.f32 %v2107_v9, %v2106_v56  ;;  %v2115_v20 = vadd.f32 %v2114_v31, %v2113_v27  ;;  %v2122_v35 = vadd.f32 %v2121_v33, %v2120_v59 }
 0x1ff   :  { %v2153_v2 = vsel %vm96_vm0, %v6679_v51, 0.0  ;;  %v2160_v3 = vsel %vm96_vm0, %v6682_v29, 0.0  ;;  %v2167_v45 = vsel %vm96_vm0, %v6685_v19, 0.0  ;;  %v2174_v37 = vsel %vm96_vm0, %v6688_v22, 0.0 }
 0x200   :  { %v6775_v7 = vadd.f32 %v2081_v52, %v2080_v43  ;;  %v2129_v34 = vadd.f32 %v2128_v13, %v2127_v4  ;;  %v2136_v32 = vadd.f32 %v2135_v0, %v2134_v30  ;;  %v2143_v10 = vadd.f32 %v2142_v12, %v2141_v21 }
 0x201   :  { %v6777_v16 = vadd.f32 %v2088_v40, %v2087_v62  ;;  %v6779_v33 = vadd.f32 %v2095_v28, %v2094_v1  ;;  %v2150_v31 = vadd.f32 %v2149_v53, %v2148_v60  ;;  %v2181_v27 = vsel %vm96_vm0, %v6697_v50, 0.0 }
 0x202   :  { %v2154_v51 = vrot.slane %v2153_v2, 4  ;;  %v2161_v29 = vrot.slane %v2160_v3, 4  ;;  %v2168_v18 = vrot.slane %v2167_v45, 4  ;;  %v2175_v19 = vrot.slane %v2174_v37, 4 }
 0x203   :  { %v2102_v11 = vrot.slane %v2101_v5, 1  ;;  %v2109_v48 = vrot.slane %v2108_v17, 1  ;;  %v2116_v22 = vrot.slane %v2115_v20, 1  ;;  %v2123_v61 = vrot.slane %v2122_v35, 1 }
 0x204   :  { %v2130_v15 = vrot.slane %v2129_v34, 1  ;;  %v2137_v56 = vrot.slane %v2136_v32, 1  ;;  %v2144_v59 = vrot.slane %v2143_v10, 1  ;;  %v2182_v8 = vrot.slane %v2181_v27, 4 }
 0x205   :  { %v2151_v24 = vrot.slane %v2150_v31, 1  ;;  %v2188_v43 = vsel %vm96_vm0, %v6700_v47, 0.0  ;;  %v2195_v4 = vsel %vm96_vm0, %v6703_v49, 0.0  ;;  %v2202_v50 = vsel %vm96_vm0, %v6709_v39, 0.0 }
 0x206   :  { %v2155_v30 = vadd.f32 %v2154_v51, %v2153_v2  ;;  %v2162_v21 = vadd.f32 %v2161_v29, %v2160_v3  ;;  %v2169_v57 = vadd.f32 %v2168_v18, %v2167_v45  ;;  %v2176_v62 = vadd.f32 %v2175_v19, %v2174_v37 }
 0x207   :  { %v6789_v1 = vadd.f32 %v2102_v11, %v2101_v5  ;;  %v6791_v60 = vadd.f32 %v2109_v48, %v2108_v17  ;;  %v6793_v38 = vadd.f32 %v2116_v22, %v2115_v20  ;;  %v6795_v9 = vadd.f32 %v2123_v61, %v2122_v35 }
 0x208   :  { %v2183_v52 = vadd.f32 %v2182_v8, %v2181_v27  ;;  %v2189_v47 = vrot.slane %v2188_v43, 4  ;;  %v2196_v13 = vrot.slane %v2195_v4, 4  ;;  %v2203_v0 = vrot.slane %v2202_v50, 4 }
 0x209   :  { %v6797_v49 = vadd.f32 %v2130_v15, %v2129_v34  ;;  %v6799_v12 = vadd.f32 %v2137_v56, %v2136_v32  ;;  %v6801_v39 = vadd.f32 %v2144_v59, %v2143_v10  ;;  %v6803_v40 = vadd.f32 %v2151_v24, %v2150_v31 }
 0x20a   :  { %v2156_v28 = vrot.slane %v2155_v30, 2  ;;  %v2163_v53 = vrot.slane %v2162_v21, 2  ;;  %v2170_v5 = vrot.slane %v2169_v57, 2  ;;  %v2177_v17 = vrot.slane %v2176_v62, 2 }
 0x20b   :  { %9434 = vst [vmem:[#allocation26_spill] sm:$0xff] %v6801_v39  ;;  %9435 = vst [vmem:[#allocation27_spill] sm:$0xff] %v6803_v40  ;;  %v2209_v20 = vsel %vm96_vm0, %v6724_v36, 0.0  ;;  %v2216_v35 = vsel %vm96_vm0, %v6727_v54, 0.0  ;;  %v2223_v2 = vsel %vm96_vm0, %v6730_v55, 0.0  ;;  %v2230_v3 = vsel %vm96_vm0, %v6733_v46, 0.0 }
 0x20c   :  { %v2184_v45 = vrot.slane %v2183_v52, 2  ;;  %v2190_v37 = vadd.f32 %v2189_v47, %v2188_v43  ;;  %v2197_v34 = vadd.f32 %v2196_v13, %v2195_v4  ;;  %v2204_v32 = vadd.f32 %v2203_v0, %v2202_v50 }
 0x20d   :  { %v2210_v10 = vrot.slane %v2209_v20, 4  ;;  %v2217_v31 = vrot.slane %v2216_v35, 4  ;;  %v2224_v27 = vrot.slane %v2223_v2, 4  ;;  %v2231_v51 = vrot.slane %v2230_v3, 4 }
 0x20e   :  { %v2237_v36 = vsel %vm96_vm0, %v6736_v6, 0.0  ;;  %v2244_v54 = vsel %vm96_vm0, %v6739_v14, 0.0  ;;  %v2251_v55 = vsel %vm96_vm0, %v6742_v25, 0.0  ;;  %v2258_v46 = vsel %vm96_vm0, %v6745_v41, 0.0 }
 0x20f   :  { %v2211_v29 = vadd.f32 %v2210_v10, %v2209_v20  ;;  %v2218_v18 = vadd.f32 %v2217_v31, %v2216_v35  ;;  %v2225_v19 = vadd.f32 %v2224_v27, %v2223_v2  ;;  %v2232_v11 = vadd.f32 %v2231_v51, %v2230_v3 }
 0x210   :  { %v2238_v48 = vrot.slane %v2237_v36, 4  ;;  %v2245_v22 = vrot.slane %v2244_v54, 4  ;;  %v2252_v61 = vrot.slane %v2251_v55, 4  ;;  %v2259_v15 = vrot.slane %v2258_v46, 4 }
 0x211   :  { %v2191_v56 = vrot.slane %v2190_v37, 2  ;;  %v2198_v59 = vrot.slane %v2197_v34, 2  ;;  %v2205_v6 = vrot.slane %v2204_v32, 2  ;;  %v2212_v8 = vrot.slane %v2211_v29, 2 }
 0x212   :  { %v2239_v24 = vadd.f32 %v2238_v48, %v2237_v36  ;;  %v2246_v14 = vadd.f32 %v2245_v22, %v2244_v54  ;;  %v2253_v43 = vadd.f32 %v2252_v61, %v2251_v55  ;;  %v2260_v4 = vadd.f32 %v2259_v15, %v2258_v46 }
 0x213   :  { %v2157_v25 = vadd.f32 %v2156_v28, %v2155_v30  ;;  %v2219_v50 = vrot.slane %v2218_v18, 2  ;;  %v2226_v47 = vrot.slane %v2225_v19, 2  ;;  %v2233_v41 = vrot.slane %v2232_v11, 2 }
 0x214   :  { %v2164_v13 = vadd.f32 %v2163_v53, %v2162_v21  ;;  %v2171_v0 = vadd.f32 %v2170_v5, %v2169_v57  ;;  %v2178_v20 = vadd.f32 %v2177_v17, %v2176_v62  ;;  %v2240_v35 = vrot.slane %v2239_v24, 2 }
 0x215   :  { %v2185_v2 = vadd.f32 %v2184_v45, %v2183_v52  ;;  %v2247_v3 = vrot.slane %v2246_v14, 2  ;;  %v2254_v10 = vrot.slane %v2253_v43, 2  ;;  %v2261_v31 = vrot.slane %v2260_v4, 2 }
 0x216   :  { %v2192_v27 = vadd.f32 %v2191_v56, %v2190_v37  ;;  %v2199_v51 = vadd.f32 %v2198_v59, %v2197_v34  ;;  %v2206_v40 = vadd.f32 %v2205_v6, %v2204_v32  ;;  %v2213_v39 = vadd.f32 %v2212_v8, %v2211_v29 }
 0x217   :  { %v2158_v36 = vrot.slane %v2157_v25, 1  ;;  %v2220_v54 = vadd.f32 %v2219_v50, %v2218_v18  ;;  %v2227_v55 = vadd.f32 %v2226_v47, %v2225_v19  ;;  %v2234_v46 = vadd.f32 %v2233_v41, %v2232_v11 }
 0x218   :  { %v2165_v30 = vrot.slane %v2164_v13, 1  ;;  %v2172_v28 = vrot.slane %v2171_v0, 1  ;;  %v2179_v48 = vrot.slane %v2178_v20, 1  ;;  %v2241_v22 = vadd.f32 %v2240_v35, %v2239_v24  ;;  %v9436_v35 = vld [vmem:[#allocation5_spill] sm:$0xff] }
 0x219   :  { %v2186_v21 = vrot.slane %v2185_v2, 1  ;;  %v2248_v57 = vadd.f32 %v2247_v3, %v2246_v14  ;;  %v2255_v62 = vadd.f32 %v2254_v10, %v2253_v43  ;;  %v2262_v53 = vadd.f32 %v2261_v31, %v2260_v4 }
 0x21a   :  { %v2193_v52 = vrot.slane %v2192_v27, 1  ;;  %v2200_v5 = vrot.slane %v2199_v51, 1  ;;  %v2207_v17 = vrot.slane %v2206_v40, 1  ;;  %v2214_v45 = vrot.slane %v2213_v39, 1 }
 0x21b   :  { %v2159_v37 = vadd.f32 %v2158_v36, %v2157_v25  ;;  %v2221_v34 = vrot.slane %v2220_v54, 1  ;;  %v2228_v32 = vrot.slane %v2227_v55, 1  ;;  %v2235_v29 = vrot.slane %v2234_v46, 1 }
 0x21c   :  { %v2166_v61 = vadd.f32 %v2165_v30, %v2164_v13  ;;  %v2173_v18 = vadd.f32 %v2172_v28, %v2171_v0  ;;  %v2180_v19 = vadd.f32 %v2179_v48, %v2178_v20  ;;  %v2242_v11 = vrot.slane %v2241_v22, 1  ;;  %v9437_v0 = vld [vmem:[#allocation6_spill] sm:$0xff] }
 0x21d   :  { %v2187_v15 = vadd.f32 %v2186_v21, %v2185_v2  ;;  %v2249_v56 = vrot.slane %v2248_v57, 1  ;;  %v2256_v59 = vrot.slane %v2255_v62, 1  ;;  %v2263_v6 = vrot.slane %v2262_v53, 1  ;;  %v9438_v2 = vld [vmem:[#allocation7_spill] sm:$0xff]  ;;  %v9445_v28 = vld [vmem:[#allocation14_spill] sm:$0xff] }
 0x21e   :  { %v2194_v8 = vadd.f32 %v2193_v52, %v2192_v27  ;;  %v2201_v24 = vadd.f32 %v2200_v5, %v2199_v51  ;;  %v2208_v14 = vadd.f32 %v2207_v17, %v2206_v40  ;;  %v2215_v43 = vadd.f32 %v2214_v45, %v2213_v39  ;;  %v9439_v39 = vld [vmem:[#allocation8_spill] sm:$0xff]  ;;  %v9440_v51 = vld [vmem:[#allocation9_spill] sm:$0xff]  ;;  %v9453_v17 = vld [vmem:[#allocation30_spill] sm:$0xff] }
 0x21f   :  { %v2222_v4 = vadd.f32 %v2221_v34, %v2220_v54  ;;  %v2229_v50 = vadd.f32 %v2228_v32, %v2227_v55  ;;  %v2236_v47 = vadd.f32 %v2235_v29, %v2234_v46  ;;  %v2265_v25 = vadd.f32 %v6757_v23, %v6455_v26  ;;  %v9441_v26 = vld [vmem:[#allocation10_spill] sm:$0xff]  ;;  %v9442_v54 = vld [vmem:[#allocation11_spill] sm:$0xff]  ;;  %v9451_v52 = vld [vmem:[#allocation28_spill] sm:$0xff] }
 0x220   :  { %v2243_v41 = vadd.f32 %v2242_v11, %v2241_v22  ;;  %v2266_v13 = vadd.f32 %v6759_v42, %v9436_v35  ;;  %v2267_v20 = vadd.f32 %v6761_v63, %v9437_v0  ;;  %v2268_v3 = vadd.f32 %v6763_v44, %v9438_v2  ;;  %v9443_v63 = vld [vmem:[#allocation12_spill] sm:$0xff]  ;;  %v9444_v44 = vld [vmem:[#allocation13_spill] sm:$0xff]  ;;  %v9457_v11 = vld [vmem:[#allocation34_spill] sm:$0xff] }
 0x221   :  { %v2250_v10 = vadd.f32 %v2249_v56, %v2248_v57  ;;  %v2257_v31 = vadd.f32 %v2256_v59, %v2255_v62  ;;  %v2264_v40 = vadd.f32 %v2263_v6, %v2262_v53  ;;  %v2269_v27 = vadd.f32 %v6765_v58, %v9439_v39  ;;  %v9446_v58 = vld [vmem:[#allocation15_spill] sm:$0xff]  ;;  %v9450_v62 = vld [vmem:[#allocation26_spill] sm:$0xff]  ;;  %v9454_v45 = vld [vmem:[#allocation29_spill] sm:$0xff] }
 0x222   :  { %v2270_v36 = vadd.f32 %v6775_v7, %v9440_v51  ;;  %v2271_v23 = vadd.f32 %v6777_v16, %v9441_v26  ;;  %v2272_v42 = vadd.f32 %v6779_v33, %v9442_v54  ;;  %v2299_v55 = vlaneseq  ;;  %v9447_v7 = vld [vmem:[#allocation16_spill] sm:$0xff]  ;;  %v9448_v16 = vld [vmem:[#allocation17_spill] sm:$0xff]  ;;  %v9449_v33 = vld [vmem:[#allocation18_spill] sm:$0xff] }
 0x223   :  { %v2273_v46 = vadd.f32 %v6789_v1, %v9443_v63  ;;  %v2274_v30 = vadd.f32 %v6791_v60, %v9444_v44  ;;  %v2275_v48 = vadd.f32 %v6793_v38, %v9445_v28  ;;  %v2276_v22 = vadd.f32 %v6795_v9, %v9446_v58  ;;  %v9452_v60 = vld [vmem:[#allocation27_spill] sm:$0xff]  ;;  %v9455_v9 = vld [vmem:[#allocation32_spill] sm:$0xff]  ;;  %v9458_v35 = vld [vmem:[#allocation33_spill] sm:$0xff] }
 0x224   :  { %v2277_v21 = vadd.f32 %v6797_v49, %v9447_v7  ;;  %v2278_v57 = vadd.f32 %v6799_v12, %v9448_v16  ;;  %v2279_v53 = vadd.f32 %v9450_v62, %v9449_v33  ;;  %v6852_v1 = vshrl.u32 %v2299_v55, 7  ;;  %v2297_v49 = vld [vmem:[%s9068_s2] sm:$0x3]  ;;  %v9456_v12 = vld [vmem:[#allocation31_spill] sm:$0xff]  ;;  %v9462_v26 = vld [vmem:[#allocation37_spill] sm:$0xff] }
 0x225   :  { %v2280_v5 = vadd.f32 %v9452_v60, %v9451_v52  ;;  %v2281_v38 = vadd.f32 %v2159_v37, %v9453_v17  ;;  %v2282_v34 = vadd.f32 %v2166_v61, %v9454_v45  ;;  %v2283_v32 = vadd.f32 %v2173_v18, %v9455_v9  ;;  %v9459_v0 = vld [vmem:[#allocation36_spill] sm:$0xff]  ;;  %v9460_v2 = vld [vmem:[#allocation35_spill] sm:$0xff]  ;;  %v9464_v28 = vld [vmem:[#allocation21_spill] sm:$0xff] }
 0x226   :  { %v2284_v29 = vadd.f32 %v2180_v19, %v9456_v12  ;;  %v2285_v56 = vadd.f32 %v2187_v15, %v9457_v11  ;;  %v6865_v59 = vsub.s32 0, %v6852_v1  ;;  %v6868_v6 = vsub.s32 1, %v6852_v1  ;;  %v9461_v39 = vld [vmem:[#allocation19_spill] sm:$0xff]  ;;  %v9463_v63 = vld [vmem:[#allocation20_spill] sm:$0xff]  ;;  %v9465_v7 = vld [vmem:[#allocation22_spill] sm:$0xff] }
 0x227   :  { %v2286_v37 = vadd.f32 %v2194_v8, %v9458_v35  ;;  %v2287_v61 = vadd.f32 %v2201_v24, %v9459_v0  ;;  %v2288_v18 = vadd.f32 %v2208_v14, %v9460_v2  ;;  %v2289_v51 = vadd.f32 %v2215_v43, %v9461_v39  ;;  %v9466_v8 = vld [vmem:[#allocation23_spill] sm:$0xff]  ;;  %v9467_v24 = vld [vmem:[#allocation24_spill] sm:$0xff]  ;;  %v9468_v14 = vld [vmem:[#allocation25_spill] sm:$0xff] }
 0x228   :  { %v2290_v54 = vadd.f32 %v2222_v4, %v9462_v26  ;;  %v2291_v19 = vadd.f32 %v2229_v50, %v9463_v63  ;;  %v2302_v15 = vrot.slane %v2297_v49, %v6865_v59  ;;  %v6878_v44 = vrot.slane %v2297_v49, %v6868_v6 }
 0x229   :  { %v2292_v58 = vadd.f32 %v2236_v47, %v9464_v28  ;;  %v2293_v16 = vadd.f32 %v2243_v41, %v9465_v7  ;;  %v2294_v33 = vadd.f32 %v2250_v10, %v9466_v8  ;;  %v2295_v62 = vadd.f32 %v2257_v31, %v9467_v24 }
 0x22a   :  { %v6885_v52 = vadd.f32 %v2264_v40, %v9468_v14  ;;  %v6887_v43 = vadd.f32 %v2302_v15, %v2265_v25  ;;  %v6890_v4 = vadd.f32 %v6878_v44, %v2266_v13  ;;  %v6892_v50 = vadd.f32 %v2302_v15, %v2267_v20 }
 0x22b   :  { %v6895_v47 = vadd.f32 %v6878_v44, %v2268_v3  ;;  %v6897_v41 = vadd.f32 %v2302_v15, %v2269_v27  ;;  %v6900_v10 = vadd.f32 %v6878_v44, %v2270_v36  ;;  %v6902_v31 = vadd.f32 %v2302_v15, %v2271_v23 }
 0x22c   :  { %v6905_v25 = vadd.f32 %v6878_v44, %v2272_v42  ;;  %v6907_v40 = vadd.f32 %v2302_v15, %v2273_v46  ;;  %v6910_v13 = vadd.f32 %v6878_v44, %v2274_v30  ;;  %v6912_v20 = vadd.f32 %v2302_v15, %v2275_v48 }
 0x22d   :  { %v6915_v3 = vadd.f32 %v6878_v44, %v2276_v22  ;;  %v6917_v27 = vadd.f32 %v2302_v15, %v2277_v21  ;;  %v6920_v36 = vadd.f32 %v6878_v44, %v2278_v57  ;;  %v6922_v23 = vadd.f32 %v2302_v15, %v2279_v53 }
 0x22e   :  { %v6925_v42 = vadd.f32 %v6878_v44, %v2280_v5  ;;  %v6927_v46 = vadd.f32 %v2302_v15, %v2281_v38  ;;  %v6930_v30 = vadd.f32 %v6878_v44, %v2282_v34  ;;  %v6932_v48 = vadd.f32 %v2302_v15, %v2283_v32 }
 0x22f   :  { %v6935_v22 = vadd.f32 %v6878_v44, %v2284_v29  ;;  %v6937_v21 = vadd.f32 %v2302_v15, %v2285_v56  ;;  %v6940_v57 = vadd.f32 %v6878_v44, %v2286_v37  ;;  %v6942_v53 = vadd.f32 %v2302_v15, %v2287_v61 }
 0x230   :  { %v6945_v60 = vadd.f32 %v6878_v44, %v2288_v18  ;;  %v6947_v5 = vadd.f32 %v2302_v15, %v2289_v51  ;;  %v6950_v17 = vadd.f32 %v6878_v44, %v2290_v54  ;;  %v6952_v38 = vadd.f32 %v2302_v15, %v2291_v19 }
 0x231   :  { %v6955_v45 = vadd.f32 %v6878_v44, %v2292_v58  ;;  %v6957_v34 = vadd.f32 %v2302_v15, %v2293_v16  ;;  %v6960_v9 = vadd.f32 %v6878_v44, %v2294_v33  ;;  %v2373_v32 = vrot.slane %v6892_v50, 7 }
 0x232   :  { %v2376_v49 = vrot.slane %v6897_v41, 6  ;;  %v2379_v12 = vrot.slane %v6902_v31, 5  ;;  %v6965_v29 = vadd.f32 %v2302_v15, %v2295_v62  ;;  %v2382_v11 = vrot.slane %v6907_v40, 4 }
 0x233   :  { %v2385_v56 = vrot.slane %v6912_v20, 3  ;;  %v2394_v35 = vrot.slane %v6895_v47, 7  ;;  %v2375_v37 = vsel %vm2374_vm1, %v2373_v32, %v6887_v43  ;;  %v2396_v0 = vrot.slane %v6900_v10, 6 }
 0x234   :  { %v2398_v61 = vrot.slane %v6905_v25, 5  ;;  %v2400_v2 = vrot.slane %v6910_v13, 4  ;;  %v2378_v18 = vsel %vm2377_vm2, %v2376_v49, %v2375_v37  ;;  %v2388_v39 = vrot.slane %v6917_v27, 2 }
 0x235   :  { %v2391_v51 = vrot.slane %v6922_v23, 1  ;;  %v2395_v26 = vsel %vm2374_vm1, %v2394_v35, %v6890_v4  ;;  %v2381_v54 = vsel %vm2380_vm3, %v2379_v12, %v2378_v18  ;;  %v2402_v19 = vrot.slane %v6915_v3, 3 }
 0x236   :  { %v2397_v63 = vsel %vm2377_vm2, %v2396_v0, %v2395_v26  ;;  %v2408_v15 = vrot.slane %v6932_v48, 7  ;;  %v2384_v28 = vsel %vm2383_vm4, %v2382_v11, %v2381_v54  ;;  %v2410_v7 = vrot.slane %v6937_v21, 6 }
 0x237   :  { %v2399_v58 = vsel %vm2380_vm3, %v2398_v61, %v2397_v63  ;;  %v2412_v16 = vrot.slane %v6942_v53, 5  ;;  %v2387_v8 = vsel %vm2386_vm5, %v2385_v56, %v2384_v28  ;;  %v2414_v62 = vrot.slane %v6947_v5, 4 }
 0x238   :  { %v2401_v33 = vsel %vm2383_vm4, %v2400_v2, %v2399_v58  ;;  %v2409_v24 = vsel %vm2374_vm1, %v2408_v15, %v6927_v46  ;;  %v6995_v14 = vadd.f32 %v6878_v44, %v6885_v52  ;;  %v2390_v32 = vsel %vm2389_vm6, %v2388_v39, %v2387_v8 }
 0x239   :  { %v2411_v49 = vsel %vm2377_vm2, %v2410_v7, %v2409_v24  ;;  %v2416_v12 = vrot.slane %v6952_v38, 3  ;;  %v2403_v11 = vsel %vm2386_vm5, %v2402_v19, %v2401_v33  ;;  %v2404_v56 = vrot.slane %v6920_v36, 2 }
 0x23a   :  { %v2413_v35 = vsel %vm2380_vm3, %v2412_v16, %v2411_v49  ;;  %v2418_v37 = vrot.slane %v6957_v34, 2  ;;  %v7005_v0 = vsel %vm2392_vm7, %v2391_v51, %v2390_v32  ;;  %v2420_v52 = vrot.slane %v6965_v29, 1 }
 0x23b   :  { %v2415_v44 = vsel %vm2383_vm4, %v2414_v62, %v2413_v35  ;;  %v2422_v61 = vrot.slane %v6935_v22, 7  ;;  %v2424_v18 = vrot.slane %v6940_v57, 6  ;;  %v2426_v39 = vrot.slane %v6945_v60, 5 }
 0x23c   :  { %v2417_v2 = vsel %vm2386_vm5, %v2416_v12, %v2415_v44  ;;  %v2428_v26 = vrot.slane %v6950_v17, 4  ;;  %v2406_v54 = vrot.slane %v6925_v42, 1  ;;  %v2430_v19 = vrot.slane %v6955_v45, 3 }
 0x23d   :  { %v2419_v63 = vsel %vm2389_vm6, %v2418_v37, %v2417_v2  ;;  %v2423_v51 = vsel %vm2374_vm1, %v2422_v61, %v6930_v30  ;;  %v2405_v15 = vsel %vm2389_vm6, %v2404_v56, %v2403_v11  ;;  %v2432_v7 = vrot.slane %v6960_v9, 2 }
 0x23e   :  { %v7021_v28 = vsel %vm2392_vm7, %v2420_v52, %v2419_v63  ;;  %v2425_v58 = vsel %vm2377_vm2, %v2424_v18, %v2423_v51  ;;  %v2434_v8 = vrot.slane %v6995_v14, 1  ;;  %v7031_v62 = vsel %vm2392_vm7, %v2406_v54, %v2405_v15 }
 0x23f   :  { %v2427_v16 = vsel %vm2380_vm3, %v2426_v39, %v2425_v58  ;;  %v2444_v33 = vadd.f32 %v7021_v28, %v7005_v0  ;;  %vm2667_vm8 = vcmp.lt.s32.totalorder %v2299_v55, 256 }
 0x240   :  { %v2429_v24 = vsel %vm2383_vm4, %v2428_v26, %v2427_v16 }
 0x241   :  { %v2431_v32 = vsel %vm2386_vm5, %v2430_v19, %v2429_v24  ;;  %v2445_v49 = vrot.slane %v2444_v33, 4 }
 0x242   :  { %v2433_v12 = vsel %vm2389_vm6, %v2432_v7, %v2431_v32 }
 0x243   :  { %v7036_v11 = vsel %vm2392_vm7, %v2434_v8, %v2433_v12  ;;  %v2446_v56 = vadd.f32 %v2445_v49, %v2444_v33 }
 0x244   :  { %v2451_v35 = vadd.f32 %v7036_v11, %v7031_v62 }
 0x245   :  { %v2447_v37 = vrot.slane %v2446_v56, 2 }
 0x246   :  { %v2452_v44 = vrot.slane %v2451_v35, 4 }
 0x247   :  { %v2448_v52 = vadd.f32 %v2447_v37, %v2446_v56 }
 0x248   :  { %v2453_v61 = vadd.f32 %v2452_v44, %v2451_v35 }
 0x249   :  { %v2449_v2 = vrot.slane %v2448_v52, 1 }
 0x24a   :  { %v2454_v18 = vrot.slane %v2453_v61, 2 }
 0x24b   :  { %v2450_v39 = vadd.f32 %v2449_v2, %v2448_v52 }
 0x24c   :  { %v2455_v26 = vadd.f32 %v2454_v18, %v2453_v61 }
 0x24d   :  { %v7040_v54 = vmul.f32 0.0625, %v2450_v39 }
 0x24e   :  { %v2456_v63 = vrot.slane %v2455_v26, 1 }
 0x24f   :  { %v2464_v51 = vrot.slane %v7040_v54, %v6865_v59 }
 0x250   :  { %v2457_v19 = vadd.f32 %v2456_v63, %v2455_v26 }
 0x251   :  { %v2469_v15 = vsub.f32 %v6887_v43, %v2464_v51  ;;  %v2471_v58 = vsub.f32 %v6892_v50, %v2464_v51  ;;  %v2473_v16 = vsub.f32 %v6897_v41, %v2464_v51  ;;  %v2475_v8 = vsub.f32 %v6902_v31, %v2464_v51 }
 0x252   :  { %v7046_v7 = vmul.f32 0.0625, %v2457_v19  ;;  %v2477_v33 = vsub.f32 %v6907_v40, %v2464_v51  ;;  %v2479_v24 = vsub.f32 %v6912_v20, %v2464_v51  ;;  %v2481_v32 = vsub.f32 %v6917_v27, %v2464_v51 }
 0x253   :  { %v2483_v49 = vsub.f32 %v6922_v23, %v2464_v51  ;;  %v2485_v12 = vsub.f32 %v6927_v46, %v2464_v51  ;;  %v2487_v50 = vsub.f32 %v6932_v48, %v2464_v51  ;;  %v2489_v56 = vsub.f32 %v6937_v21, %v2464_v51 }
 0x254   :  { %v2468_v43 = vrot.slane %v7046_v7, %v6865_v59  ;;  %v2491_v41 = vsub.f32 %v6942_v53, %v2464_v51  ;;  %v2493_v31 = vsub.f32 %v6947_v5, %v2464_v51  ;;  %v2495_v40 = vsub.f32 %v6952_v38, %v2464_v51 }
 0x255   :  { %v2497_v20 = vsub.f32 %v6957_v34, %v2464_v51  ;;  %v2499_v27 = vsub.f32 %v6965_v29, %v2464_v51  ;;  %v2501_v35 = vmul.f32 %v2469_v15, %v2469_v15  ;;  %v2503_v37 = vmul.f32 %v2471_v58, %v2471_v58 }
 0x256   :  { %v2470_v23 = vsub.f32 %v6890_v4, %v2468_v43  ;;  %v2472_v46 = vsub.f32 %v6895_v47, %v2468_v43  ;;  %v2474_v48 = vsub.f32 %v6900_v10, %v2468_v43  ;;  %v2476_v21 = vsub.f32 %v6905_v25, %v2468_v43 }
 0x257   :  { %v2478_v53 = vsub.f32 %v6910_v13, %v2468_v43  ;;  %v2480_v5 = vsub.f32 %v6915_v3, %v2468_v43  ;;  %v2482_v38 = vsub.f32 %v6920_v36, %v2468_v43  ;;  %v2484_v34 = vsub.f32 %v6925_v42, %v2468_v43 }
 0x258   :  { %v2486_v29 = vsub.f32 %v6930_v30, %v2468_v43  ;;  %v2488_v4 = vsub.f32 %v6935_v22, %v2468_v43  ;;  %v2490_v47 = vsub.f32 %v6940_v57, %v2468_v43  ;;  %v2492_v44 = vsub.f32 %v6945_v60, %v2468_v43 }
 0x259   :  { %v2494_v10 = vsub.f32 %v6950_v17, %v2468_v43  ;;  %v2496_v25 = vsub.f32 %v6955_v45, %v2468_v43  ;;  %v2498_v13 = vsub.f32 %v6960_v9, %v2468_v43  ;;  %v2500_v3 = vsub.f32 %v6995_v14, %v2468_v43 }
 0x25a   :  { %v2502_v52 = vmul.f32 %v2470_v23, %v2470_v23  ;;  %v2504_v36 = vmul.f32 %v2472_v46, %v2472_v46  ;;  %v2505_v61 = vmul.f32 %v2473_v16, %v2473_v16  ;;  %v2506_v42 = vmul.f32 %v2474_v48, %v2474_v48 }
 0x25b   :  { %v2507_v2 = vmul.f32 %v2475_v8, %v2475_v8  ;;  %v2508_v30 = vmul.f32 %v2476_v21, %v2476_v21  ;;  %v2509_v18 = vmul.f32 %v2477_v33, %v2477_v33  ;;  %v2510_v22 = vmul.f32 %v2478_v53, %v2478_v53 }
 0x25c   :  { %v2511_v39 = vmul.f32 %v2479_v24, %v2479_v24  ;;  %v2512_v57 = vmul.f32 %v2480_v5, %v2480_v5  ;;  %v2513_v26 = vmul.f32 %v2481_v32, %v2481_v32  ;;  %v7080_v60 = vmul.f32 %v2482_v38, %v2482_v38 }
 0x25d   :  { %v2515_v17 = vmul.f32 %v2483_v49, %v2483_v49  ;;  %v7082_v63 = vmul.f32 %v2484_v34, %v2484_v34  ;;  %v2517_v45 = vmul.f32 %v2485_v12, %v2485_v12  ;;  %v2518_v9 = vmul.f32 %v2486_v29, %v2486_v29 }
 0x25e   :  { %v2519_v51 = vmul.f32 %v2487_v50, %v2487_v50  ;;  %v2520_v14 = vmul.f32 %v2488_v4, %v2488_v4  ;;  %v2521_v19 = vmul.f32 %v2489_v56, %v2489_v56  ;;  %v2522_v15 = vmul.f32 %v2490_v47, %v2490_v47 }
 0x25f   :  { %v2523_v58 = vmul.f32 %v2491_v41, %v2491_v41  ;;  %v2524_v16 = vmul.f32 %v2492_v44, %v2492_v44  ;;  %v2525_v8 = vmul.f32 %v2493_v31, %v2493_v31  ;;  %v2526_v43 = vmul.f32 %v2494_v10, %v2494_v10 }
 0x260   :  { %v2527_v33 = vmul.f32 %v2495_v40, %v2495_v40  ;;  %v2528_v23 = vmul.f32 %v2496_v25, %v2496_v25  ;;  %v2529_v24 = vmul.f32 %v2497_v20, %v2497_v20  ;;  %v2530_v46 = vmul.f32 %v2498_v13, %v2498_v13 }
 0x261   :  { %v2565_v32 = vrot.slane %v2503_v37, 7  ;;  %v2567_v48 = vrot.slane %v2505_v61, 6  ;;  %v2531_v21 = vmul.f32 %v2499_v27, %v2499_v27  ;;  %v2532_v49 = vmul.f32 %v2500_v3, %v2500_v3 }
 0x262   :  { %v2569_v53 = vrot.slane %v2507_v2, 5  ;;  %v2571_v5 = vrot.slane %v2509_v18, 4  ;;  %v2573_v50 = vrot.slane %v2511_v39, 3  ;;  %v2579_v38 = vrot.slane %v2504_v36, 7 }
 0x263   :  { %v2566_v12 = vsel %vm2374_vm1, %v2565_v32, %v2501_v35  ;;  %v2581_v56 = vrot.slane %v2506_v42, 6  ;;  %v2575_v34 = vrot.slane %v2513_v26, 2  ;;  %v2583_v31 = vrot.slane %v2508_v30, 5 }
 0x264   :  { %v2568_v41 = vsel %vm2377_vm2, %v2567_v48, %v2566_v12  ;;  %v2585_v29 = vrot.slane %v2510_v22, 4  ;;  %v2577_v20 = vrot.slane %v2515_v17, 1  ;;  %v2580_v37 = vsel %vm2374_vm1, %v2579_v38, %v2502_v52 }
 0x265   :  { %v2570_v40 = vsel %vm2380_vm3, %v2569_v53, %v2568_v41  ;;  %v2587_v4 = vrot.slane %v2512_v57, 3  ;;  %v2582_v47 = vsel %vm2377_vm2, %v2581_v56, %v2580_v37  ;;  %v2593_v44 = vrot.slane %v2519_v51, 7 }
 0x266   :  { %v2572_v27 = vsel %vm2383_vm4, %v2571_v5, %v2570_v40  ;;  %v2595_v35 = vrot.slane %v2521_v19, 6  ;;  %v2584_v25 = vsel %vm2380_vm3, %v2583_v31, %v2582_v47  ;;  %v2597_v13 = vrot.slane %v2523_v58, 5 }
 0x267   :  { %v2574_v10 = vsel %vm2386_vm5, %v2573_v50, %v2572_v27  ;;  %v2599_v3 = vrot.slane %v2525_v8, 4  ;;  %v2586_v61 = vsel %vm2383_vm4, %v2585_v29, %v2584_v25  ;;  %v2594_v42 = vsel %vm2374_vm1, %v2593_v44, %v2517_v45 }
 0x268   :  { %v2576_v36 = vsel %vm2389_vm6, %v2575_v34, %v2574_v10  ;;  %v2601_v52 = vrot.slane %v2527_v33, 3  ;;  %v2589_v2 = vrot.slane %v7080_v60, 2  ;;  %v2591_v30 = vrot.slane %v7082_v63, 1 }
 0x269   :  { %v2596_v18 = vsel %vm2377_vm2, %v2595_v35, %v2594_v42  ;;  %v2603_v22 = vrot.slane %v2529_v24, 2  ;;  %v2588_v39 = vsel %vm2386_vm5, %v2587_v4, %v2586_v61  ;;  %v2605_v26 = vrot.slane %v2531_v21, 1 }
 0x26a   :  { %v2598_v57 = vsel %vm2380_vm3, %v2597_v13, %v2596_v18  ;;  %v2607_v17 = vrot.slane %v2520_v14, 7  ;;  %v2578_v51 = vsel %vm2392_vm7, %v2577_v20, %v2576_v36  ;;  %v2609_v58 = vrot.slane %v2522_v15, 6 }
 0x26b   :  { %v2600_v19 = vsel %vm2383_vm4, %v2599_v3, %v2598_v57  ;;  %v2611_v45 = vrot.slane %v2524_v16, 5  ;;  %v2613_v63 = vrot.slane %v2526_v43, 4  ;;  %v2615_v33 = vrot.slane %v2528_v23, 3 }
 0x26c   :  { %v2602_v8 = vsel %vm2386_vm5, %v2601_v52, %v2600_v19  ;;  %v2608_v60 = vsel %vm2374_vm1, %v2607_v17, %v2518_v9  ;;  %v2590_v24 = vsel %vm2389_vm6, %v2589_v2, %v2588_v39  ;;  %v2617_v21 = vrot.slane %v2530_v46, 2  ;;  %v2641_v2 = vld [vmem:[%s9069_s3] sm:$0x3] }
 0x26d   :  { %v2604_v32 = vsel %vm2389_vm6, %v2603_v22, %v2602_v8  ;;  %v2610_v48 = vsel %vm2377_vm2, %v2609_v58, %v2608_v60  ;;  %v2619_v5 = vrot.slane %v2532_v49, 1  ;;  %v2592_v12 = vsel %vm2392_vm7, %v2591_v30, %v2590_v24 }
 0x26e   :  { %v2606_v14 = vsel %vm2392_vm7, %v2605_v26, %v2604_v32  ;;  %v2612_v53 = vsel %vm2380_vm3, %v2611_v45, %v2610_v48  ;;  %v4278_v10 = vmov 1966171168  }
 0x26f   :  { %v2614_v15 = vsel %vm2383_vm4, %v2613_v63, %v2612_v53  ;;  %v2625_v16 = vadd.f32 %v2606_v14, %v2578_v51  ;;  %v2650_v25 = vunpack.c.l.s4 %v4278_v10  ;;  %v2670_v51 = vld [vmem:[%s9070_s4] sm:$0x3] }
 0x270   :  { %v2616_v9 = vsel %vm2386_vm5, %v2615_v33, %v2614_v15 }
 0x271   :  { %v2618_v43 = vsel %vm2389_vm6, %v2617_v21, %v2616_v9  ;;  %v2626_v23 = vrot.slane %v2625_v16, 4  ;;  %v2651_v13 = vunpack.c.0.s8 %v2650_v25 }
 0x272   :  { %v2620_v50 = vsel %vm2392_vm7, %v2619_v5, %v2618_v43 }
 0x273   :  { %v2627_v38 = vadd.f32 %v2626_v23, %v2625_v16  ;;  %v2632_v56 = vadd.f32 %v2620_v50, %v2592_v12  ;;  %v7115_v36 = vsub.s32 %v2651_v13, %v6852_v1 }
 0x275   :  { %v2628_v46 = vrot.slane %v2627_v38, 2  ;;  %v2633_v41 = vrot.slane %v2632_v56, 4 }
 0x277   :  { %v2629_v34 = vadd.f32 %v2628_v46, %v2627_v38  ;;  %v2634_v31 = vadd.f32 %v2633_v41, %v2632_v56 }
 0x279   :  { %v2630_v29 = vrot.slane %v2629_v34, 1  ;;  %v2635_v49 = vrot.slane %v2634_v31, 2 }
 0x27b   :  { %v2631_v40 = vadd.f32 %v2630_v29, %v2629_v34  ;;  %v2636_v20 = vadd.f32 %v2635_v49, %v2634_v31 }
 0x27d   :  { %v2637_v37 = vrot.slane %v2636_v20, 1  ;;  %v2639_v4 = vmul.f32 0.0625, %v2631_v40 }
 0x27f   :  { %v2638_v27 = vadd.f32 %v2637_v37, %v2636_v20  ;;  %v2642_v47 = vadd.f32 1e-05, %v2639_v4 }
 0x281   :  { %v2640_v44 = vmul.f32 0.0625, %v2638_v27  ;;  %4274 = vrsqrt.f32 %v2642_v47 }
 0x283   :  { %v2643_v35 = vadd.f32 1e-05, %v2640_v44 }
 0x285   :  { %4276 = vrsqrt.f32 %v2643_v35 }
 0x28b   :  { %v4275_v3 = vpop.eup %4274 }
 0x28f   :  { %v4277_v61 = vpop.eup %4276 }
 0x290   :  { %v2648_v42 = vcombine.low %v4275_v3, %v4277_v61 }
 0x292   :  { %v2655_v52 = vrot.slane %v2648_v42, %v7115_v36 }
 0x294   :  { %v2662_v30 = vrot.slane %v2655_v52, %v7115_v36 }
 0x296   :  { %v2664_v18 = vmul.f32 %v2662_v30, %v2641_v2 }
 0x298   :  { %2669 = vst.msk [vmem:[#allocation3] sm:$0x3] %vm2667_vm8, %v2664_v18  ;;  %v2675_v22 = vrot.slane %v2664_v18, %v6865_v59  ;;  %v2679_v39 = vrot.slane %v2664_v18, %v6868_v6 }
 0x29a   :  { %v2682_v1 = vmul.f32 %v2675_v22, %v7040_v54  ;;  %v2683_v57 = vmul.f32 %v2679_v39, %v7046_v7  ;;  %v3047_v39 = vld [vmem:[%s9066_s0] sm:$0x7f] }
 0x29c   :  { %v2686_v26 = vcombine.low %v2682_v1, %v2683_v57  ;;  %v3048_v1 = vld [vmem:[%s9066_s0 + $0x8] sm:$0x7f] }
 0x29e   :  { %v2693_v17 = vrot.slane %v2686_v26, %v7115_v36 }
 0x29f   :  { %v2714_v58 = vld [vmem:[#allocation3] sm:$0x3] }
 0x2a0   :  { %v2700_v19 = vrot.slane %v2693_v17, %v7115_v36  ;;  %v2719_v45 = vrot.slane %v2714_v58, %v6865_v59  ;;  %v2723_v8 = vrot.slane %v2714_v58, %v6868_v6  ;;  %v3051_v58 = vld [vmem:[%s9066_s0 + $0x20] sm:$0x7f] }
 0x2a2   :  { %v2702_v55 = vsub.f32 %v2670_v51, %v2700_v19  ;;  %v2727_v54 = vmul.f32 %v2723_v8, %v7031_v62  ;;  %v2729_v7 = vmul.f32 %v2723_v8, %v7036_v11  ;;  %v2726_v60 = vmul.f32 %v2719_v45, %v7005_v0  ;;  %v2778_v62 = vld [vmem:[%s9071_s6] sm:$0x3]  ;;  %v3049_v19 = vld [vmem:[%s9066_s0 + $0x10] sm:$0x7f] }
 0x2a3   :  { %v2728_v63 = vmul.f32 %v2719_v45, %v7021_v28  ;;  %v2785_v0 = vrot.slane %v2778_v62, %v6865_v59  ;;  %v2789_v28 = vrot.slane %v2778_v62, %v6868_v6  ;;  %v3052_v45 = vld [vmem:[%s9066_s0 + $0x28] sm:$0x7f]  ;;  %v3059_v62 = vld [vmem:[%s9066_s0 + $0x60] sm:$0x7f] }
 0x2a4   :  { %2703 = vst.msk [vmem:[#allocation4] sm:$0x3] %vm2667_vm8, %v2702_v55  ;;  %v3050_v55 = vld [vmem:[%s9066_s0 + $0x18] sm:$0x7f] }
 0x2ab   :  { %v2730_v33 = vld [vmem:[#allocation4] sm:$0x3] }
 0x2ac   :  { %v2735_v24 = vrot.slane %v2730_v33, %v6865_v59  ;;  %v2739_v32 = vrot.slane %v2730_v33, %v6868_v6  ;;  %v3054_v33 = vld [vmem:[%s9066_s0 + $0x38] sm:$0x7f] }
 0x2ae   :  { %v2743_v48 = vadd.f32 %v2739_v32, %v2727_v54  ;;  %v2745_v21 = vadd.f32 %v2739_v32, %v2729_v7  ;;  %v2742_v14 = vadd.f32 %v2735_v24, %v2726_v60  ;;  %v2744_v53 = vadd.f32 %v2735_v24, %v2728_v63  ;;  %v3053_v63 = vld [vmem:[%s9066_s0 + $0x30] sm:$0x7f]  ;;  %v3055_v24 = vld [vmem:[%s9066_s0 + $0x40] sm:$0x7f]  ;;  %v3056_v32 = vld [vmem:[%s9066_s0 + $0x48] sm:$0x7f] }
 0x2b0   :  { %v2780_v5 = vpack.c.bf16 %v2745_v21, %v2743_v48  ;;  %v2779_v15 = vpack.c.bf16 %v2744_v53, %v2742_v14 }
 0x2b2   :  { %2984 = vmatprep.mubr.bf16.mxu0 %v2780_v5  ;;  %v3057_v5 = vld [vmem:[%s9066_s0 + $0x50] sm:$0x7f] }
 0x2b3   :  { %2985 = vmatmul.mubr.bf16.vlgmr.msra.gmra.mrb[0].mxu0 %v2779_v15  ;;  %v3058_v15 = vld [vmem:[%s9066_s0 + $0x58] sm:$0x7f] }
 0x386   :  { %v2986_v11 = vpop.f32.mrb[0].mxu0 }
 0x387   :  { %v2987_v16 = vadd.f32 %v2986_v11, %v2785_v0  ;;  %v2988_v12 = vpop.f32.mrb[1].mxu0 }
 0x388   :  { %v2989_v9 = vadd.f32 %v2988_v12, %v2789_v28  ;;  %v2990_v43 = vpop.f32.mrb[2].mxu0 }
 0x389   :  { %v2991_v23 = vadd.f32 %v2990_v43, %v2785_v0  ;;  %v2992_v50 = vpop.f32.mrb[3].mxu0  ;;  %v2995_v56 = vmax.f32 %v2987_v16, 0.0  ;;  %v3062_v43 = vld [vmem:[%s9066_s0 + $0x78] sm:$0x7f] }
 0x38a   :  { %v2993_v38 = vadd.f32 %v2992_v50, %v2789_v28  ;;  %v2996_v41 = vmax.f32 %v2989_v9, 0.0  ;;  %v3061_v9 = vld [vmem:[%s9066_s0 + $0x70] sm:$0x7f]  ;;  %v3064_v50 = vld [vmem:[%s9066_s0 + $0x88] sm:$0x7f] }
 0x38b   :  { %v2997_v46 = vmax.f32 %v2991_v23, 0.0  ;;  %v3063_v23 = vld [vmem:[%s9066_s0 + $0x80] sm:$0x7f] }
 0x38c   :  { %v2998_v34 = vmax.f32 %v2993_v38, 0.0 }
 0x38d   :  { %v2999_v31 = vpack.c.bf16 %v2997_v46, %v2995_v56 }
 0x38e   :  { %v3000_v29 = vpack.c.bf16 %v2998_v34, %v2996_v41  ;;  %v3065_v34 = vld [vmem:[%s9066_s0 + $0x90] sm:$0x7f] }
 0x390   :  { %3033 = vmatprep.mubr.bf16.mxu1 %v3000_v29  ;;  %v3067_v29 = vld [vmem:[%s9066_s0 + $0xa0] sm:$0x7f] }
 0x391   :  { %3034 = vmatmul.mubr.bf16.vlgmr.msra.gmra.mrb[0].mxu1 %v2999_v31  ;;  %v3066_v31 = vld [vmem:[%s9066_s0 + $0x98] sm:$0x7f] }
 0x464   :  { %v3035_v49 = vpop.f32.mrb[0].mxu1 }
 0x465   :  { %v3036_v40 = vadd.f32 %v3035_v49, %v2785_v0  ;;  %v3037_v20 = vpop.f32.mrb[1].mxu1  ;;  %v3068_v49 = vld [vmem:[%s9066_s0 + $0xa8] sm:$0x7f] }
 0x466   :  { %v3038_v37 = vadd.f32 %v3037_v20, %v2789_v28  ;;  %v3039_v4 = vpop.f32.mrb[2].mxu1 }
 0x467   :  { %v3040_v27 = vadd.f32 %v3039_v4, %v2785_v0  ;;  %v3041_v47 = vpop.f32.mrb[3].mxu1  ;;  %v3060_v0 = vld [vmem:[%s9066_s0 + $0x68] sm:$0x7f] }
 0x468   :  { %v3275_v44 = vcombine.low %v3036_v40, %v3038_v37  ;;  %v3276_v35 = vcombine.high %v3036_v40, %v3038_v37  ;;  %v3042_v10 = vadd.f32 %v3041_v47, %v2789_v28  ;;  %v3070_v47 = vld [vmem:[%s9066_s0 + $0xb8] sm:$0x7f] }
 0x46a   :  { %v3283_v25 = vrot.slane %v3275_v44, %v7115_v36  ;;  %v3290_v13 = vrot.slane %v3276_v35, %v7115_v36  ;;  %v3325_v3 = vcombine.low %v3040_v27, %v3042_v10  ;;  %v3326_v61 = vcombine.high %v3040_v27, %v3042_v10  ;;  %v3069_v27 = vld [vmem:[%s9066_s0 + $0xb0] sm:$0x7f]  ;;  %v3071_v44 = vld [vmem:[%s9066_s0 + $0xc0] sm:$0x7f]  ;;  %v3072_v35 = vld [vmem:[%s9066_s0 + $0xc8] sm:$0x7f] }
 0x46c   :  { %v3291_v42 = vcombine.high %v3283_v25, %v3283_v25  ;;  %v3292_v52 = vcombine.high %v3290_v13, %v3290_v13  ;;  %v3299_v2 = vrot.slane %v3283_v25, %v7115_v36  ;;  %v3306_v30 = vrot.slane %v3290_v13, %v7115_v36 }
 0x46d   :  { %v7150_v18 = vrot.slane %v3325_v3, %v7115_v36  ;;  %v7153_v22 = vrot.slane %v3326_v61, %v7115_v36  ;;  %v3073_v61 = vld [vmem:[%s9066_s0 + $0xd0] sm:$0x7f] }
 0x46e   :  { %v3313_v57 = vrot.slane %v3291_v42, %v7115_v36  ;;  %v3320_v26 = vrot.slane %v3292_v52, %v7115_v36  ;;  %v3321_v17 = vcombine.high %v3299_v2, %v3299_v2  ;;  %v3322_v51 = vcombine.high %v3306_v30, %v3306_v30  ;;  %v3074_v42 = vld [vmem:[%s9066_s0 + $0xd8] sm:$0x7f]  ;;  %v3075_v52 = vld [vmem:[%s9066_s0 + $0xe0] sm:$0x7f] }
 0x46f   :  { %v3378_v8 = vrot.slane %v3299_v2, %v6865_v59  ;;  %v3382_v54 = vrot.slane %v3299_v2, %v6868_v6  ;;  %v7178_v7 = vrot.slane %v3306_v30, %v6865_v59  ;;  %v7181_v60 = vrot.slane %v3306_v30, %v6868_v6  ;;  %v3076_v2 = vld [vmem:[%s9066_s0 + $0xe8] sm:$0x7f] }
 0x470   :  { %v3323_v48 = vcombine.high %v3313_v57, %v3313_v57  ;;  %v3324_v21 = vcombine.high %v3320_v26, %v3320_v26  ;;  %v7196_v14 = vrot.slane %v3313_v57, %v6865_v59  ;;  %v7199_v53 = vrot.slane %v3313_v57, %v6868_v6 }
 0x471   :  { %v7214_v28 = vrot.slane %v3321_v17, %v6865_v59  ;;  %v7217_v11 = vrot.slane %v3321_v17, %v6868_v6  ;;  %v7220_v16 = vrot.slane %v3320_v26, %v6865_v59  ;;  %v7223_v12 = vrot.slane %v3320_v26, %v6868_v6  ;;  %v7300_v26 = vld [vmem:[%s9066_s0 + $0xf0] sm:$0x7f]  ;;  %v7305_v17 = vld [vmem:[%s9066_s0 + $0xf8] sm:$0x7f] }
 0x472   :  { %v7238_v38 = vrot.slane %v3323_v48, %v6865_v59  ;;  %v7241_v56 = vrot.slane %v3323_v48, %v6868_v6  ;;  %v7244_v46 = vrot.slane %v3322_v51, %v6865_v59  ;;  %v7247_v41 = vrot.slane %v3322_v51, %v6868_v6  ;;  %v7310_v51 = vld [vmem:[%s9066_s0 + $0x100] sm:$0x7f] }
 0x473   :  { %v7262_v40 = vrot.slane %v3324_v21, %v6865_v59  ;;  %v7265_v20 = vrot.slane %v3324_v21, %v6868_v6  ;;  %v3535_v37 = vadd.f32 %v3378_v8, %v3047_v39  ;;  %v3536_v4 = vadd.f32 %v3382_v54, %v3048_v1 }
 0x474   :  { %v3537_v10 = vadd.f32 %v3378_v8, %v3049_v19  ;;  %v3538_v25 = vadd.f32 %v3382_v54, %v3050_v55  ;;  %v3539_v13 = vadd.f32 %v3378_v8, %v3051_v58  ;;  %v3540_v3 = vadd.f32 %v3382_v54, %v3052_v45  ;;  %v7315_v19 = vld [vmem:[%s9066_s0 + $0x108] sm:$0x7f] }
 0x475   :  { %v3541_v30 = vadd.f32 %v3378_v8, %v3053_v63  ;;  %v3542_v39 = vadd.f32 %v3382_v54, %v3054_v33  ;;  %v3543_v1 = vadd.f32 %v3378_v8, %v3055_v24  ;;  %v3544_v57 = vadd.f32 %v3382_v54, %v3056_v32  ;;  %3759 = vst [vmem:[%s9072_s7] sm:$0x7f] %v3535_v37  ;;  %v7342_v33 = vld [vmem:[%s9066_s0 + $0x120] sm:$0x7f]  ;;  %v7347_v24 = vld [vmem:[%s9066_s0 + $0x128] sm:$0x7f] }
 0x476   :  { %3760 = vst [vmem:[%s9072_s7 + $0x8] sm:$0x7f] %v3536_v4  ;;  %v3545_v55 = vadd.f32 %v3378_v8, %v3057_v5  ;;  %v3546_v58 = vadd.f32 %v3382_v54, %v3058_v15  ;;  %v3547_v45 = vadd.f32 %v3378_v8, %v3059_v62  ;;  %v3548_v63 = vadd.f32 %v3382_v54, %v3060_v0  ;;  %v7332_v8 = vld [vmem:[%s9066_s0 + $0x110] sm:$0x7f]  ;;  %v7337_v54 = vld [vmem:[%s9066_s0 + $0x118] sm:$0x7f] }
 0x477   :  { %3761 = vst [vmem:[%s9072_s7 + $0x10] sm:$0x7f] %v3537_v10  ;;  %3762 = vst [vmem:[%s9072_s7 + $0x18] sm:$0x7f] %v3538_v25  ;;  %v3549_v32 = vadd.f32 %v7196_v14, %v3061_v9  ;;  %v3550_v48 = vadd.f32 %v7199_v53, %v3062_v43  ;;  %v3551_v21 = vadd.f32 %v7196_v14, %v3063_v23  ;;  %v7368_v15 = vld [vmem:[%s9066_s0 + $0x130] sm:$0x7f] }
 0x478   :  { %3763 = vst [vmem:[%s9072_s7 + $0x20] sm:$0x7f] %v3539_v13  ;;  %3764 = vst [vmem:[%s9072_s7 + $0x28] sm:$0x7f] %v3540_v3  ;;  %v3552_v5 = vadd.f32 %v7199_v53, %v3064_v50  ;;  %v7373_v62 = vld [vmem:[%s9066_s0 + $0x138] sm:$0x7f]  ;;  %v3553_v43 = vadd.f32 %v7196_v14, %v3065_v34  ;;  %v3554_v23 = vadd.f32 %v7199_v53, %v3066_v31 }
 0x479   :  { %3765 = vst [vmem:[%s9072_s7 + $0x30] sm:$0x7f] %v3541_v30  ;;  %3766 = vst [vmem:[%s9072_s7 + $0x38] sm:$0x7f] %v3542_v39  ;;  %v7378_v0 = vld [vmem:[%s9066_s0 + $0x140] sm:$0x7f]  ;;  %v3555_v50 = vadd.f32 %v7196_v14, %v3067_v29  ;;  %v3556_v37 = vadd.f32 %v7199_v53, %v3068_v49  ;;  %v3557_v4 = vadd.f32 %v7196_v14, %v3069_v27 }
 0x47a   :  { %3767 = vst [vmem:[%s9072_s7 + $0x40] sm:$0x7f] %v3543_v1  ;;  %3768 = vst [vmem:[%s9072_s7 + $0x48] sm:$0x7f] %v3544_v57  ;;  %v7383_v9 = vld [vmem:[%s9066_s0 + $0x148] sm:$0x7f]  ;;  %v3558_v10 = vadd.f32 %v7199_v53, %v3070_v47  ;;  %v3559_v25 = vadd.f32 %v7196_v14, %v3071_v44  ;;  %v3560_v13 = vadd.f32 %v7199_v53, %v3072_v35 }
 0x47b   :  { %3769 = vst [vmem:[%s9072_s7 + $0x50] sm:$0x7f] %v3545_v55  ;;  %3770 = vst [vmem:[%s9072_s7 + $0x58] sm:$0x7f] %v3546_v58  ;;  %v7404_v34 = vld [vmem:[%s9066_s0 + $0x150] sm:$0x7f]  ;;  %v3561_v3 = vadd.f32 %v7196_v14, %v3073_v61  ;;  %v3562_v30 = vadd.f32 %v7199_v53, %v3074_v42  ;;  %v3563_v39 = vadd.f32 %v7214_v28, %v3075_v52 }
 0x47c   :  { %3771 = vst [vmem:[%s9072_s7 + $0x60] sm:$0x7f] %v3547_v45  ;;  %3772 = vst [vmem:[%s9072_s7 + $0x68] sm:$0x7f] %v3548_v63  ;;  %v7409_v31 = vld [vmem:[%s9066_s0 + $0x158] sm:$0x7f]  ;;  %v3564_v1 = vadd.f32 %v7217_v11, %v3076_v2  ;;  %v3565_v52 = vadd.f32 %v7214_v28, %v7300_v26  ;;  %v3566_v2 = vadd.f32 %v7217_v11, %v7305_v17 }
 0x47d   :  { %v7414_v29 = vld [vmem:[%s9066_s0 + $0x160] sm:$0x7f]  ;;  %v7419_v49 = vld [vmem:[%s9066_s0 + $0x168] sm:$0x7f]  ;;  %3773 = vst [vmem:[%s9072_s7 + $0x70] sm:$0x7f] %v3549_v32  ;;  %v3567_v57 = vadd.f32 %v7214_v28, %v7310_v51  ;;  %v3568_v55 = vadd.f32 %v7217_v11, %v7315_v19  ;;  %v3569_v58 = vadd.f32 %v7214_v28, %v7332_v8  ;;  %v3570_v45 = vadd.f32 %v7217_v11, %v7337_v54 }
 0x47e   :  { %3774 = vst [vmem:[%s9072_s7 + $0x78] sm:$0x7f] %v3550_v48  ;;  %3775 = vst [vmem:[%s9072_s7 + $0x80] sm:$0x7f] %v3551_v21  ;;  %v7440_v27 = vld [vmem:[%s9066_s0 + $0x170] sm:$0x7f]  ;;  %v3571_v63 = vadd.f32 %v7214_v28, %v7342_v33  ;;  %v3572_v32 = vadd.f32 %v7217_v11, %v7347_v24  ;;  %v3573_v48 = vadd.f32 %v7214_v28, %v7368_v15 }
 0x47f   :  { %3776 = vst [vmem:[%s9072_s7 + $0x88] sm:$0x7f] %v3552_v5  ;;  %v7445_v47 = vld [vmem:[%s9066_s0 + $0x178] sm:$0x7f]  ;;  %v7450_v44 = vld [vmem:[%s9066_s0 + $0x180] sm:$0x7f]  ;;  %v3574_v21 = vadd.f32 %v7217_v11, %v7373_v62  ;;  %v3575_v5 = vadd.f32 %v7214_v28, %v7378_v0  ;;  %v3577_v0 = vadd.f32 %v7238_v38, %v7404_v34 }
 0x480   :  { %v7455_v35 = vld [vmem:[%s9066_s0 + $0x188] sm:$0x7f]  ;;  %3777 = vst [vmem:[%s9072_s7 + $0x90] sm:$0x7f] %v3553_v43  ;;  %3778 = vst [vmem:[%s9072_s7 + $0x98] sm:$0x7f] %v3554_v23  ;;  %v3576_v43 = vadd.f32 %v7217_v11, %v7383_v9  ;;  %v3578_v9 = vadd.f32 %v7241_v56, %v7409_v31  ;;  %v3579_v23 = vadd.f32 %v7238_v38, %v7414_v29 }
 0x481   :  { %3779 = vst [vmem:[%s9072_s7 + $0xa0] sm:$0x7f] %v3555_v50  ;;  %3780 = vst [vmem:[%s9072_s7 + $0xa8] sm:$0x7f] %v3556_v37  ;;  %v7476_v14 = vld [vmem:[%s9066_s0 + $0x190] sm:$0x7f]  ;;  %v3580_v50 = vadd.f32 %v7241_v56, %v7419_v49  ;;  %v3581_v49 = vadd.f32 %v7238_v38, %v7440_v27 }
 0x482   :  { %v7481_v53 = vld [vmem:[%s9066_s0 + $0x198] sm:$0x7f]  ;;  %v7486_v61 = vld [vmem:[%s9066_s0 + $0x1a0] sm:$0x7f]  ;;  %v7491_v42 = vld [vmem:[%s9066_s0 + $0x1a8] sm:$0x7f] }
 0x483   :  { %3781 = vst [vmem:[%s9072_s7 + $0xb0] sm:$0x7f] %v3557_v4  ;;  %3782 = vst [vmem:[%s9072_s7 + $0xb8] sm:$0x7f] %v3558_v10  ;;  %v7516_v26 = vld [vmem:[%s9066_s0 + $0x1b0] sm:$0x7f]  ;;  %v3582_v4 = vadd.f32 %v7241_v56, %v7445_v47  ;;  %v3583_v10 = vadd.f32 %v7238_v38, %v7450_v44 }
 0x484   :  { %3783 = vst [vmem:[%s9072_s7 + $0xc0] sm:$0x7f] %v3559_v25  ;;  %3784 = vst [vmem:[%s9072_s7 + $0xc8] sm:$0x7f] %v3560_v13  ;;  %v7521_v17 = vld [vmem:[%s9066_s0 + $0x1b8] sm:$0x7f]  ;;  %v3584_v25 = vadd.f32 %v7241_v56, %v7455_v35  ;;  %v3585_v35 = vadd.f32 %v7238_v38, %v7476_v14 }
 0x485   :  { %v7526_v51 = vld [vmem:[%s9066_s0 + $0x1c0] sm:$0x7f]  ;;  %v7531_v19 = vld [vmem:[%s9066_s0 + $0x1c8] sm:$0x7f]  ;;  %3785 = vst [vmem:[%s9072_s7 + $0xd0] sm:$0x7f] %v3561_v3  ;;  %v3586_v3 = vadd.f32 %v7241_v56, %v7481_v53 }
 0x486   :  { %3786 = vst [vmem:[%s9072_s7 + $0xd8] sm:$0x7f] %v3562_v30  ;;  %3787 = vst [vmem:[%s9072_s7 + $0xe0] sm:$0x7f] %v3563_v39  ;;  %v7556_v8 = vld [vmem:[%s9066_s0 + $0x1d0] sm:$0x7f]  ;;  %v3587_v30 = vadd.f32 %v7238_v38, %v7486_v61  ;;  %v3588_v39 = vadd.f32 %v7241_v56, %v7491_v42  ;;  %v3589_v42 = vadd.f32 %v7238_v38, %v7516_v26 }
 0x487   :  { %3788 = vst [vmem:[%s9072_s7 + $0xe8] sm:$0x7f] %v3564_v1  ;;  %v7561_v54 = vld [vmem:[%s9066_s0 + $0x1d8] sm:$0x7f]  ;;  %v7566_v33 = vld [vmem:[%s9066_s0 + $0x1e0] sm:$0x7f] }
 0x488   :  { %v7571_v24 = vld [vmem:[%s9066_s0 + $0x1e8] sm:$0x7f]  ;;  %3789 = vst [vmem:[%s9072_s7 + $0xf0] sm:$0x7f] %v3565_v52  ;;  %3790 = vst [vmem:[%s9072_s7 + $0xf8] sm:$0x7f] %v3566_v2  ;;  %v3590_v52 = vadd.f32 %v7241_v56, %v7521_v17  ;;  %v3591_v2 = vadd.f32 %v7178_v7, %v7526_v51  ;;  %v3593_v17 = vadd.f32 %v7178_v7, %v7556_v8 }
 0x489   :  { %3791 = vst [vmem:[%s9072_s7 + $0x100] sm:$0x7f] %v3567_v57  ;;  %3792 = vst [vmem:[%s9072_s7 + $0x108] sm:$0x7f] %v3568_v55  ;;  %v7596_v28 = vld [vmem:[%s9066_s0 + $0x1f0] sm:$0x7f]  ;;  %v3592_v57 = vadd.f32 %v7181_v60, %v7531_v19  ;;  %v3594_v51 = vadd.f32 %v7181_v60, %v7561_v54  ;;  %v3595_v19 = vadd.f32 %v7178_v7, %v7566_v33 }
 0x48a   :  { %v7601_v11 = vld [vmem:[%s9066_s0 + $0x1f8] sm:$0x7f]  ;;  %v7606_v15 = vld [vmem:[%s9066_s0 + $0x200] sm:$0x7f]  ;;  %v7611_v62 = vld [vmem:[%s9066_s0 + $0x208] sm:$0x7f]  ;;  %v3597_v54 = vadd.f32 %v7178_v7, %v7596_v28 }
 0x48b   :  { %3793 = vst [vmem:[%s9072_s7 + $0x110] sm:$0x7f] %v3569_v58  ;;  %3794 = vst [vmem:[%s9072_s7 + $0x118] sm:$0x7f] %v3570_v45  ;;  %v7636_v37 = vld [vmem:[%s9066_s0 + $0x210] sm:$0x7f]  ;;  %v3596_v58 = vadd.f32 %v7181_v60, %v7571_v24  ;;  %v3598_v33 = vadd.f32 %v7181_v60, %v7601_v11  ;;  %v3599_v24 = vadd.f32 %v7178_v7, %v7606_v15 }
 0x48c   :  { %3795 = vst [vmem:[%s9072_s7 + $0x120] sm:$0x7f] %v3571_v63  ;;  %3796 = vst [vmem:[%s9072_s7 + $0x128] sm:$0x7f] %v3572_v32  ;;  %v7641_v34 = vld [vmem:[%s9066_s0 + $0x218] sm:$0x7f]  ;;  %v3601_v28 = vadd.f32 %v7178_v7, %v7636_v37 }
 0x48d   :  { %v7646_v31 = vld [vmem:[%s9066_s0 + $0x220] sm:$0x7f]  ;;  %v7651_v29 = vld [vmem:[%s9066_s0 + $0x228] sm:$0x7f]  ;;  %3797 = vst [vmem:[%s9072_s7 + $0x130] sm:$0x7f] %v3573_v48  ;;  %v3600_v48 = vadd.f32 %v7181_v60, %v7611_v62  ;;  %v3602_v11 = vadd.f32 %v7181_v60, %v7641_v34 }
 0x48e   :  { %3798 = vst [vmem:[%s9072_s7 + $0x138] sm:$0x7f] %v3574_v21  ;;  %3799 = vst [vmem:[%s9072_s7 + $0x140] sm:$0x7f] %v3575_v5  ;;  %v3117_v13 = vld [vmem:[%s9066_s0 + $0x230] sm:$0x7f]  ;;  %v3603_v15 = vadd.f32 %v7178_v7, %v7646_v31  ;;  %v3604_v62 = vadd.f32 %v7181_v60, %v7651_v29 }
 0x48f   :  { %3800 = vst [vmem:[%s9072_s7 + $0x148] sm:$0x7f] %v3576_v43  ;;  %v3118_v27 = vld [vmem:[%s9066_s0 + $0x238] sm:$0x7f]  ;;  %v3119_v47 = vld [vmem:[%s9066_s0 + $0x240] sm:$0x7f] }
 0x490   :  { %v3120_v44 = vld [vmem:[%s9066_s0 + $0x248] sm:$0x7f]  ;;  %3801 = vst [vmem:[%s9072_s7 + $0x150] sm:$0x7f] %v3577_v0  ;;  %3802 = vst [vmem:[%s9072_s7 + $0x158] sm:$0x7f] %v3578_v9  ;;  %v3605_v9 = vadd.f32 %v7220_v16, %v3117_v13 }
 0x491   :  { %3803 = vst [vmem:[%s9072_s7 + $0x160] sm:$0x7f] %v3579_v23  ;;  %3804 = vst [vmem:[%s9072_s7 + $0x168] sm:$0x7f] %v3580_v50  ;;  %v3121_v1 = vld [vmem:[%s9066_s0 + $0x250] sm:$0x7f]  ;;  %v3606_v23 = vadd.f32 %v7223_v12, %v3118_v27  ;;  %v3607_v50 = vadd.f32 %v7220_v16, %v3119_v47  ;;  %v3608_v37 = vadd.f32 %v7223_v12, %v3120_v44 }
 0x492   :  { %v3122_v14 = vld [vmem:[%s9066_s0 + $0x258] sm:$0x7f]  ;;  %v3123_v53 = vld [vmem:[%s9066_s0 + $0x260] sm:$0x7f]  ;;  %v3124_v61 = vld [vmem:[%s9066_s0 + $0x268] sm:$0x7f] }
 0x493   :  { %3805 = vst [vmem:[%s9072_s7 + $0x170] sm:$0x7f] %v3581_v49  ;;  %3806 = vst [vmem:[%s9072_s7 + $0x178] sm:$0x7f] %v3582_v4  ;;  %v3125_v38 = vld [vmem:[%s9066_s0 + $0x270] sm:$0x7f]  ;;  %v3609_v49 = vadd.f32 %v7220_v16, %v3121_v1  ;;  %v3610_v4 = vadd.f32 %v7223_v12, %v3122_v14 }
 0x494   :  { %3807 = vst [vmem:[%s9072_s7 + $0x180] sm:$0x7f] %v3583_v10  ;;  %3808 = vst [vmem:[%s9072_s7 + $0x188] sm:$0x7f] %v3584_v25  ;;  %v3126_v56 = vld [vmem:[%s9066_s0 + $0x278] sm:$0x7f]  ;;  %v3611_v10 = vadd.f32 %v7220_v16, %v3123_v53  ;;  %v3612_v25 = vadd.f32 %v7223_v12, %v3124_v61  ;;  %v3613_v44 = vadd.f32 %v7220_v16, %v3125_v38 }
 0x495   :  { %v3127_v55 = vld [vmem:[%s9066_s0 + $0x280] sm:$0x7f]  ;;  %v3128_v26 = vld [vmem:[%s9066_s0 + $0x288] sm:$0x7f]  ;;  %3809 = vst [vmem:[%s9072_s7 + $0x190] sm:$0x7f] %v3585_v35  ;;  %v3614_v35 = vadd.f32 %v7223_v12, %v3126_v56 }
 0x496   :  { %3810 = vst [vmem:[%s9072_s7 + $0x198] sm:$0x7f] %v3586_v3  ;;  %3811 = vst [vmem:[%s9072_s7 + $0x1a0] sm:$0x7f] %v3587_v30  ;;  %v3129_v45 = vld [vmem:[%s9066_s0 + $0x290] sm:$0x7f]  ;;  %v3615_v3 = vadd.f32 %v7220_v16, %v3127_v55  ;;  %v3616_v30 = vadd.f32 %v7223_v12, %v3128_v26 }
 0x497   :  { %3812 = vst [vmem:[%s9072_s7 + $0x1a8] sm:$0x7f] %v3588_v39  ;;  %v3130_v63 = vld [vmem:[%s9066_s0 + $0x298] sm:$0x7f]  ;;  %v3131_v32 = vld [vmem:[%s9066_s0 + $0x2a0] sm:$0x7f]  ;;  %v3617_v53 = vadd.f32 %v7220_v16, %v3129_v45 }
 0x498   :  { %v3132_v8 = vld [vmem:[%s9066_s0 + $0x2a8] sm:$0x7f]  ;;  %3813 = vst [vmem:[%s9072_s7 + $0x1b0] sm:$0x7f] %v3589_v42  ;;  %3814 = vst [vmem:[%s9072_s7 + $0x1b8] sm:$0x7f] %v3590_v52  ;;  %v3618_v61 = vadd.f32 %v7223_v12, %v3130_v63  ;;  %v3619_v42 = vadd.f32 %v7244_v46, %v3131_v32 }
 0x499   :  { %3815 = vst [vmem:[%s9072_s7 + $0x1c0] sm:$0x7f] %v3591_v2  ;;  %3816 = vst [vmem:[%s9072_s7 + $0x1c8] sm:$0x7f] %v3592_v57  ;;  %v3133_v21 = vld [vmem:[%s9066_s0 + $0x2b0] sm:$0x7f]  ;;  %v3620_v52 = vadd.f32 %v7247_v41, %v3132_v8 }
 0x49a   :  { %v3134_v5 = vld [vmem:[%s9066_s0 + $0x2b8] sm:$0x7f]  ;;  %v3135_v43 = vld [vmem:[%s9066_s0 + $0x2c0] sm:$0x7f]  ;;  %3817 = vst [vmem:[%s9072_s7 + $0x1d0] sm:$0x7f] %v3593_v17  ;;  %v3621_v57 = vadd.f32 %v7244_v46, %v3133_v21 }
 0x49b   :  { %3818 = vst [vmem:[%s9072_s7 + $0x1d8] sm:$0x7f] %v3594_v51  ;;  %3819 = vst [vmem:[%s9072_s7 + $0x1e0] sm:$0x7f] %v3595_v19  ;;  %v3136_v7 = vld [vmem:[%s9066_s0 + $0x2c8] sm:$0x7f]  ;;  %v3622_v38 = vadd.f32 %v7247_v41, %v3134_v5  ;;  %v3623_v56 = vadd.f32 %v7244_v46, %v3135_v43 }
 0x49c   :  { %3820 = vst [vmem:[%s9072_s7 + $0x1e8] sm:$0x7f] %v3596_v58  ;;  %v3137_v60 = vld [vmem:[%s9066_s0 + $0x2d0] sm:$0x7f]  ;;  %v3138_v0 = vld [vmem:[%s9066_s0 + $0x2d8] sm:$0x7f]  ;;  %v3624_v55 = vadd.f32 %v7247_v41, %v3136_v7 }
 0x49d   :  { %3821 = vst [vmem:[%s9072_s7 + $0x1f0] sm:$0x7f] %v3597_v54  ;;  %3822 = vst [vmem:[%s9072_s7 + $0x1f8] sm:$0x7f] %v3598_v33  ;;  %v3139_v34 = vld [vmem:[%s9066_s0 + $0x2e0] sm:$0x7f]  ;;  %v3625_v19 = vadd.f32 %v7244_v46, %v3137_v60  ;;  %v3626_v58 = vadd.f32 %v7247_v41, %v3138_v0 }
 0x49e   :  { %3823 = vst [vmem:[%s9072_s7 + $0x200] sm:$0x7f] %v3599_v24  ;;  %3824 = vst [vmem:[%s9072_s7 + $0x208] sm:$0x7f] %v3600_v48  ;;  %v3140_v31 = vld [vmem:[%s9066_s0 + $0x2e8] sm:$0x7f]  ;;  %v3627_v45 = vadd.f32 %v7244_v46, %v3139_v34 }
 0x49f   :  { %v3141_v29 = vld [vmem:[%s9066_s0 + $0x2f0] sm:$0x7f]  ;;  %3825 = vst [vmem:[%s9072_s7 + $0x210] sm:$0x7f] %v3601_v28  ;;  %3826 = vst [vmem:[%s9072_s7 + $0x218] sm:$0x7f] %v3602_v11  ;;  %v3628_v63 = vadd.f32 %v7247_v41, %v3140_v31  ;;  %v3349_v31 = vrot.slane %v7150_v18, %v7115_v36 }
 0x4a0   :  { %3827 = vst [vmem:[%s9072_s7 + $0x220] sm:$0x7f] %v3603_v15  ;;  %3828 = vst [vmem:[%s9072_s7 + $0x228] sm:$0x7f] %v3604_v62  ;;  %v3142_v13 = vld [vmem:[%s9066_s0 + $0x2f8] sm:$0x7f]  ;;  %v3629_v33 = vadd.f32 %v7244_v46, %v3141_v29  ;;  %v3356_v29 = vrot.slane %v7153_v22, %v7115_v36 }
 0x4a1   :  { %v3143_v27 = vld [vmem:[%s9066_s0 + $0x300] sm:$0x7f]  ;;  %v3144_v47 = vld [vmem:[%s9066_s0 + $0x308] sm:$0x7f]  ;;  %3829 = vst [vmem:[%s9072_s7 + $0x230] sm:$0x7f] %v3605_v9  ;;  %v3630_v24 = vadd.f32 %v7247_v41, %v3142_v13  ;;  %v3371_v13 = vcombine.high %v3349_v31, %v3349_v31 }
 0x4a2   :  { %3830 = vst [vmem:[%s9072_s7 + $0x238] sm:$0x7f] %v3606_v23  ;;  %3831 = vst [vmem:[%s9072_s7 + $0x240] sm:$0x7f] %v3607_v50  ;;  %v3145_v39 = vld [vmem:[%s9066_s0 + $0x310] sm:$0x7f]  ;;  %v3631_v48 = vadd.f32 %v7244_v46, %v3143_v27  ;;  %v3632_v21 = vadd.f32 %v7247_v41, %v3144_v47  ;;  %v3372_v27 = vcombine.high %v3356_v29, %v3356_v29 }
 0x4a3   :  { %3832 = vst [vmem:[%s9072_s7 + $0x248] sm:$0x7f] %v3608_v37  ;;  %v3146_v1 = vld [vmem:[%s9066_s0 + $0x318] sm:$0x7f]  ;;  %v3147_v14 = vld [vmem:[%s9066_s0 + $0x320] sm:$0x7f]  ;;  %v3633_v5 = vadd.f32 %v7262_v40, %v3145_v39  ;;  %v8117_v47 = vrot.slane %v3349_v31, %v6868_v6 }
 0x4a4   :  { %3833 = vst [vmem:[%s9072_s7 + $0x250] sm:$0x7f] %v3609_v49  ;;  %3834 = vst [vmem:[%s9072_s7 + $0x258] sm:$0x7f] %v3610_v4  ;;  %v3148_v16 = vld [vmem:[%s9066_s0 + $0x328] sm:$0x7f]  ;;  %v3634_v43 = vadd.f32 %v7265_v20, %v3146_v1  ;;  %v3635_v28 = vadd.f32 %v7262_v40, %v3147_v14 }
 0x4a5   :  { %3835 = vst [vmem:[%s9072_s7 + $0x260] sm:$0x7f] %v3611_v10  ;;  %3836 = vst [vmem:[%s9072_s7 + $0x268] sm:$0x7f] %v3612_v25  ;;  %v3149_v12 = vld [vmem:[%s9066_s0 + $0x330] sm:$0x7f]  ;;  %v3636_v11 = vadd.f32 %v7265_v20, %v3148_v16 }
 0x4a6   :  { %v3150_v2 = vld [vmem:[%s9066_s0 + $0x338] sm:$0x7f]  ;;  %3837 = vst [vmem:[%s9072_s7 + $0x270] sm:$0x7f] %v3613_v44  ;;  %3838 = vst [vmem:[%s9072_s7 + $0x278] sm:$0x7f] %v3614_v35  ;;  %v3637_v15 = vadd.f32 %v7262_v40, %v3149_v12  ;;  %v8150_v12 = vrot.slane %v3371_v13, %v6865_v59 }
 0x4a7   :  { %3839 = vst [vmem:[%s9072_s7 + $0x280] sm:$0x7f] %v3615_v3  ;;  %3840 = vst [vmem:[%s9072_s7 + $0x288] sm:$0x7f] %v3616_v30  ;;  %v3151_v26 = vld [vmem:[%s9066_s0 + $0x340] sm:$0x7f]  ;;  %v3638_v62 = vadd.f32 %v7265_v20, %v3150_v2  ;;  %v8153_v2 = vrot.slane %v3371_v13, %v6868_v6 }
 0x4a8   :  { %v3152_v17 = vld [vmem:[%s9066_s0 + $0x348] sm:$0x7f]  ;;  %v3153_v51 = vld [vmem:[%s9066_s0 + $0x350] sm:$0x7f]  ;;  %3841 = vst [vmem:[%s9072_s7 + $0x290] sm:$0x7f] %v3617_v53  ;;  %v3639_v7 = vadd.f32 %v7262_v40, %v3151_v26 }
 0x4a9   :  { %3842 = vst [vmem:[%s9072_s7 + $0x298] sm:$0x7f] %v3618_v61  ;;  %3843 = vst [vmem:[%s9072_s7 + $0x2a0] sm:$0x7f] %v3619_v42  ;;  %v3154_v32 = vld [vmem:[%s9066_s0 + $0x358] sm:$0x7f]  ;;  %v3640_v60 = vadd.f32 %v7265_v20, %v3152_v17  ;;  %v3641_v0 = vadd.f32 %v7262_v40, %v3153_v51 }
 0x4aa   :  { %3844 = vst [vmem:[%s9072_s7 + $0x2a8] sm:$0x7f] %v3620_v52  ;;  %v3155_v8 = vld [vmem:[%s9066_s0 + $0x360] sm:$0x7f]  ;;  %v3156_v54 = vld [vmem:[%s9066_s0 + $0x368] sm:$0x7f]  ;;  %v3642_v9 = vadd.f32 %v7265_v20, %v3154_v32 }
 0x4ab   :  { %3845 = vst [vmem:[%s9072_s7 + $0x2b0] sm:$0x7f] %v3621_v57  ;;  %3846 = vst [vmem:[%s9072_s7 + $0x2b8] sm:$0x7f] %v3622_v38  ;;  %v3157_v46 = vld [vmem:[%s9066_s0 + $0x370] sm:$0x7f]  ;;  %v3643_v23 = vadd.f32 %v7262_v40, %v3155_v8  ;;  %v3644_v50 = vadd.f32 %v7265_v20, %v3156_v54  ;;  %v8156_v57 = vrot.slane %v3356_v29, %v6865_v59 }
 0x4ac   :  { %3847 = vst [vmem:[%s9072_s7 + $0x2c0] sm:$0x7f] %v3623_v56  ;;  %3848 = vst [vmem:[%s9072_s7 + $0x2c8] sm:$0x7f] %v3624_v55  ;;  %v3158_v41 = vld [vmem:[%s9066_s0 + $0x378] sm:$0x7f]  ;;  %v3645_v37 = vadd.f32 %v7262_v40, %v3157_v46  ;;  %v3341_v40 = vcombine.high %v7150_v18, %v7150_v18  ;;  %v8159_v38 = vrot.slane %v3356_v29, %v6868_v6 }
 0x4ad   :  { %3849 = vst [vmem:[%s9072_s7 + $0x2d0] sm:$0x7f] %v3625_v19  ;;  %3850 = vst [vmem:[%s9072_s7 + $0x2d8] sm:$0x7f] %v3626_v58  ;;  %v3646_v34 = vadd.f32 %v7265_v20, %v3158_v41  ;;  %v3342_v20 = vcombine.high %v7153_v22, %v7153_v22  ;;  %v3159_v10 = vld [vmem:[%s9066_s0 + $0x380] sm:$0x7f] }
 0x4ae   :  { %3851 = vst [vmem:[%s9072_s7 + $0x2e0] sm:$0x7f] %v3627_v45  ;;  %3852 = vst [vmem:[%s9072_s7 + $0x2e8] sm:$0x7f] %v3628_v63  ;;  %v3363_v49 = vrot.slane %v3341_v40, %v7115_v36  ;;  %v3160_v18 = vld [vmem:[%s9066_s0 + $0x388] sm:$0x7f] }
 0x4af   :  { %3853 = vst [vmem:[%s9072_s7 + $0x2f0] sm:$0x7f] %v3629_v33  ;;  %3854 = vst [vmem:[%s9072_s7 + $0x2f8] sm:$0x7f] %v3630_v24  ;;  %v3370_v4 = vrot.slane %v3342_v20, %v7115_v36  ;;  %v3161_v22 = vld [vmem:[%s9066_s0 + $0x390] sm:$0x7f]  ;;  %v8114_v36 = vrot.slane %v3349_v31, %v6865_v59  ;;  %v8198_v33 = vrot.slane %v3372_v27, %v6865_v59 }
 0x4b0   :  { %3855 = vst [vmem:[%s9072_s7 + $0x300] sm:$0x7f] %v3631_v48  ;;  %3856 = vst [vmem:[%s9072_s7 + $0x308] sm:$0x7f] %v3632_v21  ;;  %v3162_v25 = vld [vmem:[%s9066_s0 + $0x398] sm:$0x7f]  ;;  %v3373_v39 = vcombine.high %v3363_v49, %v3363_v49  ;;  %v8132_v14 = vrot.slane %v3363_v49, %v6865_v59  ;;  %v8135_v53 = vrot.slane %v3363_v49, %v6868_v6 }
 0x4b1   :  { %3857 = vst [vmem:[%s9072_s7 + $0x310] sm:$0x7f] %v3633_v5  ;;  %3858 = vst [vmem:[%s9072_s7 + $0x318] sm:$0x7f] %v3634_v43  ;;  %v3163_v44 = vld [vmem:[%s9066_s0 + $0x3a0] sm:$0x7f]  ;;  %v3374_v1 = vcombine.high %v3370_v4, %v3370_v4  ;;  %v8180_v58 = vrot.slane %v3370_v4, %v6865_v59  ;;  %v8183_v45 = vrot.slane %v3370_v4, %v6868_v6 }
 0x4b2   :  { %3859 = vst [vmem:[%s9072_s7 + $0x320] sm:$0x7f] %v3635_v28  ;;  %3860 = vst [vmem:[%s9072_s7 + $0x328] sm:$0x7f] %v3636_v11  ;;  %v3164_v35 = vld [vmem:[%s9066_s0 + $0x3a8] sm:$0x7f]  ;;  %v8174_v51 = vrot.slane %v3373_v39, %v6865_v59  ;;  %v8177_v19 = vrot.slane %v3373_v39, %v6868_v6  ;;  %v8201_v24 = vrot.slane %v3372_v27, %v6868_v6 }
 0x4b3   :  { %3861 = vst [vmem:[%s9072_s7 + $0x330] sm:$0x7f] %v3637_v15  ;;  %3862 = vst [vmem:[%s9072_s7 + $0x338] sm:$0x7f] %v3638_v62  ;;  %v3165_v3 = vld [vmem:[%s9066_s0 + $0x3b0] sm:$0x7f]  ;;  %v8204_v48 = vrot.slane %v3374_v1, %v6865_v59  ;;  %v8207_v21 = vrot.slane %v3374_v1, %v6868_v6  ;;  %v3647_v43 = vadd.f32 %v8114_v36, %v3159_v10 }
 0x4b4   :  { %3863 = vst [vmem:[%s9072_s7 + $0x340] sm:$0x7f] %v3639_v7  ;;  %3864 = vst [vmem:[%s9072_s7 + $0x348] sm:$0x7f] %v3640_v60  ;;  %v3166_v30 = vld [vmem:[%s9066_s0 + $0x3b8] sm:$0x7f]  ;;  %v3648_v6 = vadd.f32 %v8117_v47, %v3160_v18  ;;  %v3649_v28 = vadd.f32 %v8114_v36, %v3161_v22  ;;  %v3650_v11 = vadd.f32 %v8117_v47, %v3162_v25 }
 0x4b5   :  { %3865 = vst [vmem:[%s9072_s7 + $0x350] sm:$0x7f] %v3641_v0  ;;  %3866 = vst [vmem:[%s9072_s7 + $0x358] sm:$0x7f] %v3642_v9  ;;  %v3167_v61 = vld [vmem:[%s9066_s0 + $0x3c0] sm:$0x7f]  ;;  %v3651_v0 = vadd.f32 %v8114_v36, %v3163_v44  ;;  %v3652_v9 = vadd.f32 %v8117_v47, %v3164_v35 }
 0x4b6   :  { %3867 = vst [vmem:[%s9072_s7 + $0x360] sm:$0x7f] %v3643_v23  ;;  %3868 = vst [vmem:[%s9072_s7 + $0x368] sm:$0x7f] %v3644_v50  ;;  %v3168_v42 = vld [vmem:[%s9066_s0 + $0x3c8] sm:$0x7f]  ;;  %v3653_v23 = vadd.f32 %v8114_v36, %v3165_v3  ;;  %v3654_v50 = vadd.f32 %v8117_v47, %v3166_v30  ;;  %v3655_v31 = vadd.f32 %v8114_v36, %v3167_v61 }
 0x4b7   :  { %3869 = vst [vmem:[%s9072_s7 + $0x370] sm:$0x7f] %v3645_v37  ;;  %3870 = vst [vmem:[%s9072_s7 + $0x378] sm:$0x7f] %v3646_v34  ;;  %v3169_v52 = vld [vmem:[%s9066_s0 + $0x3d0] sm:$0x7f]  ;;  %v3656_v29 = vadd.f32 %v8117_v47, %v3168_v42 }
 0x4b8   :  { %v3170_v16 = vld [vmem:[%s9066_s0 + $0x3d8] sm:$0x7f]  ;;  %v3171_v56 = vld [vmem:[%s9066_s0 + $0x3e0] sm:$0x7f]  ;;  %v3172_v55 = vld [vmem:[%s9066_s0 + $0x3e8] sm:$0x7f]  ;;  %v3657_v49 = vadd.f32 %v8114_v36, %v3169_v52 }
 0x4b9   :  { %v3173_v26 = vld [vmem:[%s9066_s0 + $0x3f0] sm:$0x7f]  ;;  %v3174_v17 = vld [vmem:[%s9066_s0 + $0x3f8] sm:$0x7f]  ;;  %v3175_v63 = vld [vmem:[%s9066_s0 + $0x400] sm:$0x7f]  ;;  %v3658_v4 = vadd.f32 %v8117_v47, %v3170_v16  ;;  %v3659_v13 = vadd.f32 %v8114_v36, %v3171_v56  ;;  %v3660_v27 = vadd.f32 %v8117_v47, %v3172_v55 }
 0x4ba   :  { %v3176_v32 = vld [vmem:[%s9066_s0 + $0x408] sm:$0x7f]  ;;  %v3177_v8 = vld [vmem:[%s9066_s0 + $0x410] sm:$0x7f]  ;;  %v3178_v54 = vld [vmem:[%s9066_s0 + $0x418] sm:$0x7f]  ;;  %v3661_v44 = vadd.f32 %v8132_v14, %v3173_v26  ;;  %v3662_v35 = vadd.f32 %v8135_v53, %v3174_v17  ;;  %v3663_v39 = vadd.f32 %v8132_v14, %v3175_v63 }
 0x4bb   :  { %v3179_v46 = vld [vmem:[%s9066_s0 + $0x420] sm:$0x7f]  ;;  %v3180_v41 = vld [vmem:[%s9066_s0 + $0x428] sm:$0x7f]  ;;  %v3181_v5 = vld [vmem:[%s9066_s0 + $0x430] sm:$0x7f]  ;;  %v3664_v1 = vadd.f32 %v8135_v53, %v3176_v32  ;;  %v3665_v61 = vadd.f32 %v8132_v14, %v3177_v8  ;;  %v3666_v42 = vadd.f32 %v8135_v53, %v3178_v54 }
 0x4bc   :  { %v3182_v59 = vld [vmem:[%s9066_s0 + $0x438] sm:$0x7f]  ;;  %v3183_v15 = vld [vmem:[%s9066_s0 + $0x440] sm:$0x7f]  ;;  %v3184_v62 = vld [vmem:[%s9066_s0 + $0x448] sm:$0x7f]  ;;  %v3667_v26 = vadd.f32 %v8132_v14, %v3179_v46  ;;  %v3668_v17 = vadd.f32 %v8135_v53, %v3180_v41  ;;  %v3669_v63 = vadd.f32 %v8132_v14, %v3181_v5 }
 0x4bd   :  { %v3185_v7 = vld [vmem:[%s9066_s0 + $0x450] sm:$0x7f]  ;;  %v3186_v60 = vld [vmem:[%s9066_s0 + $0x458] sm:$0x7f]  ;;  %v8244_v37 = vld [vmem:[%s9066_s0 + $0x460] sm:$0x7f]  ;;  %v3670_v32 = vadd.f32 %v8135_v53, %v3182_v59  ;;  %v3671_v5 = vadd.f32 %v8132_v14, %v3183_v15  ;;  %v3672_v59 = vadd.f32 %v8135_v53, %v3184_v62 }
 0x4be   :  { %v8249_v34 = vld [vmem:[%s9066_s0 + $0x468] sm:$0x7f]  ;;  %v8254_v40 = vld [vmem:[%s9066_s0 + $0x470] sm:$0x7f]  ;;  %v8259_v20 = vld [vmem:[%s9066_s0 + $0x478] sm:$0x7f]  ;;  %v3675_v15 = vadd.f32 %v8150_v12, %v8244_v37 }
 0x4bf   :  { %3871 = vst [vmem:[%s9072_s7 + $0x380] sm:$0x7f] %v3647_v43  ;;  %3872 = vst [vmem:[%s9072_s7 + $0x388] sm:$0x7f] %v3648_v6  ;;  %v8280_v10 = vld [vmem:[%s9066_s0 + $0x480] sm:$0x7f]  ;;  %v3673_v43 = vadd.f32 %v8132_v14, %v3185_v7  ;;  %v3674_v6 = vadd.f32 %v8135_v53, %v3186_v60  ;;  %v3676_v62 = vadd.f32 %v8153_v2, %v8249_v34 }
 0x4c0   :  { %3873 = vst [vmem:[%s9072_s7 + $0x390] sm:$0x7f] %v3649_v28  ;;  %3874 = vst [vmem:[%s9072_s7 + $0x398] sm:$0x7f] %v3650_v11  ;;  %v8285_v18 = vld [vmem:[%s9066_s0 + $0x488] sm:$0x7f]  ;;  %v3677_v7 = vadd.f32 %v8150_v12, %v8254_v40  ;;  %v3678_v60 = vadd.f32 %v8153_v2, %v8259_v20  ;;  %v3679_v37 = vadd.f32 %v8150_v12, %v8280_v10 }
 0x4c1   :  { %v8290_v22 = vld [vmem:[%s9066_s0 + $0x490] sm:$0x7f]  ;;  %v8295_v25 = vld [vmem:[%s9066_s0 + $0x498] sm:$0x7f]  ;;  %3875 = vst [vmem:[%s9072_s7 + $0x3a0] sm:$0x7f] %v3651_v0  ;;  %v3680_v34 = vadd.f32 %v8153_v2, %v8285_v18 }
 0x4c2   :  { %3876 = vst [vmem:[%s9072_s7 + $0x3a8] sm:$0x7f] %v3652_v9  ;;  %3877 = vst [vmem:[%s9072_s7 + $0x3b0] sm:$0x7f] %v3653_v23  ;;  %v8316_v36 = vld [vmem:[%s9066_s0 + $0x4a0] sm:$0x7f]  ;;  %v3681_v40 = vadd.f32 %v8150_v12, %v8290_v22  ;;  %v3682_v20 = vadd.f32 %v8153_v2, %v8295_v25 }
 0x4c3   :  { %3878 = vst [vmem:[%s9072_s7 + $0x3b8] sm:$0x7f] %v3654_v50  ;;  %v8321_v47 = vld [vmem:[%s9066_s0 + $0x4a8] sm:$0x7f]  ;;  %v8326_v3 = vld [vmem:[%s9066_s0 + $0x4b0] sm:$0x7f]  ;;  %v3683_v10 = vadd.f32 %v8150_v12, %v8316_v36 }
 0x4c4   :  { %v8331_v30 = vld [vmem:[%s9066_s0 + $0x4b8] sm:$0x7f]  ;;  %3879 = vst [vmem:[%s9072_s7 + $0x3c0] sm:$0x7f] %v3655_v31  ;;  %3880 = vst [vmem:[%s9072_s7 + $0x3c8] sm:$0x7f] %v3656_v29  ;;  %v3684_v18 = vadd.f32 %v8153_v2, %v8321_v47  ;;  %v3685_v22 = vadd.f32 %v8150_v12, %v8326_v3 }
 0x4c5   :  { %3881 = vst [vmem:[%s9072_s7 + $0x3d0] sm:$0x7f] %v3657_v49  ;;  %3882 = vst [vmem:[%s9072_s7 + $0x3d8] sm:$0x7f] %v3658_v4  ;;  %v8352_v52 = vld [vmem:[%s9066_s0 + $0x4c0] sm:$0x7f]  ;;  %v3686_v25 = vadd.f32 %v8153_v2, %v8331_v30 }
 0x4c6   :  { %v8357_v16 = vld [vmem:[%s9066_s0 + $0x4c8] sm:$0x7f]  ;;  %v8362_v56 = vld [vmem:[%s9066_s0 + $0x4d0] sm:$0x7f]  ;;  %v8367_v55 = vld [vmem:[%s9066_s0 + $0x4d8] sm:$0x7f]  ;;  %v3687_v36 = vadd.f32 %v8150_v12, %v8352_v52 }
 0x4c7   :  { %3883 = vst [vmem:[%s9072_s7 + $0x3e0] sm:$0x7f] %v3659_v13  ;;  %3884 = vst [vmem:[%s9072_s7 + $0x3e8] sm:$0x7f] %v3660_v27  ;;  %v8388_v8 = vld [vmem:[%s9066_s0 + $0x4e0] sm:$0x7f]  ;;  %v3688_v47 = vadd.f32 %v8153_v2, %v8357_v16  ;;  %v3689_v3 = vadd.f32 %v8174_v51, %v8362_v56  ;;  %v3690_v30 = vadd.f32 %v8177_v19, %v8367_v55 }
 0x4c8   :  { %3885 = vst [vmem:[%s9072_s7 + $0x3f0] sm:$0x7f] %v3661_v44  ;;  %3886 = vst [vmem:[%s9072_s7 + $0x3f8] sm:$0x7f] %v3662_v35  ;;  %v8393_v54 = vld [vmem:[%s9066_s0 + $0x4e8] sm:$0x7f] }
 0x4c9   :  { %v8398_v46 = vld [vmem:[%s9066_s0 + $0x4f0] sm:$0x7f]  ;;  %v8403_v41 = vld [vmem:[%s9066_s0 + $0x4f8] sm:$0x7f]  ;;  %3887 = vst [vmem:[%s9072_s7 + $0x400] sm:$0x7f] %v3663_v39 }
 0x4ca   :  { %3888 = vst [vmem:[%s9072_s7 + $0x408] sm:$0x7f] %v3664_v1  ;;  %3889 = vst [vmem:[%s9072_s7 + $0x410] sm:$0x7f] %v3665_v61  ;;  %v8424_v14 = vld [vmem:[%s9066_s0 + $0x500] sm:$0x7f]  ;;  %v3691_v61 = vadd.f32 %v8174_v51, %v8388_v8  ;;  %v3693_v52 = vadd.f32 %v8174_v51, %v8398_v46  ;;  %v3694_v16 = vadd.f32 %v8177_v19, %v8403_v41 }
 0x4cb   :  { %3890 = vst [vmem:[%s9072_s7 + $0x418] sm:$0x7f] %v3666_v42  ;;  %v8429_v53 = vld [vmem:[%s9066_s0 + $0x508] sm:$0x7f]  ;;  %v8434_v28 = vld [vmem:[%s9066_s0 + $0x510] sm:$0x7f]  ;;  %v3692_v42 = vadd.f32 %v8177_v19, %v8393_v54 }
 0x4cc   :  { %v8439_v11 = vld [vmem:[%s9066_s0 + $0x518] sm:$0x7f]  ;;  %3891 = vst [vmem:[%s9072_s7 + $0x420] sm:$0x7f] %v3667_v26  ;;  %3892 = vst [vmem:[%s9072_s7 + $0x428] sm:$0x7f] %v3668_v17  ;;  %v3697_v8 = vadd.f32 %v8174_v51, %v8434_v28 }
 0x4cd   :  { %3893 = vst [vmem:[%s9072_s7 + $0x430] sm:$0x7f] %v3669_v63  ;;  %3894 = vst [vmem:[%s9072_s7 + $0x438] sm:$0x7f] %v3670_v32  ;;  %v8464_v0 = vld [vmem:[%s9066_s0 + $0x520] sm:$0x7f]  ;;  %v3695_v63 = vadd.f32 %v8174_v51, %v8424_v14  ;;  %v3696_v32 = vadd.f32 %v8177_v19, %v8429_v53  ;;  %v3698_v54 = vadd.f32 %v8177_v19, %v8439_v11 }
 0x4ce   :  { %v8469_v9 = vld [vmem:[%s9066_s0 + $0x528] sm:$0x7f]  ;;  %v8474_v23 = vld [vmem:[%s9066_s0 + $0x530] sm:$0x7f]  ;;  %v8479_v50 = vld [vmem:[%s9066_s0 + $0x538] sm:$0x7f] }
 0x4cf   :  { %3895 = vst [vmem:[%s9072_s7 + $0x440] sm:$0x7f] %v3671_v5  ;;  %3896 = vst [vmem:[%s9072_s7 + $0x448] sm:$0x7f] %v3672_v59  ;;  %v8504_v31 = vld [vmem:[%s9066_s0 + $0x540] sm:$0x7f]  ;;  %v3701_v14 = vadd.f32 %v8174_v51, %v8474_v23  ;;  %v3702_v53 = vadd.f32 %v8177_v19, %v8479_v50 }
 0x4d0   :  { %3897 = vst [vmem:[%s9072_s7 + $0x450] sm:$0x7f] %v3673_v43  ;;  %3898 = vst [vmem:[%s9072_s7 + $0x458] sm:$0x7f] %v3674_v6  ;;  %v8509_v29 = vld [vmem:[%s9066_s0 + $0x548] sm:$0x7f]  ;;  %v3699_v43 = vadd.f32 %v8174_v51, %v8464_v0  ;;  %v3700_v6 = vadd.f32 %v8177_v19, %v8469_v9 }
 0x4d1   :  { %v8514_v49 = vld [vmem:[%s9066_s0 + $0x550] sm:$0x7f]  ;;  %v8519_v4 = vld [vmem:[%s9066_s0 + $0x558] sm:$0x7f]  ;;  %3899 = vst [vmem:[%s9072_s7 + $0x460] sm:$0x7f] %v3675_v15  ;;  %v3703_v15 = vadd.f32 %v8156_v57, %v8504_v31 }
 0x4d2   :  { %3900 = vst [vmem:[%s9072_s7 + $0x468] sm:$0x7f] %v3676_v62  ;;  %3901 = vst [vmem:[%s9072_s7 + $0x470] sm:$0x7f] %v3677_v7  ;;  %v8544_v13 = vld [vmem:[%s9066_s0 + $0x560] sm:$0x7f]  ;;  %v3704_v62 = vadd.f32 %v8159_v38, %v8509_v29  ;;  %v3705_v7 = vadd.f32 %v8156_v57, %v8514_v49 }
 0x4d3   :  { %3902 = vst [vmem:[%s9072_s7 + $0x478] sm:$0x7f] %v3678_v60  ;;  %v8549_v27 = vld [vmem:[%s9066_s0 + $0x568] sm:$0x7f]  ;;  %v8554_v44 = vld [vmem:[%s9066_s0 + $0x570] sm:$0x7f]  ;;  %v3706_v60 = vadd.f32 %v8159_v38, %v8519_v4 }
 0x4d4   :  { %v8559_v35 = vld [vmem:[%s9066_s0 + $0x578] sm:$0x7f]  ;;  %3903 = vst [vmem:[%s9072_s7 + $0x480] sm:$0x7f] %v3679_v37  ;;  %3904 = vst [vmem:[%s9072_s7 + $0x488] sm:$0x7f] %v3680_v34  ;;  %v3707_v37 = vadd.f32 %v8156_v57, %v8544_v13  ;;  %v3708_v34 = vadd.f32 %v8159_v38, %v8549_v27 }
 0x4d5   :  { %3905 = vst [vmem:[%s9072_s7 + $0x490] sm:$0x7f] %v3681_v40  ;;  %3906 = vst [vmem:[%s9072_s7 + $0x498] sm:$0x7f] %v3682_v20  ;;  %v8584_v12 = vld [vmem:[%s9066_s0 + $0x580] sm:$0x7f]  ;;  %v3709_v40 = vadd.f32 %v8156_v57, %v8554_v44  ;;  %v3710_v20 = vadd.f32 %v8159_v38, %v8559_v35 }
 0x4d6   :  { %v8589_v2 = vld [vmem:[%s9066_s0 + $0x588] sm:$0x7f]  ;;  %v8594_v39 = vld [vmem:[%s9066_s0 + $0x590] sm:$0x7f]  ;;  %v8599_v1 = vld [vmem:[%s9066_s0 + $0x598] sm:$0x7f] }
 0x4d7   :  { %3907 = vst [vmem:[%s9072_s7 + $0x4a0] sm:$0x7f] %v3683_v10  ;;  %3908 = vst [vmem:[%s9072_s7 + $0x4a8] sm:$0x7f] %v3684_v18  ;;  %v8624_v56 = vld [vmem:[%s9066_s0 + $0x5a0] sm:$0x7f]  ;;  %v3711_v10 = vadd.f32 %v8156_v57, %v8584_v12  ;;  %v3712_v18 = vadd.f32 %v8159_v38, %v8589_v2 }
 0x4d8   :  { %3909 = vst [vmem:[%s9072_s7 + $0x4b0] sm:$0x7f] %v3685_v22  ;;  %3910 = vst [vmem:[%s9072_s7 + $0x4b8] sm:$0x7f] %v3686_v25  ;;  %v8629_v55 = vld [vmem:[%s9066_s0 + $0x5a8] sm:$0x7f]  ;;  %v3713_v22 = vadd.f32 %v8156_v57, %v8594_v39  ;;  %v3714_v25 = vadd.f32 %v8159_v38, %v8599_v1  ;;  %v3715_v35 = vadd.f32 %v8156_v57, %v8624_v56 }
 0x4d9   :  { %v8634_v26 = vld [vmem:[%s9066_s0 + $0x5b0] sm:$0x7f]  ;;  %v8639_v17 = vld [vmem:[%s9066_s0 + $0x5b8] sm:$0x7f]  ;;  %3911 = vst [vmem:[%s9072_s7 + $0x4c0] sm:$0x7f] %v3687_v36  ;;  %v3716_v36 = vadd.f32 %v8159_v38, %v8629_v55 }
 0x4da   :  { %3912 = vst [vmem:[%s9072_s7 + $0x4c8] sm:$0x7f] %v3688_v47  ;;  %3913 = vst [vmem:[%s9072_s7 + $0x4d0] sm:$0x7f] %v3689_v3  ;;  %v3231_v46 = vld [vmem:[%s9066_s0 + $0x5c0] sm:$0x7f]  ;;  %v3717_v47 = vadd.f32 %v8180_v58, %v8634_v26  ;;  %v3718_v3 = vadd.f32 %v8183_v45, %v8639_v17 }
 0x4db   :  { %3914 = vst [vmem:[%s9072_s7 + $0x4d8] sm:$0x7f] %v3690_v30  ;;  %v3232_v41 = vld [vmem:[%s9066_s0 + $0x5c8] sm:$0x7f]  ;;  %v3233_v5 = vld [vmem:[%s9066_s0 + $0x5d0] sm:$0x7f]  ;;  %v3719_v12 = vadd.f32 %v8180_v58, %v3231_v46 }
 0x4dc   :  { %v3234_v59 = vld [vmem:[%s9066_s0 + $0x5d8] sm:$0x7f]  ;;  %3915 = vst [vmem:[%s9072_s7 + $0x4e0] sm:$0x7f] %v3691_v61  ;;  %3916 = vst [vmem:[%s9072_s7 + $0x4e8] sm:$0x7f] %v3692_v42  ;;  %v3720_v2 = vadd.f32 %v8183_v45, %v3232_v41  ;;  %v3721_v39 = vadd.f32 %v8180_v58, %v3233_v5 }
 0x4dd   :  { %3917 = vst [vmem:[%s9072_s7 + $0x4f0] sm:$0x7f] %v3693_v52  ;;  %3918 = vst [vmem:[%s9072_s7 + $0x4f8] sm:$0x7f] %v3694_v16  ;;  %v3235_v51 = vld [vmem:[%s9066_s0 + $0x5e0] sm:$0x7f]  ;;  %v3722_v1 = vadd.f32 %v8183_v45, %v3234_v59 }
 0x4de   :  { %v3236_v19 = vld [vmem:[%s9066_s0 + $0x5e8] sm:$0x7f]  ;;  %v3237_v28 = vld [vmem:[%s9066_s0 + $0x5f0] sm:$0x7f]  ;;  %v3238_v11 = vld [vmem:[%s9066_s0 + $0x5f8] sm:$0x7f]  ;;  %v3723_v16 = vadd.f32 %v8180_v58, %v3235_v51 }
 0x4df   :  { %3919 = vst [vmem:[%s9072_s7 + $0x500] sm:$0x7f] %v3695_v63  ;;  %3920 = vst [vmem:[%s9072_s7 + $0x508] sm:$0x7f] %v3696_v32  ;;  %v3239_v0 = vld [vmem:[%s9066_s0 + $0x600] sm:$0x7f]  ;;  %v3724_v56 = vadd.f32 %v8183_v45, %v3236_v19  ;;  %v3725_v55 = vadd.f32 %v8180_v58, %v3237_v28  ;;  %v3726_v26 = vadd.f32 %v8183_v45, %v3238_v11 }
 0x4e0   :  { %3921 = vst [vmem:[%s9072_s7 + $0x510] sm:$0x7f] %v3697_v8  ;;  %3922 = vst [vmem:[%s9072_s7 + $0x518] sm:$0x7f] %v3698_v54  ;;  %v3240_v9 = vld [vmem:[%s9066_s0 + $0x608] sm:$0x7f]  ;;  %v3727_v8 = vadd.f32 %v8180_v58, %v3239_v0 }
 0x4e1   :  { %v3241_v23 = vld [vmem:[%s9066_s0 + $0x610] sm:$0x7f]  ;;  %v3242_v50 = vld [vmem:[%s9066_s0 + $0x618] sm:$0x7f]  ;;  %3923 = vst [vmem:[%s9072_s7 + $0x520] sm:$0x7f] %v3699_v43  ;;  %v3728_v54 = vadd.f32 %v8183_v45, %v3240_v9 }
 0x4e2   :  { %3924 = vst [vmem:[%s9072_s7 + $0x528] sm:$0x7f] %v3700_v6  ;;  %3925 = vst [vmem:[%s9072_s7 + $0x530] sm:$0x7f] %v3701_v14  ;;  %v3243_v31 = vld [vmem:[%s9066_s0 + $0x620] sm:$0x7f]  ;;  %v3729_v46 = vadd.f32 %v8180_v58, %v3241_v23  ;;  %v3730_v41 = vadd.f32 %v8183_v45, %v3242_v50 }
 0x4e3   :  { %3926 = vst [vmem:[%s9072_s7 + $0x538] sm:$0x7f] %v3702_v53  ;;  %v3244_v29 = vld [vmem:[%s9066_s0 + $0x628] sm:$0x7f]  ;;  %v3245_v49 = vld [vmem:[%s9066_s0 + $0x630] sm:$0x7f]  ;;  %v3731_v59 = vadd.f32 %v8198_v33, %v3243_v31 }
 0x4e4   :  { %v3246_v4 = vld [vmem:[%s9066_s0 + $0x638] sm:$0x7f]  ;;  %3927 = vst [vmem:[%s9072_s7 + $0x540] sm:$0x7f] %v3703_v15  ;;  %3928 = vst [vmem:[%s9072_s7 + $0x548] sm:$0x7f] %v3704_v62  ;;  %v3732_v43 = vadd.f32 %v8201_v24, %v3244_v29  ;;  %v3733_v6 = vadd.f32 %v8198_v33, %v3245_v49 }
 0x4e5   :  { %3929 = vst [vmem:[%s9072_s7 + $0x550] sm:$0x7f] %v3705_v7  ;;  %3930 = vst [vmem:[%s9072_s7 + $0x558] sm:$0x7f] %v3706_v60  ;;  %v3247_v13 = vld [vmem:[%s9066_s0 + $0x640] sm:$0x7f]  ;;  %v3734_v14 = vadd.f32 %v8201_v24, %v3246_v4 }
 0x4e6   :  { %v3248_v27 = vld [vmem:[%s9066_s0 + $0x648] sm:$0x7f]  ;;  %v3249_v44 = vld [vmem:[%s9066_s0 + $0x650] sm:$0x7f]  ;;  %3931 = vst [vmem:[%s9072_s7 + $0x560] sm:$0x7f] %v3707_v37  ;;  %v3735_v28 = vadd.f32 %v8198_v33, %v3247_v13 }
 0x4e7   :  { %3932 = vst [vmem:[%s9072_s7 + $0x568] sm:$0x7f] %v3708_v34  ;;  %3933 = vst [vmem:[%s9072_s7 + $0x570] sm:$0x7f] %v3709_v40  ;;  %v3250_v57 = vld [vmem:[%s9066_s0 + $0x658] sm:$0x7f]  ;;  %v3736_v11 = vadd.f32 %v8201_v24, %v3248_v27  ;;  %v3737_v15 = vadd.f32 %v8198_v33, %v3249_v44 }
 0x4e8   :  { %3934 = vst [vmem:[%s9072_s7 + $0x578] sm:$0x7f] %v3710_v20  ;;  %v3251_v38 = vld [vmem:[%s9066_s0 + $0x660] sm:$0x7f]  ;;  %v3252_v30 = vld [vmem:[%s9066_s0 + $0x668] sm:$0x7f]  ;;  %v3738_v62 = vadd.f32 %v8201_v24, %v3250_v57 }
 0x4e9   :  { %3935 = vst [vmem:[%s9072_s7 + $0x580] sm:$0x7f] %v3711_v10  ;;  %3936 = vst [vmem:[%s9072_s7 + $0x588] sm:$0x7f] %v3712_v18  ;;  %v3253_v61 = vld [vmem:[%s9066_s0 + $0x670] sm:$0x7f]  ;;  %v3739_v9 = vadd.f32 %v8198_v33, %v3251_v38  ;;  %v3740_v23 = vadd.f32 %v8201_v24, %v3252_v30 }
 0x4ea   :  { %3937 = vst [vmem:[%s9072_s7 + $0x590] sm:$0x7f] %v3713_v22  ;;  %3938 = vst [vmem:[%s9072_s7 + $0x598] sm:$0x7f] %v3714_v25  ;;  %v3254_v42 = vld [vmem:[%s9066_s0 + $0x678] sm:$0x7f]  ;;  %v3741_v50 = vadd.f32 %v8198_v33, %v3253_v61 }
 0x4eb   :  { %v3255_v52 = vld [vmem:[%s9066_s0 + $0x680] sm:$0x7f]  ;;  %3939 = vst [vmem:[%s9072_s7 + $0x5a0] sm:$0x7f] %v3715_v35  ;;  %3940 = vst [vmem:[%s9072_s7 + $0x5a8] sm:$0x7f] %v3716_v36  ;;  %v3742_v37 = vadd.f32 %v8201_v24, %v3254_v42 }
 0x4ec   :  { %3941 = vst [vmem:[%s9072_s7 + $0x5b0] sm:$0x7f] %v3717_v47  ;;  %3942 = vst [vmem:[%s9072_s7 + $0x5b8] sm:$0x7f] %v3718_v3  ;;  %v3256_v17 = vld [vmem:[%s9066_s0 + $0x688] sm:$0x7f]  ;;  %v3743_v31 = vadd.f32 %v8198_v33, %v3255_v52 }
 0x4ed   :  { %v3257_v63 = vld [vmem:[%s9066_s0 + $0x690] sm:$0x7f]  ;;  %v3258_v32 = vld [vmem:[%s9066_s0 + $0x698] sm:$0x7f]  ;;  %3943 = vst [vmem:[%s9072_s7 + $0x5c0] sm:$0x7f] %v3719_v12  ;;  %v3744_v29 = vadd.f32 %v8201_v24, %v3256_v17 }
 0x4ee   :  { %3944 = vst [vmem:[%s9072_s7 + $0x5c8] sm:$0x7f] %v3720_v2  ;;  %3945 = vst [vmem:[%s9072_s7 + $0x5d0] sm:$0x7f] %v3721_v39  ;;  %v3259_v58 = vld [vmem:[%s9066_s0 + $0x6a0] sm:$0x7f]  ;;  %v3745_v49 = vadd.f32 %v8204_v48, %v3257_v63  ;;  %v3746_v4 = vadd.f32 %v8207_v21, %v3258_v32 }
 0x4ef   :  { %3946 = vst [vmem:[%s9072_s7 + $0x5d8] sm:$0x7f] %v3722_v1  ;;  %v3260_v45 = vld [vmem:[%s9066_s0 + $0x6a8] sm:$0x7f]  ;;  %v3261_v5 = vld [vmem:[%s9066_s0 + $0x6b0] sm:$0x7f]  ;;  %v3747_v33 = vadd.f32 %v8204_v48, %v3259_v58 }
 0x4f0   :  { %3947 = vst [vmem:[%s9072_s7 + $0x5e0] sm:$0x7f] %v3723_v16  ;;  %3948 = vst [vmem:[%s9072_s7 + $0x5e8] sm:$0x7f] %v3724_v56  ;;  %v3262_v53 = vld [vmem:[%s9066_s0 + $0x6b8] sm:$0x7f]  ;;  %v3748_v24 = vadd.f32 %v8207_v21, %v3260_v45  ;;  %v3749_v10 = vadd.f32 %v8204_v48, %v3261_v5 }
 0x4f1   :  { %3949 = vst [vmem:[%s9072_s7 + $0x5f0] sm:$0x7f] %v3725_v55  ;;  %3950 = vst [vmem:[%s9072_s7 + $0x5f8] sm:$0x7f] %v3726_v26  ;;  %v3263_v51 = vld [vmem:[%s9066_s0 + $0x6c0] sm:$0x7f]  ;;  %v3750_v18 = vadd.f32 %v8207_v21, %v3262_v53 }
 0x4f2   :  { %v3264_v19 = vld [vmem:[%s9066_s0 + $0x6c8] sm:$0x7f]  ;;  %3951 = vst [vmem:[%s9072_s7 + $0x600] sm:$0x7f] %v3727_v8  ;;  %3952 = vst [vmem:[%s9072_s7 + $0x608] sm:$0x7f] %v3728_v54  ;;  %v3751_v22 = vadd.f32 %v8204_v48, %v3263_v51 }
 0x4f3   :  { %3953 = vst [vmem:[%s9072_s7 + $0x610] sm:$0x7f] %v3729_v46  ;;  %3954 = vst [vmem:[%s9072_s7 + $0x618] sm:$0x7f] %v3730_v41  ;;  %v3265_v7 = vld [vmem:[%s9066_s0 + $0x6d0] sm:$0x7f]  ;;  %v3752_v25 = vadd.f32 %v8207_v21, %v3264_v19 }
 0x4f4   :  { %v3266_v60 = vld [vmem:[%s9066_s0 + $0x6d8] sm:$0x7f]  ;;  %v3267_v0 = vld [vmem:[%s9066_s0 + $0x6e0] sm:$0x7f]  ;;  %3955 = vst [vmem:[%s9072_s7 + $0x620] sm:$0x7f] %v3731_v59  ;;  %v3753_v13 = vadd.f32 %v8204_v48, %v3265_v7 }
 0x4f5   :  { %3956 = vst [vmem:[%s9072_s7 + $0x628] sm:$0x7f] %v3732_v43  ;;  %3957 = vst [vmem:[%s9072_s7 + $0x630] sm:$0x7f] %v3733_v6  ;;  %v3268_v34 = vld [vmem:[%s9066_s0 + $0x6e8] sm:$0x7f]  ;;  %v3754_v27 = vadd.f32 %v8207_v21, %v3266_v60  ;;  %v3755_v44 = vadd.f32 %v8204_v48, %v3267_v0 }
 0x4f6   :  { %3958 = vst [vmem:[%s9072_s7 + $0x638] sm:$0x7f] %v3734_v14  ;;  %v3269_v40 = vld [vmem:[%s9066_s0 + $0x6f0] sm:$0x7f]  ;;  %v3270_v20 = vld [vmem:[%s9066_s0 + $0x6f8] sm:$0x7f]  ;;  %v3756_v35 = vadd.f32 %v8207_v21, %v3268_v34 }
 0x4f7   :  { %3959 = vst [vmem:[%s9072_s7 + $0x640] sm:$0x7f] %v3735_v28  ;;  %3960 = vst [vmem:[%s9072_s7 + $0x648] sm:$0x7f] %v3736_v11  ;;  %v3757_v36 = vadd.f32 %v8204_v48, %v3269_v40  ;;  %v3758_v47 = vadd.f32 %v8207_v21, %v3270_v20 }
 0x4f8   :  { %3961 = vst [vmem:[%s9072_s7 + $0x650] sm:$0x7f] %v3737_v15  ;;  %3962 = vst [vmem:[%s9072_s7 + $0x658] sm:$0x7f] %v3738_v62 }
 0x4f9   :  { %3963 = vst [vmem:[%s9072_s7 + $0x660] sm:$0x7f] %v3739_v9  ;;  %3964 = vst [vmem:[%s9072_s7 + $0x668] sm:$0x7f] %v3740_v23 }
 0x4fa   :  { %3965 = vst [vmem:[%s9072_s7 + $0x670] sm:$0x7f] %v3741_v50  ;;  %3966 = vst [vmem:[%s9072_s7 + $0x678] sm:$0x7f] %v3742_v37 }
 0x4fb   :  { %3967 = vst [vmem:[%s9072_s7 + $0x680] sm:$0x7f] %v3743_v31  ;;  %3968 = vst [vmem:[%s9072_s7 + $0x688] sm:$0x7f] %v3744_v29 }
 0x4fc   :  { %3969 = vst [vmem:[%s9072_s7 + $0x690] sm:$0x7f] %v3745_v49  ;;  %3970 = vst [vmem:[%s9072_s7 + $0x698] sm:$0x7f] %v3746_v4 }
 0x4fd   :  { %3971 = vst [vmem:[%s9072_s7 + $0x6a0] sm:$0x7f] %v3747_v33  ;;  %3972 = vst [vmem:[%s9072_s7 + $0x6a8] sm:$0x7f] %v3748_v24 }
 0x4fe   :  { %3973 = vst [vmem:[%s9072_s7 + $0x6b0] sm:$0x7f] %v3749_v10  ;;  %3974 = vst [vmem:[%s9072_s7 + $0x6b8] sm:$0x7f] %v3750_v18 }
 0x4ff   :  { %3975 = vst [vmem:[%s9072_s7 + $0x6c0] sm:$0x7f] %v3751_v22  ;;  %3976 = vst [vmem:[%s9072_s7 + $0x6c8] sm:$0x7f] %v3752_v25 }
 0x500   :  { %3977 = vst [vmem:[%s9072_s7 + $0x6d0] sm:$0x7f] %v3753_v13  ;;  %3978 = vst [vmem:[%s9072_s7 + $0x6d8] sm:$0x7f] %v3754_v27 }
 0x501   :  { %3979 = vst [vmem:[%s9072_s7 + $0x6e0] sm:$0x7f] %v3755_v44  ;;  %3980 = vst [vmem:[%s9072_s7 + $0x6e8] sm:$0x7f] %v3756_v35 }
 0x502   :  { %3981 = vst [vmem:[%s9072_s7 + $0x6f0] sm:$0x7f] %v3757_v36  ;;  %3982 = vst [vmem:[%s9072_s7 + $0x6f8] sm:$0x7f] %v3758_v47 }

</bundles_post_ra>
